<compile_context>
chip_gen: v5e
topology: v5e:2x2
jax: 0.10.0
libtpu: 0.0.40
codegen_flags: <defaults>
</compile_context>

<pallas_src>
import functools

import numpy as np
import jax
import jax.numpy as jnp
from jax.experimental import pallas as pl
from jax.experimental.pallas import tpu as pltpu


def _vmem_limit_bytes():
    # ~3/4 of physical VMEM: 96 MiB on v5e/v6e (128 MiB), 48 MiB on v7x (64 MiB).
    cap = 64 * 1024 * 1024
    try:
        info = pltpu.get_tpu_info()
        cap = int(getattr(info, "vmem_capacity_bytes", cap) or cap)
    except Exception:
        pass
    return max(32 * 1024 * 1024, (cap * 3) // 4)


def _sigmoid(x):
    # exp rides the EUP slot; approx reciprocal stays off the VALU.
    return pl.reciprocal(1.0 + jnp.exp(-x), approx=True)


# ----------------------------------------------------------------------------
# Kernel 1: maxpool(2) + 1x1 conv + BN batch statistics for both streams.
#   grid = (2 streams, N samples); stream axis "parallel", sample axis
#   "arbitrary" (stats accumulate across it in VMEM scratch).
# ----------------------------------------------------------------------------
def _down_raw_kernel(rb_ref, db_ref, w_ref, sel_ref, gamma_ref, beta_ref,
                     y_ref, scale_ref, shift_ref,
                     sum_ref, ssq_ref, *, w2, inv_count, eps):
    s = pl.program_id(0)
    n = pl.program_id(1)
    n_last = pl.num_programs(1) - 1
    L = rb_ref.shape[-1]                                    # 4*H*W

    # Pick the stream for this grid half with a scalar blend (no branch); the
    # unused input's BlockSpec pins block 0 so it is DMA'd only once per half.
    t = (s == 0).astype(jnp.float32)
    x = t * rb_ref[0] + (1.0 - t) * db_ref[0]               # (Cin, L) f32

    # 2x2 max pool: max of 4 lane-shifted copies (valid at lanes (2y)*w2+2x),
    # compacted to (Cin, H*W) by a 0/1 selection matmul (MXU).
    m = jnp.maximum(jnp.maximum(x, pltpu.roll(x, L - 1, 1)),
                    jnp.maximum(pltpu.roll(x, L - w2, 1),
                                pltpu.roll(x, L - w2 - 1, 1)))
    pooled = jnp.dot(m, sel_ref[...], preferred_element_type=jnp.float32)

    # 1x1 conv (no bias); raw (un-normalized) result goes to HBM in bf16.
    y = jnp.dot(w_ref[...], pooled, preferred_element_type=jnp.float32)
    y_ref[0] = y.astype(y_ref.dtype)

    # Per-channel sum / sum-of-squares via ones-vector matmuls (MXU slot,
    # keeps the XLU free), accumulated across the sample axis.
    ones = jnp.ones((y.shape[1], 1), jnp.float32)
    bsum = jnp.dot(y, ones, preferred_element_type=jnp.float32)      # (Cout,1)
    bssq = jnp.dot(y * y, ones, preferred_element_type=jnp.float32)  # (Cout,1)

    @pl.when(n == 0)
    def _():
        sum_ref[...] = jnp.zeros_like(sum_ref)
        ssq_ref[...] = jnp.zeros_like(ssq_ref)

    sum_ref[...] += bsum
    ssq_ref[...] += bssq

    @pl.when(n == n_last)
    def _():
        mean = sum_ref[...] * inv_count
        var = jnp.maximum(ssq_ref[...] * inv_count - mean * mean, 0.0)
        rstd = jax.lax.rsqrt(var + eps)
        scale = gamma_ref[...] * rstd
        scale_ref[0] = scale
        shift_ref[0] = beta_ref[...] - mean * scale


def down_raw(r_before, d_before, w_down, gamma, beta, *, out_dtype=jnp.bfloat16):
    N, Cin, H2, W2 = r_before.shape
    H, W = H2 // 2, W2 // 2
    HW, L = H * W, H2 * W2
    Cout = w_down.shape[0]

    rb = r_before.reshape(N, Cin, L)        # free row-major reshapes
    db = d_before.reshape(N, Cin, L)

    # 0/1 selection matrix compacting lanes (2y)*2W + 2x  ->  y*W + x.
    q = jnp.arange(HW)
    src = (2 * (q // W)) * W2 + 2 * (q % W)
    sel = jnp.zeros((L, HW), jnp.float32).at[src, q].set(1.0)
    # TODO(synk): for very large H*W the (4HW, HW) selection matmul grows
    # quadratically; switch to an in-kernel strided-lane compaction there.

    kernel = functools.partial(_down_raw_kernel, w2=2 * W,
                               inv_count=1.0 / float(N * HW), eps=1e-5)
    return pl.pallas_call(
        kernel,
        grid=(2, N),
        in_specs=[
            pl.BlockSpec((1, Cin, L), lambda s, n: ((1 - s) * n, 0, 0)),  # r_before
            pl.BlockSpec((1, Cin, L), lambda s, n: (s * n, 0, 0)),        # d_before
            pl.BlockSpec((Cout, Cin), lambda s, n: (0, 0)),               # conv weight
            pl.BlockSpec((L, HW), lambda s, n: (0, 0)),                   # pool selector
            pl.BlockSpec((Cout, 1), lambda s, n: (0, 0)),                 # bn gamma
            pl.BlockSpec((Cout, 1), lambda s, n: (0, 0)),                 # bn beta
        ],
        out_specs=(
            pl.BlockSpec((1, Cout, HW), lambda s, n: (s * N + n, 0, 0)),  # raw conv
            pl.BlockSpec((1, Cout, 1), lambda s, n: (s, 0, 0)),           # bn scale
            pl.BlockSpec((1, Cout, 1), lambda s, n: (s, 0, 0)),           # bn shift
        ),
        out_shape=(jax.ShapeDtypeStruct((2 * N, Cout, HW), out_dtype),
                   jax.ShapeDtypeStruct((2, Cout, 1), jnp.float32),
                   jax.ShapeDtypeStruct((2, Cout, 1), jnp.float32)),
        scratch_shapes=[pltpu.VMEM((Cout, 1), jnp.float32),
                        pltpu.VMEM((Cout, 1), jnp.float32)],
        compiler_params=pltpu.CompilerParams(
            dimension_semantics=("parallel", "arbitrary"),
            vmem_limit_bytes=_vmem_limit_bytes()),
    )(rb, db, w_down, sel, gamma.reshape(Cout, 1), beta.reshape(Cout, 1))


# ----------------------------------------------------------------------------
# Kernel 2: BN-apply + ReLU + add -> channel-max -> 7x7 spatial attention ->
#           channel attention (both streams) -> r_out / d_out / cat(mul, add).
# One grid step = one sample; everything stays in VMEM.
# ----------------------------------------------------------------------------
def _fused_attn_kernel(r_ref, d_ref, yr_ref, yd_ref, bnsc_ref, bnsh_ref, wm_ref,
                       f1tr_ref, f2r_ref, f1td_ref, f2d_ref,
                       r_out_ref, d_out_ref, fuse_ref, *, W):
    C, HW = r_out_ref.shape[1], r_out_ref.shape[2]

    # Finish the Down stage: folded BatchNorm (scale/shift) + ReLU, then add.
    down_r = jnp.maximum(
        yr_ref[0].astype(jnp.float32) * bnsc_ref[0] + bnsh_ref[0], 0.0)
    down_d = jnp.maximum(
        yd_ref[0].astype(jnp.float32) * bnsc_ref[1] + bnsh_ref[1], 0.0)
    r_new = r_ref[0] + down_r                                      # (C, HW)
    d_new = d_ref[0] + down_d

    # Channel-wise max of r*d -> (1, HW), lane-dense.
    cmax = jnp.max(r_new * d_new, axis=0, keepdims=True)

    # 7x7 "same" conv on the flat map: stack the 7 vertical offsets on
    # sublanes (padded to 8 rows), then 6 horizontal lane rolls + weighted
    # sublane reduce.  Boundaries handled by the precomputed
    # (weight x validity) table wm (56, HW) = 7 dx-groups x 8 rows.
    subl = jax.lax.broadcasted_iota(jnp.int32, (8, 1), 0)
    stack = jnp.zeros((8, HW), jnp.float32)
    for j in range(7):
        dy = j - 3
        row = cmax if dy == 0 else pltpu.roll(cmax, (-dy * W) % HW, 1)
        stack = stack + jnp.where(subl == j, 1.0, 0.0) * row        # (8, HW)
    acc = jnp.zeros((8, HW), jnp.float32)
    for i in range(7):
        dx = i - 3
        shifted = stack if dx == 0 else pltpu.roll(stack, (-dx) % HW, 1)
        acc = acc + wm_ref[i * 8:(i + 1) * 8, :] * shifted
    sa = _sigmoid(jnp.sum(acc, axis=0, keepdims=True))              # (1, HW)

    # Channel attention: global max pool -> fc1 -> ReLU -> fc2 -> sigmoid.
    pr = jnp.max(r_new * sa, axis=1, keepdims=True)                 # (C, 1)
    pd = jnp.max(d_new * sa, axis=1, keepdims=True)
    if C >= 128:
        dn = (((0,), (0,)), ((), ()))                               # contract C (MXU)
        hr = jnp.maximum(jax.lax.dot_general(
            f1tr_ref[...], pr, dn, preferred_element_type=jnp.float32), 0.0)
        hd = jnp.maximum(jax.lax.dot_general(
            f1td_ref[...], pd, dn, preferred_element_type=jnp.float32), 0.0)
        car = _sigmoid(jnp.dot(f2r_ref[...], hr, preferred_element_type=jnp.float32))
        cad = _sigmoid(jnp.dot(f2d_ref[...], hd, preferred_element_type=jnp.float32))
    else:
        hr = jnp.maximum(jnp.sum(f1tr_ref[...] * pr, axis=0, keepdims=True), 0.0)
        hd = jnp.maximum(jnp.sum(f1td_ref[...] * pd, axis=0, keepdims=True), 0.0)
        car = _sigmoid(jnp.sum(f2r_ref[...] * hr, axis=1, keepdims=True))
        cad = _sigmoid(jnp.sum(f2d_ref[...] * hd, axis=1, keepdims=True))

    r_o = r_new * car
    d_o = d_new * cad
    r_out_ref[0] = r_o
    d_out_ref[0] = d_o
    fuse_ref[0, :C, :] = r_o * d_o          # cat([mul, add], dim=1) as two
    fuse_ref[0, C:, :] = r_o + d_o          # aligned sublane slices


# ----------------------------------------------------------------------------
# Full CFEM_Mid forward
# ----------------------------------------------------------------------------
def cfem_mid(r, d, r_before, d_before, params):
    assert r.shape == d.shape, 'rgb and depth should have same size'
    N, C, H, W = r.shape
    HW = H * W
    C16 = params['fc1_r'].shape[0]
    # lane/sublane alignment assumptions of the kernels below
    assert HW % 128 == 0 and C % 8 == 0, (
        "TODO(synk): pad H*W to a multiple of 128 (and C to 8) for odd shapes")

    y_raw, bn_scale, bn_shift = down_raw(
        r_before, d_before, params['w_down'], params['bn_gamma'],
        params['bn_beta'])

    # (weight x in-bounds validity) table for the 7x7 conv on the flat map,
    # grouped by horizontal offset: row i*8+j <-> (dx=i-3, dy=j-3); row 7 of
    # each group is zero so every group is an aligned (8, HW) slab.
    ys = jnp.arange(H).reshape(H, 1)
    xs = jnp.arange(W).reshape(1, W)
    rows = []
    for i in range(7):
        dx = i - 3
        for j in range(7):
            dy = j - 3
            ok = ((ys + dy >= 0) & (ys + dy < H) &
                  (xs + dx >= 0) & (xs + dx < W)).astype(jnp.float32)
            rows.append((params['w_sa'][dy + 3, dx + 3] * ok).reshape(1, HW))
        rows.append(jnp.zeros((1, HW), jnp.float32))
    wm = jnp.concatenate(rows, axis=0)                              # (56, HW)

    r3 = r.reshape(N, C, HW)
    d3 = d.reshape(N, C, HW)

    r_out, d_out, fuse = pl.pallas_call(
        functools.partial(_fused_attn_kernel, W=W),
        grid=(N,),
        in_specs=[
            pl.BlockSpec((1, C, HW), lambda n: (n, 0, 0)),          # r
            pl.BlockSpec((1, C, HW), lambda n: (n, 0, 0)),          # d
            pl.BlockSpec((1, C, HW), lambda n: (n, 0, 0)),          # raw conv (r side)
            pl.BlockSpec((1, C, HW), lambda n: (N + n, 0, 0)),      # raw conv (d side)
            pl.BlockSpec((2, C, 1), lambda n: (0, 0, 0)),           # bn scale
            pl.BlockSpec((2, C, 1), lambda n: (0, 0, 0)),           # bn shift
            pl.BlockSpec((56, HW), lambda n: (0, 0)),               # masked 7x7 weights
            pl.BlockSpec((C, C16), lambda n: (0, 0)),               # fc1_r.T
            pl.BlockSpec((C, C16), lambda n: (0, 0)),               # fc2_r
            pl.BlockSpec((C, C16), lambda n: (0, 0)),               # fc1_d.T
            pl.BlockSpec((C, C16), lambda n: (0, 0)),               # fc2_d
        ],
        out_specs=(
            pl.BlockSpec((1, C, HW), lambda n: (n, 0, 0)),
            pl.BlockSpec((1, C, HW), lambda n: (n, 0, 0)),
            pl.BlockSpec((1, 2 * C, HW), lambda n: (n, 0, 0)),
        ),
        out_shape=(jax.ShapeDtypeStruct((N, C, HW), jnp.float32),
                   jax.ShapeDtypeStruct((N, C, HW), jnp.float32),
                   jax.ShapeDtypeStruct((N, 2 * C, HW), jnp.float32)),
        compiler_params=pltpu.CompilerParams(
            dimension_semantics=("parallel",),
            vmem_limit_bytes=_vmem_limit_bytes()),
    )(r3, d3, y_raw, y_raw, bn_scale, bn_shift, wm,
      params['fc1_r'].T, params['fc2_r'], params['fc1_d'].T, params['fc2_d'])

    return (r_out.reshape(N, C, H, W),
            d_out.reshape(N, C, H, W),
            fuse.reshape(N, 2 * C, H, W))


# ----------------------------------------------------------------------------
# Pure-JAX reference of the PyTorch forward (for correctness checking)
# ----------------------------------------------------------------------------
def _ref_cfem_mid(r, d, r_before, d_before, params):
    eps = 1e-5
    hp = jax.lax.Precision.HIGHEST

    def down_ref(x):
        pooled = jax.lax.reduce_window(x, -jnp.inf, jax.lax.max,
                                       (1, 1, 2, 2), (1, 1, 2, 2), 'VALID')
        y = jnp.einsum('oc,nchw->nohw', params['w_down'], pooled, precision=hp)
        mean = y.mean(axis=(0, 2, 3), keepdims=True)
        var = ((y - mean) ** 2).mean(axis=(0, 2, 3), keepdims=True)
        yh = (y - mean) * jax.lax.rsqrt(var + eps)
        yh = yh * params['bn_gamma'].reshape(1, -1, 1, 1) + \
            params['bn_beta'].reshape(1, -1, 1, 1)
        return jnp.maximum(yh, 0.0)

    def spatial_attention_ref(x):
        m = jnp.max(x, axis=1, keepdims=True)
        wk = params['w_sa'].reshape(1, 1, 7, 7)
        y = jax.lax.conv_general_dilated(
            m, wk, (1, 1), ((3, 3), (3, 3)),
            dimension_numbers=('NCHW', 'OIHW', 'NCHW'), precision=hp)
        return jax.nn.sigmoid(y)

    def chan_attn_ref(x, fc1, fc2):
        p = jnp.max(x, axis=(2, 3))
        h = jnp.maximum(jnp.einsum('kc,nc->nk', fc1, p, precision=hp), 0.0)
        o = jnp.einsum('ck,nk->nc', fc2, h, precision=hp)
        return jax.nn.sigmoid(o)[:, :, None, None]

    r = r + down_ref(r_before)
    d = d + down_ref(d_before)
    sa = spatial_attention_ref(r * d)
    r_ca = chan_attn_ref(r * sa, params['fc1_r'], params['fc2_r'])
    d_ca = chan_attn_ref(d * sa, params['fc1_d'], params['fc2_d'])
    r_out = r * r_ca
    d_out = d * d_ca
    fuse = jnp.concatenate([r_out * d_out, r_out + d_out], axis=1)
    return r_out, d_out, fuse


if __name__ == "__main__":
    # small shapes; in_channel must be a multiple of 16 (ChannelAttention //16)
    N, C, H, W = 2, 32, 16, 16
    C2, C16 = C // 2, C // 16

    key = jax.random.PRNGKey(0)
    ks = jax.random.split(key, 12)
    params = {
        'w_down':   0.1 * jax.random.normal(ks[0], (C, C2), jnp.float32),   # Conv2d(C/2,C,1)
        'bn_gamma': 1.0 + 0.1 * jax.random.normal(ks[1], (C,), jnp.float32),
        'bn_beta':  0.1 * jax.random.normal(ks[2], (C,), jnp.float32),
        'w_sa':     0.1 * jax.random.normal(ks[3], (7, 7), jnp.float32),    # Conv2d(1,1,7)
        'fc1_r':    0.1 * jax.random.normal(ks[4], (C16, C), jnp.float32),  # Conv2d(C,C/16,1)
        'fc2_r':    0.1 * jax.random.normal(ks[5], (C, C16), jnp.float32),  # Conv2d(C/16,C,1)
        'fc1_d':    0.1 * jax.random.normal(ks[6], (C16, C), jnp.float32),
        'fc2_d':    0.1 * jax.random.normal(ks[7], (C, C16), jnp.float32),
    }

    r        = jax.random.normal(ks[8],  (N, C, H, W), jnp.float32)
    d        = jax.random.normal(ks[9],  (N, C, H, W), jnp.float32)
    r_before = jax.random.normal(ks[10], (N, C2, 2 * H, 2 * W), jnp.float32)
    d_before = jax.random.normal(ks[11], (N, C2, 2 * H, 2 * W), jnp.float32)

    fn = jax.jit(cfem_mid)
    r_out, d_out, fuse_fea = fn(r, d, r_before, d_before, params)
    jax.block_until_ready((r_out, d_out, fuse_fea))

    assert r_out.shape == (N, C, H, W)
    assert d_out.shape == (N, C, H, W)
    assert fuse_fea.shape == (N, 2 * C, H, W)

    # correctness check against the pure-JAX reference (2e-2: the Down
    # intermediate is intentionally stored in bfloat16 to halve HBM traffic)
    r_exp, d_exp, f_exp = jax.jit(_ref_cfem_mid)(r, d, r_before, d_before, params)
    np.testing.assert_allclose(np.asarray(r_out), np.asarray(r_exp), rtol=2e-2, atol=2e-2)
    np.testing.assert_allclose(np.asarray(d_out), np.asarray(d_exp), rtol=2e-2, atol=2e-2)
    np.testing.assert_allclose(np.asarray(fuse_fea), np.asarray(f_exp), rtol=2e-2, atol=2e-2)

    print("KERNEL_OK")
</pallas_src>

<mosaic_0001>
module attributes {stable_mosaic.version = 11 : i64} {
  func.func @_down_raw_kernel(%arg0: i32, %arg1: i32, %arg2: memref<1x16x1024xf32, #tpu.memory_space<vmem>>, %arg3: memref<1x16x1024xf32, #tpu.memory_space<vmem>>, %arg4: memref<32x16xf32, #tpu.memory_space<vmem>>, %arg5: memref<1024x256xf32, #tpu.memory_space<vmem>>, %arg6: memref<32x1xf32, #tpu.memory_space<vmem>>, %arg7: memref<32x1xf32, #tpu.memory_space<vmem>>, %arg8: memref<1x32x256xbf16, #tpu.memory_space<vmem>>, %arg9: memref<1x32x1xf32, #tpu.memory_space<vmem>>, %arg10: memref<1x32x1xf32, #tpu.memory_space<vmem>>, %arg11: memref<32x1xf32, #tpu.memory_space<vmem>>, %arg12: memref<32x1xf32, #tpu.memory_space<vmem>>) attributes {dimension_semantics = [#tpu.dimension_semantics<parallel>, #tpu.dimension_semantics<arbitrary>], iteration_bounds = array<i64: 2, 2>, scalar_prefetch = 0 : i64, scratch_operands = 2 : i64, tpu.core_type = #tpu.core_type<tc>, window_params = [{transform_indices = @transform_0, window_bounds = array<i64: 1, 16, 1024>}, {transform_indices = @transform_1, window_bounds = array<i64: 1, 16, 1024>}, {pipeline_mode = #tpu.pipeline_mode<synchronous>, transform_indices = @transform_2, window_bounds = array<i64: 32, 16>}, {pipeline_mode = #tpu.pipeline_mode<synchronous>, transform_indices = @transform_3, window_bounds = array<i64: 1024, 256>}, {pipeline_mode = #tpu.pipeline_mode<synchronous>, transform_indices = @transform_4, window_bounds = array<i64: 32, 1>}, {pipeline_mode = #tpu.pipeline_mode<synchronous>, transform_indices = @transform_5, window_bounds = array<i64: 32, 1>}, {transform_indices = @transform_6, window_bounds = array<i64: 1, 32, 256>}, {transform_indices = @transform_7, window_bounds = array<i64: 1, 32, 1>}, {transform_indices = @transform_8, window_bounds = array<i64: 1, 32, 1>}]} {
    %c0_i32 = arith.constant 0 : i32
    %0 = arith.cmpi eq, %arg0, %c0_i32 : i32
    %1 = arith.extui %0 : i1 to i32
    %2 = arith.sitofp %1 : i32 to f32
    %c0 = arith.constant 0 : index
    %c0_0 = arith.constant 0 : index
    %c0_1 = arith.constant 0 : index
    %3 = vector.load %arg2[%c0, %c0_0, %c0_1] : memref<1x16x1024xf32, #tpu.memory_space<vmem>>, vector<1x16x1024xf32>
    %4 = vector.shape_cast %3 : vector<1x16x1024xf32> to vector<16x1024xf32>
    %5 = vector.broadcast %2 : f32 to vector<16x1024xf32>
    %6 = arith.mulf %5, %4 : vector<16x1024xf32>
    %cst = arith.constant 1.000000e+00 : f32
    %7 = arith.subf %cst, %2 : f32
    %c0_2 = arith.constant 0 : index
    %c0_3 = arith.constant 0 : index
    %c0_4 = arith.constant 0 : index
    %8 = vector.load %arg3[%c0_2, %c0_3, %c0_4] : memref<1x16x1024xf32, #tpu.memory_space<vmem>>, vector<1x16x1024xf32>
    %9 = vector.shape_cast %8 : vector<1x16x1024xf32> to vector<16x1024xf32>
    %10 = vector.broadcast %7 : f32 to vector<16x1024xf32>
    %11 = arith.mulf %10, %9 : vector<16x1024xf32>
    %12 = arith.addf %6, %11 : vector<16x1024xf32>
    %c1023_i32 = arith.constant 1023 : i32
    %13 = tpu.dynamic_rotate %12 by %c1023_i32 dim 1 : vector<16x1024xf32>, i32 -> vector<16x1024xf32>
    %14 = arith.maximumf %12, %13 : vector<16x1024xf32>
    %c992_i32 = arith.constant 992 : i32
    %15 = tpu.dynamic_rotate %12 by %c992_i32 dim 1 : vector<16x1024xf32>, i32 -> vector<16x1024xf32>
    %c991_i32 = arith.constant 991 : i32
    %16 = tpu.dynamic_rotate %12 by %c991_i32 dim 1 : vector<16x1024xf32>, i32 -> vector<16x1024xf32>
    %17 = arith.maximumf %15, %16 : vector<16x1024xf32>
    %18 = arith.maximumf %14, %17 : vector<16x1024xf32>
    %c0_5 = arith.constant 0 : index
    %c0_6 = arith.constant 0 : index
    %19 = vector.load %arg5[%c0_5, %c0_6] : memref<1024x256xf32, #tpu.memory_space<vmem>>, vector<1024x256xf32>
    %cst_7 = arith.constant dense<0.000000e+00> : vector<16x256xf32>
    %20 = tpu.matmul %18, %19, %cst_7 {dimension_numbers = #tpu.dot_dimension_numbers<[1], [0], [0], [1], [0, 0, 1, 1], [], []>} : vector<16x1024xf32>, vector<1024x256xf32>, vector<16x256xf32> -> vector<16x256xf32>
    %c0_8 = arith.constant 0 : index
    %c0_9 = arith.constant 0 : index
    %21 = vector.load %arg4[%c0_8, %c0_9] : memref<32x16xf32, #tpu.memory_space<vmem>>, vector<32x16xf32>
    %cst_10 = arith.constant dense<0.000000e+00> : vector<32x256xf32>
    %22 = tpu.matmul %21, %20, %cst_10 {dimension_numbers = #tpu.dot_dimension_numbers<[1], [0], [0], [1], [0, 0, 1, 1], [], []>} : vector<32x16xf32>, vector<16x256xf32>, vector<32x256xf32> -> vector<32x256xf32>
    %23 = arith.truncf %22 : vector<32x256xf32> to vector<32x256xbf16>
    %c0_11 = arith.constant 0 : index
    %c0_12 = arith.constant 0 : index
    %c0_13 = arith.constant 0 : index
    %24 = vector.load %arg8[%c0_11, %c0_12, %c0_13] : memref<1x32x256xbf16, #tpu.memory_space<vmem>>, vector<1x32x256xbf16>
    %25 = vector.shape_cast %24 : vector<1x32x256xbf16> to vector<32x256xbf16>
    %26 = vector.shape_cast %23 : vector<32x256xbf16> to vector<1x32x256xbf16>
    tpu.vector_store %arg8[%c0_11, %c0_12, %c0_13], %26 {strides = array<i32>} : memref<1x32x256xbf16, #tpu.memory_space<vmem>>, vector<1x32x256xbf16>,
    %cst_14 = arith.constant 1.000000e+00 : f32
    %27 = vector.broadcast %cst_14 : f32 to vector<256x1xf32>
    %cst_15 = arith.constant dense<0.000000e+00> : vector<32x1xf32>
    %28 = tpu.matmul %22, %27, %cst_15 {dimension_numbers = #tpu.dot_dimension_numbers<[1], [0], [0], [1], [0, 0, 1, 1], [], []>} : vector<32x256xf32>, vector<256x1xf32>, vector<32x1xf32> -> vector<32x1xf32>
    %29 = arith.mulf %22, %22 : vector<32x256xf32>
    %cst_16 = arith.constant dense<0.000000e+00> : vector<32x1xf32>
    %30 = tpu.matmul %29, %27, %cst_16 {dimension_numbers = #tpu.dot_dimension_numbers<[1], [0], [0], [1], [0, 0, 1, 1], [], []>} : vector<32x256xf32>, vector<256x1xf32>, vector<32x1xf32> -> vector<32x1xf32>
    %c0_i32_17 = arith.constant 0 : i32
    %31 = arith.cmpi eq, %arg1, %c0_i32_17 : i32
    %32 = arith.extui %31 : i1 to i32
    %c0_i32_18 = arith.constant 0 : i32
    %33 = arith.cmpi ne, %32, %c0_i32_18 : i32
    scf.if %33 {
      %cst_28 = arith.constant 0.000000e+00 : f32
      %43 = vector.broadcast %cst_28 : f32 to vector<32x1xf32>
      %c0_29 = arith.constant 0 : index
      %c0_30 = arith.constant 0 : index
      %44 = vector.load %arg11[%c0_29, %c0_30] : memref<32x1xf32, #tpu.memory_space<vmem>>, vector<32x1xf32>
      tpu.vector_store %arg11[%c0_29, %c0_30], %43 {strides = array<i32>} : memref<32x1xf32, #tpu.memory_space<vmem>>, vector<32x1xf32>,
      %cst_31 = arith.constant 0.000000e+00 : f32
      %45 = vector.broadcast %cst_31 : f32 to vector<32x1xf32>
      %c0_32 = arith.constant 0 : index
      %c0_33 = arith.constant 0 : index
      %46 = vector.load %arg12[%c0_32, %c0_33] : memref<32x1xf32, #tpu.memory_space<vmem>>, vector<32x1xf32>
      tpu.vector_store %arg12[%c0_32, %c0_33], %45 {strides = array<i32>} : memref<32x1xf32, #tpu.memory_space<vmem>>, vector<32x1xf32>,
    } else {
    }
    %c0_19 = arith.constant 0 : index
    %c0_20 = arith.constant 0 : index
    %34 = vector.load %arg11[%c0_19, %c0_20] : memref<32x1xf32, #tpu.memory_space<vmem>>, vector<32x1xf32>
    %35 = arith.addf %34, %28 : vector<32x1xf32>
    %c0_21 = arith.constant 0 : index
    %c0_22 = arith.constant 0 : index
    %36 = vector.load %arg11[%c0_21, %c0_22] : memref<32x1xf32, #tpu.memory_space<vmem>>, vector<32x1xf32>
    tpu.vector_store %arg11[%c0_21, %c0_22], %35 {strides = array<i32>} : memref<32x1xf32, #tpu.memory_space<vmem>>, vector<32x1xf32>,
    %c0_23 = arith.constant 0 : index
    %c0_24 = arith.constant 0 : index
    %37 = vector.load %arg12[%c0_23, %c0_24] : memref<32x1xf32, #tpu.memory_space<vmem>>, vector<32x1xf32>
    %38 = arith.addf %37, %30 : vector<32x1xf32>
    %c0_25 = arith.constant 0 : index
    %c0_26 = arith.constant 0 : index
    %39 = vector.load %arg12[%c0_25, %c0_26] : memref<32x1xf32, #tpu.memory_space<vmem>>, vector<32x1xf32>
    tpu.vector_store %arg12[%c0_25, %c0_26], %38 {strides = array<i32>} : memref<32x1xf32, #tpu.memory_space<vmem>>, vector<32x1xf32>,
    %c1_i32 = arith.constant 1 : i32
    %40 = arith.cmpi eq, %arg1, %c1_i32 : i32
    %41 = arith.extui %40 : i1 to i32
    %c0_i32_27 = arith.constant 0 : i32
    %42 = arith.cmpi ne, %41, %c0_i32_27 : i32
    scf.if %42 {
      %c0_28 = arith.constant 0 : index
      %c0_29 = arith.constant 0 : index
      %43 = vector.load %arg11[%c0_28, %c0_29] : memref<32x1xf32, #tpu.memory_space<vmem>>, vector<32x1xf32>
      %cst_30 = arith.constant 0.001953125 : f32
      %44 = vector.broadcast %cst_30 : f32 to vector<32x1xf32>
      %45 = arith.mulf %43, %44 : vector<32x1xf32>
      %c0_31 = arith.constant 0 : index
      %c0_32 = arith.constant 0 : index
      %46 = vector.load %arg12[%c0_31, %c0_32] : memref<32x1xf32, #tpu.memory_space<vmem>>, vector<32x1xf32>
      %cst_33 = arith.constant 0.001953125 : f32
      %47 = vector.broadcast %cst_33 : f32 to vector<32x1xf32>
      %48 = arith.mulf %46, %47 : vector<32x1xf32>
      %49 = arith.mulf %45, %45 : vector<32x1xf32>
      %50 = arith.subf %48, %49 : vector<32x1xf32>
      %cst_34 = arith.constant 0.000000e+00 : f32
      %51 = vector.broadcast %cst_34 : f32 to vector<32x1xf32>
      %52 = arith.maximumf %50, %51 : vector<32x1xf32>
      %cst_35 = arith.constant 9.99999974E-6 : f32
      %53 = vector.broadcast %cst_35 : f32 to vector<32x1xf32>
      %54 = arith.addf %52, %53 : vector<32x1xf32>
      %55 = math.rsqrt %54 : vector<32x1xf32>
      %c0_36 = arith.constant 0 : index
      %c0_37 = arith.constant 0 : index
      %56 = vector.load %arg6[%c0_36, %c0_37] : memref<32x1xf32, #tpu.memory_space<vmem>>, vector<32x1xf32>
      %57 = arith.mulf %56, %55 : vector<32x1xf32>
      %c0_38 = arith.constant 0 : index
      %c0_39 = arith.constant 0 : index
      %c0_40 = arith.constant 0 : index
      %58 = vector.load %arg9[%c0_38, %c0_39, %c0_40] : memref<1x32x1xf32, #tpu.memory_space<vmem>>, vector<1x32x1xf32>
      %59 = vector.shape_cast %58 : vector<1x32x1xf32> to vector<32x1xf32>
      %60 = vector.shape_cast %57 : vector<32x1xf32> to vector<1x32x1xf32>
      tpu.vector_store %arg9[%c0_38, %c0_39, %c0_40], %60 {strides = array<i32>} : memref<1x32x1xf32, #tpu.memory_space<vmem>>, vector<1x32x1xf32>,
      %c0_41 = arith.constant 0 : index
      %c0_42 = arith.constant 0 : index
      %61 = vector.load %arg7[%c0_41, %c0_42] : memref<32x1xf32, #tpu.memory_space<vmem>>, vector<32x1xf32>
      %62 = arith.mulf %45, %57 : vector<32x1xf32>
      %63 = arith.subf %61, %62 : vector<32x1xf32>
      %c0_43 = arith.constant 0 : index
      %c0_44 = arith.constant 0 : index
      %c0_45 = arith.constant 0 : index
      %64 = vector.load %arg10[%c0_43, %c0_44, %c0_45] : memref<1x32x1xf32, #tpu.memory_space<vmem>>, vector<1x32x1xf32>
      %65 = vector.shape_cast %64 : vector<1x32x1xf32> to vector<32x1xf32>
      %66 = vector.shape_cast %63 : vector<32x1xf32> to vector<1x32x1xf32>
      tpu.vector_store %arg10[%c0_43, %c0_44, %c0_45], %66 {strides = array<i32>} : memref<1x32x1xf32, #tpu.memory_space<vmem>>, vector<1x32x1xf32>,
    } else {
    }
    return
  }
  func.func @transform_0(%arg0: i32, %arg1: i32) -> (i32, i32, i32) {
    %c1_i32 = arith.constant 1 : i32
    %0 = arith.subi %c1_i32, %arg0 : i32
    %1 = arith.muli %0, %arg1 : i32
    %c0_i32 = arith.constant 0 : i32
    %c0_i32_0 = arith.constant 0 : i32
    %c0_i32_1 = arith.constant 0 : i32
    return %1, %c0_i32, %c0_i32_0 : i32, i32, i32
  }
  func.func @transform_1(%arg0: i32, %arg1: i32) -> (i32, i32, i32) {
    %0 = arith.muli %arg0, %arg1 : i32
    %c0_i32 = arith.constant 0 : i32
    %c0_i32_0 = arith.constant 0 : i32
    %c0_i32_1 = arith.constant 0 : i32
    return %0, %c0_i32, %c0_i32_0 : i32, i32, i32
  }
  func.func @transform_2(%arg0: i32, %arg1: i32) -> (i32, i32) {
    %c0_i32 = arith.constant 0 : i32
    %c0_i32_0 = arith.constant 0 : i32
    %c0_i32_1 = arith.constant 0 : i32
    return %c0_i32, %c0_i32_0 : i32, i32
  }
  func.func @transform_3(%arg0: i32, %arg1: i32) -> (i32, i32) {
    %c0_i32 = arith.constant 0 : i32
    %c0_i32_0 = arith.constant 0 : i32
    %c0_i32_1 = arith.constant 0 : i32
    return %c0_i32, %c0_i32_0 : i32, i32
  }
  func.func @transform_4(%arg0: i32, %arg1: i32) -> (i32, i32) {
    %c0_i32 = arith.constant 0 : i32
    %c0_i32_0 = arith.constant 0 : i32
    %c0_i32_1 = arith.constant 0 : i32
    return %c0_i32, %c0_i32_0 : i32, i32
  }
  func.func @transform_5(%arg0: i32, %arg1: i32) -> (i32, i32) {
    %c0_i32 = arith.constant 0 : i32
    %c0_i32_0 = arith.constant 0 : i32
    %c0_i32_1 = arith.constant 0 : i32
    return %c0_i32, %c0_i32_0 : i32, i32
  }
  func.func @transform_6(%arg0: i32, %arg1: i32) -> (i32, i32, i32) {
    %c2_i32 = arith.constant 2 : i32
    %0 = arith.muli %arg0, %c2_i32 : i32
    %1 = arith.addi %0, %arg1 : i32
    %c0_i32 = arith.constant 0 : i32
    %c0_i32_0 = arith.constant 0 : i32
    %c0_i32_1 = arith.constant 0 : i32
    return %1, %c0_i32, %c0_i32_0 : i32, i32, i32
  }
  func.func @transform_7(%arg0: i32, %arg1: i32) -> (i32, i32, i32) {
    %c0_i32 = arith.constant 0 : i32
    %c0_i32_0 = arith.constant 0 : i32
    %c0_i32_1 = arith.constant 0 : i32
    return %arg0, %c0_i32, %c0_i32_0 : i32, i32, i32
  }
  func.func @transform_8(%arg0: i32, %arg1: i32) -> (i32, i32, i32) {
    %c0_i32 = arith.constant 0 : i32
    %c0_i32_0 = arith.constant 0 : i32
    %c0_i32_1 = arith.constant 0 : i32
    return %arg0, %c0_i32, %c0_i32_0 : i32, i32, i32
  }
}

module attributes {stable_mosaic.version = 11 : i64} {
  func.func @_fused_attn_kernel(%arg0: i32, %arg1: memref<1x32x256xf32, #tpu.memory_space<vmem>>, %arg2: memref<1x32x256xf32, #tpu.memory_space<vmem>>, %arg3: memref<1x32x256xbf16, #tpu.memory_space<vmem>>, %arg4: memref<1x32x256xbf16, #tpu.memory_space<vmem>>, %arg5: memref<2x32x1xf32, #tpu.memory_space<vmem>>, %arg6: memref<2x32x1xf32, #tpu.memory_space<vmem>>, %arg7: memref<56x256xf32, #tpu.memory_space<vmem>>, %arg8: memref<32x2xf32, #tpu.memory_space<vmem>>, %arg9: memref<32x2xf32, #tpu.memory_space<vmem>>, %arg10: memref<32x2xf32, #tpu.memory_space<vmem>>, %arg11: memref<32x2xf32, #tpu.memory_space<vmem>>, %arg12: memref<1x32x256xf32, #tpu.memory_space<vmem>>, %arg13: memref<1x32x256xf32, #tpu.memory_space<vmem>>, %arg14: memref<1x64x256xf32, #tpu.memory_space<vmem>>) attributes {dimension_semantics = [#tpu.dimension_semantics<parallel>], iteration_bounds = array<i64: 2>, scalar_prefetch = 0 : i64, scratch_operands = 0 : i64, tpu.core_type = #tpu.core_type<tc>, window_params = [{transform_indices = @transform_0, window_bounds = array<i64: 1, 32, 256>}, {transform_indices = @transform_1, window_bounds = array<i64: 1, 32, 256>}, {transform_indices = @transform_2, window_bounds = array<i64: 1, 32, 256>}, {transform_indices = @transform_3, window_bounds = array<i64: 1, 32, 256>}, {pipeline_mode = #tpu.pipeline_mode<synchronous>, transform_indices = @transform_4, window_bounds = array<i64: 2, 32, 1>}, {pipeline_mode = #tpu.pipeline_mode<synchronous>, transform_indices = @transform_5, window_bounds = array<i64: 2, 32, 1>}, {pipeline_mode = #tpu.pipeline_mode<synchronous>, transform_indices = @transform_6, window_bounds = array<i64: 56, 256>}, {pipeline_mode = #tpu.pipeline_mode<synchronous>, transform_indices = @transform_7, window_bounds = array<i64: 32, 2>}, {pipeline_mode = #tpu.pipeline_mode<synchronous>, transform_indices = @transform_8, window_bounds = array<i64: 32, 2>}, {pipeline_mode = #tpu.pipeline_mode<synchronous>, transform_indices = @transform_9, window_bounds = array<i64: 32, 2>}, {pipeline_mode = #tpu.pipeline_mode<synchronous>, transform_indices = @transform_10, window_bounds = array<i64: 32, 2>}, {transform_indices = @transform_11, window_bounds = array<i64: 1, 32, 256>}, {transform_indices = @transform_12, window_bounds = array<i64: 1, 32, 256>}, {transform_indices = @transform_13, window_bounds = array<i64: 1, 64, 256>}]} {
    %c0 = arith.constant 0 : index
    %c0_0 = arith.constant 0 : index
    %c0_1 = arith.constant 0 : index
    %0 = vector.load %arg3[%c0, %c0_0, %c0_1] : memref<1x32x256xbf16, #tpu.memory_space<vmem>>, vector<1x32x256xbf16>
    %1 = vector.shape_cast %0 : vector<1x32x256xbf16> to vector<32x256xbf16>
    %2 = arith.extf %1 : vector<32x256xbf16> to vector<32x256xf32>
    %c0_2 = arith.constant 0 : index
    %c0_3 = arith.constant 0 : index
    %c0_4 = arith.constant 0 : index
    %3 = vector.load %arg5[%c0_2, %c0_3, %c0_4] : memref<2x32x1xf32, #tpu.memory_space<vmem>>, vector<1x32x1xf32>
    %4 = vector.shape_cast %3 : vector<1x32x1xf32> to vector<32x1xf32>
    %5 = vector.broadcast %4 : vector<32x1xf32> to vector<32x256xf32>
    %6 = arith.mulf %2, %5 : vector<32x256xf32>
    %c0_5 = arith.constant 0 : index
    %c0_6 = arith.constant 0 : index
    %c0_7 = arith.constant 0 : index
    %7 = vector.load %arg6[%c0_5, %c0_6, %c0_7] : memref<2x32x1xf32, #tpu.memory_space<vmem>>, vector<1x32x1xf32>
    %8 = vector.shape_cast %7 : vector<1x32x1xf32> to vector<32x1xf32>
    %9 = vector.broadcast %8 : vector<32x1xf32> to vector<32x256xf32>
    %10 = arith.addf %6, %9 : vector<32x256xf32>
    %cst = arith.constant 0.000000e+00 : f32
    %11 = vector.broadcast %cst : f32 to vector<32x256xf32>
    %12 = arith.maximumf %10, %11 : vector<32x256xf32>
    %c0_8 = arith.constant 0 : index
    %c0_9 = arith.constant 0 : index
    %c0_10 = arith.constant 0 : index
    %13 = vector.load %arg4[%c0_8, %c0_9, %c0_10] : memref<1x32x256xbf16, #tpu.memory_space<vmem>>, vector<1x32x256xbf16>
    %14 = vector.shape_cast %13 : vector<1x32x256xbf16> to vector<32x256xbf16>
    %15 = arith.extf %14 : vector<32x256xbf16> to vector<32x256xf32>
    %c1 = arith.constant 1 : index
    %c0_11 = arith.constant 0 : index
    %c0_12 = arith.constant 0 : index
    %16 = vector.load %arg5[%c1, %c0_11, %c0_12] : memref<2x32x1xf32, #tpu.memory_space<vmem>>, vector<1x32x1xf32>
    %17 = vector.shape_cast %16 : vector<1x32x1xf32> to vector<32x1xf32>
    %18 = vector.broadcast %17 : vector<32x1xf32> to vector<32x256xf32>
    %19 = arith.mulf %15, %18 : vector<32x256xf32>
    %c1_13 = arith.constant 1 : index
    %c0_14 = arith.constant 0 : index
    %c0_15 = arith.constant 0 : index
    %20 = vector.load %arg6[%c1_13, %c0_14, %c0_15] : memref<2x32x1xf32, #tpu.memory_space<vmem>>, vector<1x32x1xf32>
    %21 = vector.shape_cast %20 : vector<1x32x1xf32> to vector<32x1xf32>
    %22 = vector.broadcast %21 : vector<32x1xf32> to vector<32x256xf32>
    %23 = arith.addf %19, %22 : vector<32x256xf32>
    %cst_16 = arith.constant 0.000000e+00 : f32
    %24 = vector.broadcast %cst_16 : f32 to vector<32x256xf32>
    %25 = arith.maximumf %23, %24 : vector<32x256xf32>
    %c0_17 = arith.constant 0 : index
    %c0_18 = arith.constant 0 : index
    %c0_19 = arith.constant 0 : index
    %26 = vector.load %arg1[%c0_17, %c0_18, %c0_19] : memref<1x32x256xf32, #tpu.memory_space<vmem>>, vector<1x32x256xf32>
    %27 = vector.shape_cast %26 : vector<1x32x256xf32> to vector<32x256xf32>
    %28 = arith.addf %27, %12 : vector<32x256xf32>
    %c0_20 = arith.constant 0 : index
    %c0_21 = arith.constant 0 : index
    %c0_22 = arith.constant 0 : index
    %29 = vector.load %arg2[%c0_20, %c0_21, %c0_22] : memref<1x32x256xf32, #tpu.memory_space<vmem>>, vector<1x32x256xf32>
    %30 = vector.shape_cast %29 : vector<1x32x256xf32> to vector<32x256xf32>
    %31 = arith.addf %30, %25 : vector<32x256xf32>
    %32 = arith.mulf %28, %31 : vector<32x256xf32>
    %cst_23 = arith.constant dense<0xFF800000> : vector<256xf32>
    %33 = vector.multi_reduction <maximumf>, %32, %cst_23 [0] : vector<32x256xf32> to vector<256xf32>
    %34 = vector.shape_cast %33 : vector<256xf32> to vector<1x256xf32>
    %35 = tpu.iota {dimensions = array<i32: 0>} : vector<8x1xi32>
    %cst_24 = arith.constant 0.000000e+00 : f32
    %36 = vector.broadcast %cst_24 : f32 to vector<8x256xf32>
    %c48_i32 = arith.constant 48 : i32
    %37 = tpu.dynamic_rotate %34 by %c48_i32 dim 1 : vector<1x256xf32>, i32 -> vector<1x256xf32>
    %c0_i32 = arith.constant 0 : i32
    %38 = vector.broadcast %c0_i32 : i32 to vector<8x1xi32>
    %39 = arith.cmpi eq, %35, %38 : vector<8x1xi32>
    %cst_25 = arith.constant 1.000000e+00 : f32
    %cst_26 = arith.constant 0.000000e+00 : f32
    %40 = vector.broadcast %cst_25 : f32 to vector<8x1xf32>
    %41 = vector.broadcast %cst_26 : f32 to vector<8x1xf32>
    %42 = arith.select %39, %40, %41 : vector<8x1xi1>, vector<8x1xf32>
    %43 = vector.broadcast %42 : vector<8x1xf32> to vector<8x256xf32>
    %44 = vector.broadcast %37 : vector<1x256xf32> to vector<8x256xf32>
    %45 = arith.mulf %43, %44 : vector<8x256xf32>
    %46 = arith.addf %36, %45 : vector<8x256xf32>
    %c32_i32 = arith.constant 32 : i32
    %47 = tpu.dynamic_rotate %34 by %c32_i32 dim 1 : vector<1x256xf32>, i32 -> vector<1x256xf32>
    %c1_i32 = arith.constant 1 : i32
    %48 = vector.broadcast %c1_i32 : i32 to vector<8x1xi32>
    %49 = arith.cmpi eq, %35, %48 : vector<8x1xi32>
    %cst_27 = arith.constant 1.000000e+00 : f32
    %cst_28 = arith.constant 0.000000e+00 : f32
    %50 = vector.broadcast %cst_27 : f32 to vector<8x1xf32>
    %51 = vector.broadcast %cst_28 : f32 to vector<8x1xf32>
    %52 = arith.select %49, %50, %51 : vector<8x1xi1>, vector<8x1xf32>
    %53 = vector.broadcast %52 : vector<8x1xf32> to vector<8x256xf32>
    %54 = vector.broadcast %47 : vector<1x256xf32> to vector<8x256xf32>
    %55 = arith.mulf %53, %54 : vector<8x256xf32>
    %56 = arith.addf %46, %55 : vector<8x256xf32>
    %c16_i32 = arith.constant 16 : i32
    %57 = tpu.dynamic_rotate %34 by %c16_i32 dim 1 : vector<1x256xf32>, i32 -> vector<1x256xf32>
    %c2_i32 = arith.constant 2 : i32
    %58 = vector.broadcast %c2_i32 : i32 to vector<8x1xi32>
    %59 = arith.cmpi eq, %35, %58 : vector<8x1xi32>
    %cst_29 = arith.constant 1.000000e+00 : f32
    %cst_30 = arith.constant 0.000000e+00 : f32
    %60 = vector.broadcast %cst_29 : f32 to vector<8x1xf32>
    %61 = vector.broadcast %cst_30 : f32 to vector<8x1xf32>
    %62 = arith.select %59, %60, %61 : vector<8x1xi1>, vector<8x1xf32>
    %63 = vector.broadcast %62 : vector<8x1xf32> to vector<8x256xf32>
    %64 = vector.broadcast %57 : vector<1x256xf32> to vector<8x256xf32>
    %65 = arith.mulf %63, %64 : vector<8x256xf32>
    %66 = arith.addf %56, %65 : vector<8x256xf32>
    %c3_i32 = arith.constant 3 : i32
    %67 = vector.broadcast %c3_i32 : i32 to vector<8x1xi32>
    %68 = arith.cmpi eq, %35, %67 : vector<8x1xi32>
    %cst_31 = arith.constant 1.000000e+00 : f32
    %cst_32 = arith.constant 0.000000e+00 : f32
    %69 = vector.broadcast %cst_31 : f32 to vector<8x1xf32>
    %70 = vector.broadcast %cst_32 : f32 to vector<8x1xf32>
    %71 = arith.select %68, %69, %70 : vector<8x1xi1>, vector<8x1xf32>
    %72 = vector.broadcast %71 : vector<8x1xf32> to vector<8x256xf32>
    %73 = vector.broadcast %34 : vector<1x256xf32> to vector<8x256xf32>
    %74 = arith.mulf %72, %73 : vector<8x256xf32>
    %75 = arith.addf %66, %74 : vector<8x256xf32>
    %c240_i32 = arith.constant 240 : i32
    %76 = tpu.dynamic_rotate %34 by %c240_i32 dim 1 : vector<1x256xf32>, i32 -> vector<1x256xf32>
    %c4_i32 = arith.constant 4 : i32
    %77 = vector.broadcast %c4_i32 : i32 to vector<8x1xi32>
    %78 = arith.cmpi eq, %35, %77 : vector<8x1xi32>
    %cst_33 = arith.constant 1.000000e+00 : f32
    %cst_34 = arith.constant 0.000000e+00 : f32
    %79 = vector.broadcast %cst_33 : f32 to vector<8x1xf32>
    %80 = vector.broadcast %cst_34 : f32 to vector<8x1xf32>
    %81 = arith.select %78, %79, %80 : vector<8x1xi1>, vector<8x1xf32>
    %82 = vector.broadcast %81 : vector<8x1xf32> to vector<8x256xf32>
    %83 = vector.broadcast %76 : vector<1x256xf32> to vector<8x256xf32>
    %84 = arith.mulf %82, %83 : vector<8x256xf32>
    %85 = arith.addf %75, %84 : vector<8x256xf32>
    %c224_i32 = arith.constant 224 : i32
    %86 = tpu.dynamic_rotate %34 by %c224_i32 dim 1 : vector<1x256xf32>, i32 -> vector<1x256xf32>
    %c5_i32 = arith.constant 5 : i32
    %87 = vector.broadcast %c5_i32 : i32 to vector<8x1xi32>
    %88 = arith.cmpi eq, %35, %87 : vector<8x1xi32>
    %cst_35 = arith.constant 1.000000e+00 : f32
    %cst_36 = arith.constant 0.000000e+00 : f32
    %89 = vector.broadcast %cst_35 : f32 to vector<8x1xf32>
    %90 = vector.broadcast %cst_36 : f32 to vector<8x1xf32>
    %91 = arith.select %88, %89, %90 : vector<8x1xi1>, vector<8x1xf32>
    %92 = vector.broadcast %91 : vector<8x1xf32> to vector<8x256xf32>
    %93 = vector.broadcast %86 : vector<1x256xf32> to vector<8x256xf32>
    %94 = arith.mulf %92, %93 : vector<8x256xf32>
    %95 = arith.addf %85, %94 : vector<8x256xf32>
    %c208_i32 = arith.constant 208 : i32
    %96 = tpu.dynamic_rotate %34 by %c208_i32 dim 1 : vector<1x256xf32>, i32 -> vector<1x256xf32>
    %c6_i32 = arith.constant 6 : i32
    %97 = vector.broadcast %c6_i32 : i32 to vector<8x1xi32>
    %98 = arith.cmpi eq, %35, %97 : vector<8x1xi32>
    %cst_37 = arith.constant 1.000000e+00 : f32
    %cst_38 = arith.constant 0.000000e+00 : f32
    %99 = vector.broadcast %cst_37 : f32 to vector<8x1xf32>
    %100 = vector.broadcast %cst_38 : f32 to vector<8x1xf32>
    %101 = arith.select %98, %99, %100 : vector<8x1xi1>, vector<8x1xf32>
    %102 = vector.broadcast %101 : vector<8x1xf32> to vector<8x256xf32>
    %103 = vector.broadcast %96 : vector<1x256xf32> to vector<8x256xf32>
    %104 = arith.mulf %102, %103 : vector<8x256xf32>
    %105 = arith.addf %95, %104 : vector<8x256xf32>
    %cst_39 = arith.constant 0.000000e+00 : f32
    %106 = vector.broadcast %cst_39 : f32 to vector<8x256xf32>
    %c3_i32_40 = arith.constant 3 : i32
    %107 = tpu.dynamic_rotate %105 by %c3_i32_40 dim 1 : vector<8x256xf32>, i32 -> vector<8x256xf32>
    %c0_41 = arith.constant 0 : index
    %c0_42 = arith.constant 0 : index
    %108 = vector.load %arg7[%c0_41, %c0_42] : memref<56x256xf32, #tpu.memory_space<vmem>>, vector<8x256xf32>
    %109 = arith.mulf %108, %107 : vector<8x256xf32>
    %110 = arith.addf %106, %109 : vector<8x256xf32>
    %c2_i32_43 = arith.constant 2 : i32
    %111 = tpu.dynamic_rotate %105 by %c2_i32_43 dim 1 : vector<8x256xf32>, i32 -> vector<8x256xf32>
    %c8 = arith.constant 8 : index
    %c0_44 = arith.constant 0 : index
    %112 = vector.load %arg7[%c8, %c0_44] : memref<56x256xf32, #tpu.memory_space<vmem>>, vector<8x256xf32>
    %113 = arith.mulf %112, %111 : vector<8x256xf32>
    %114 = arith.addf %110, %113 : vector<8x256xf32>
    %c1_i32_45 = arith.constant 1 : i32
    %115 = tpu.dynamic_rotate %105 by %c1_i32_45 dim 1 : vector<8x256xf32>, i32 -> vector<8x256xf32>
    %c16 = arith.constant 16 : index
    %c0_46 = arith.constant 0 : index
    %116 = vector.load %arg7[%c16, %c0_46] : memref<56x256xf32, #tpu.memory_space<vmem>>, vector<8x256xf32>
    %117 = arith.mulf %116, %115 : vector<8x256xf32>
    %118 = arith.addf %114, %117 : vector<8x256xf32>
    %c24 = arith.constant 24 : index
    %c0_47 = arith.constant 0 : index
    %119 = vector.load %arg7[%c24, %c0_47] : memref<56x256xf32, #tpu.memory_space<vmem>>, vector<8x256xf32>
    %120 = arith.mulf %119, %105 : vector<8x256xf32>
    %121 = arith.addf %118, %120 : vector<8x256xf32>
    %c255_i32 = arith.constant 255 : i32
    %122 = tpu.dynamic_rotate %105 by %c255_i32 dim 1 : vector<8x256xf32>, i32 -> vector<8x256xf32>
    %c32 = arith.constant 32 : index
    %c0_48 = arith.constant 0 : index
    %123 = vector.load %arg7[%c32, %c0_48] : memref<56x256xf32, #tpu.memory_space<vmem>>, vector<8x256xf32>
    %124 = arith.mulf %123, %122 : vector<8x256xf32>
    %125 = arith.addf %121, %124 : vector<8x256xf32>
    %c254_i32 = arith.constant 254 : i32
    %126 = tpu.dynamic_rotate %105 by %c254_i32 dim 1 : vector<8x256xf32>, i32 -> vector<8x256xf32>
    %c40 = arith.constant 40 : index
    %c0_49 = arith.constant 0 : index
    %127 = vector.load %arg7[%c40, %c0_49] : memref<56x256xf32, #tpu.memory_space<vmem>>, vector<8x256xf32>
    %128 = arith.mulf %127, %126 : vector<8x256xf32>
    %129 = arith.addf %125, %128 : vector<8x256xf32>
    %c253_i32 = arith.constant 253 : i32
    %130 = tpu.dynamic_rotate %105 by %c253_i32 dim 1 : vector<8x256xf32>, i32 -> vector<8x256xf32>
    %c48 = arith.constant 48 : index
    %c0_50 = arith.constant 0 : index
    %131 = vector.load %arg7[%c48, %c0_50] : memref<56x256xf32, #tpu.memory_space<vmem>>, vector<8x256xf32>
    %132 = arith.mulf %131, %130 : vector<8x256xf32>
    %133 = arith.addf %129, %132 : vector<8x256xf32>
    %cst_51 = arith.constant dense<0.000000e+00> : vector<256xf32>
    %134 = vector.multi_reduction <add>, %133, %cst_51 [0] : vector<8x256xf32> to vector<256xf32>
    %135 = vector.shape_cast %134 : vector<256xf32> to vector<1x256xf32>
    %cst_52 = arith.constant 0.000000e+00 : f32
    %136 = vector.broadcast %cst_52 : f32 to vector<1x256xf32>
    %137 = arith.subf %136, %135 : vector<1x256xf32>
    %138 = math.exp %137 : vector<1x256xf32>
    %cst_53 = arith.constant 1.000000e+00 : f32
    %139 = vector.broadcast %cst_53 : f32 to vector<1x256xf32>
    %140 = arith.addf %139, %138 : vector<1x256xf32>
    %141 = tpu.reciprocal %140 {approx = true} : vector<1x256xf32> -> vector<1x256xf32>
    %142 = vector.broadcast %141 : vector<1x256xf32> to vector<32x256xf32>
    %143 = arith.mulf %28, %142 : vector<32x256xf32>
    %cst_54 = arith.constant dense<0xFF800000> : vector<32xf32>
    %144 = vector.multi_reduction <maximumf>, %143, %cst_54 [1] : vector<32x256xf32> to vector<32xf32>
    %145 = vector.shape_cast %144 : vector<32xf32> to vector<32x1xf32>
    %146 = vector.broadcast %141 : vector<1x256xf32> to vector<32x256xf32>
    %147 = arith.mulf %31, %146 : vector<32x256xf32>
    %cst_55 = arith.constant dense<0xFF800000> : vector<32xf32>
    %148 = vector.multi_reduction <maximumf>, %147, %cst_55 [1] : vector<32x256xf32> to vector<32xf32>
    %149 = vector.shape_cast %148 : vector<32xf32> to vector<32x1xf32>
    %c0_56 = arith.constant 0 : index
    %c0_57 = arith.constant 0 : index
    %150 = vector.load %arg8[%c0_56, %c0_57] : memref<32x2xf32, #tpu.memory_space<vmem>>, vector<32x2xf32>
    %151 = vector.broadcast %145 : vector<32x1xf32> to vector<32x2xf32>
    %152 = arith.mulf %150, %151 : vector<32x2xf32>
    %cst_58 = arith.constant dense<0.000000e+00> : vector<2xf32>
    %153 = vector.multi_reduction <add>, %152, %cst_58 [0] : vector<32x2xf32> to vector<2xf32>
    %154 = vector.shape_cast %153 : vector<2xf32> to vector<1x2xf32>
    %cst_59 = arith.constant 0.000000e+00 : f32
    %155 = vector.broadcast %cst_59 : f32 to vector<1x2xf32>
    %156 = arith.maximumf %154, %155 : vector<1x2xf32>
    %c0_60 = arith.constant 0 : index
    %c0_61 = arith.constant 0 : index
    %157 = vector.load %arg10[%c0_60, %c0_61] : memref<32x2xf32, #tpu.memory_space<vmem>>, vector<32x2xf32>
    %158 = vector.broadcast %149 : vector<32x1xf32> to vector<32x2xf32>
    %159 = arith.mulf %157, %158 : vector<32x2xf32>
    %cst_62 = arith.constant dense<0.000000e+00> : vector<2xf32>
    %160 = vector.multi_reduction <add>, %159, %cst_62 [0] : vector<32x2xf32> to vector<2xf32>
    %161 = vector.shape_cast %160 : vector<2xf32> to vector<1x2xf32>
    %cst_63 = arith.constant 0.000000e+00 : f32
    %162 = vector.broadcast %cst_63 : f32 to vector<1x2xf32>
    %163 = arith.maximumf %161, %162 : vector<1x2xf32>
    %c0_64 = arith.constant 0 : index
    %c0_65 = arith.constant 0 : index
    %164 = vector.load %arg9[%c0_64, %c0_65] : memref<32x2xf32, #tpu.memory_space<vmem>>, vector<32x2xf32>
    %165 = vector.broadcast %156 : vector<1x2xf32> to vector<32x2xf32>
    %166 = arith.mulf %164, %165 : vector<32x2xf32>
    %cst_66 = arith.constant dense<0.000000e+00> : vector<32xf32>
    %167 = vector.multi_reduction <add>, %166, %cst_66 [1] : vector<32x2xf32> to vector<32xf32>
    %168 = vector.shape_cast %167 : vector<32xf32> to vector<32x1xf32>
    %cst_67 = arith.constant 0.000000e+00 : f32
    %169 = vector.broadcast %cst_67 : f32 to vector<32x1xf32>
    %170 = arith.subf %169, %168 : vector<32x1xf32>
    %171 = math.exp %170 : vector<32x1xf32>
    %cst_68 = arith.constant 1.000000e+00 : f32
    %172 = vector.broadcast %cst_68 : f32 to vector<32x1xf32>
    %173 = arith.addf %172, %171 : vector<32x1xf32>
    %174 = tpu.reciprocal %173 {approx = true} : vector<32x1xf32> -> vector<32x1xf32>
    %c0_69 = arith.constant 0 : index
    %c0_70 = arith.constant 0 : index
    %175 = vector.load %arg11[%c0_69, %c0_70] : memref<32x2xf32, #tpu.memory_space<vmem>>, vector<32x2xf32>
    %176 = vector.broadcast %163 : vector<1x2xf32> to vector<32x2xf32>
    %177 = arith.mulf %175, %176 : vector<32x2xf32>
    %cst_71 = arith.constant dense<0.000000e+00> : vector<32xf32>
    %178 = vector.multi_reduction <add>, %177, %cst_71 [1] : vector<32x2xf32> to vector<32xf32>
    %179 = vector.shape_cast %178 : vector<32xf32> to vector<32x1xf32>
    %cst_72 = arith.constant 0.000000e+00 : f32
    %180 = vector.broadcast %cst_72 : f32 to vector<32x1xf32>
    %181 = arith.subf %180, %179 : vector<32x1xf32>
    %182 = math.exp %181 : vector<32x1xf32>
    %cst_73 = arith.constant 1.000000e+00 : f32
    %183 = vector.broadcast %cst_73 : f32 to vector<32x1xf32>
    %184 = arith.addf %183, %182 : vector<32x1xf32>
    %185 = tpu.reciprocal %184 {approx = true} : vector<32x1xf32> -> vector<32x1xf32>
    %186 = vector.broadcast %174 : vector<32x1xf32> to vector<32x256xf32>
    %187 = arith.mulf %28, %186 : vector<32x256xf32>
    %188 = vector.broadcast %185 : vector<32x1xf32> to vector<32x256xf32>
    %189 = arith.mulf %31, %188 : vector<32x256xf32>
    %c0_74 = arith.constant 0 : index
    %c0_75 = arith.constant 0 : index
    %c0_76 = arith.constant 0 : index
    %190 = vector.load %arg12[%c0_74, %c0_75, %c0_76] : memref<1x32x256xf32, #tpu.memory_space<vmem>>, vector<1x32x256xf32>
    %191 = vector.shape_cast %190 : vector<1x32x256xf32> to vector<32x256xf32>
    %192 = vector.shape_cast %187 : vector<32x256xf32> to vector<1x32x256xf32>
    tpu.vector_store %arg12[%c0_74, %c0_75, %c0_76], %192 {strides = array<i32>} : memref<1x32x256xf32, #tpu.memory_space<vmem>>, vector<1x32x256xf32>,
    %c0_77 = arith.constant 0 : index
    %c0_78 = arith.constant 0 : index
    %c0_79 = arith.constant 0 : index
    %193 = vector.load %arg13[%c0_77, %c0_78, %c0_79] : memref<1x32x256xf32, #tpu.memory_space<vmem>>, vector<1x32x256xf32>
    %194 = vector.shape_cast %193 : vector<1x32x256xf32> to vector<32x256xf32>
    %195 = vector.shape_cast %189 : vector<32x256xf32> to vector<1x32x256xf32>
    tpu.vector_store %arg13[%c0_77, %c0_78, %c0_79], %195 {strides = array<i32>} : memref<1x32x256xf32, #tpu.memory_space<vmem>>, vector<1x32x256xf32>,
    %196 = arith.mulf %187, %189 : vector<32x256xf32>
    %c0_80 = arith.constant 0 : index
    %c0_81 = arith.constant 0 : index
    %c0_82 = arith.constant 0 : index
    %197 = vector.load %arg14[%c0_80, %c0_81, %c0_82] : memref<1x64x256xf32, #tpu.memory_space<vmem>>, vector<1x32x256xf32>
    %198 = vector.shape_cast %197 : vector<1x32x256xf32> to vector<32x256xf32>
    %199 = vector.shape_cast %196 : vector<32x256xf32> to vector<1x32x256xf32>
    tpu.vector_store %arg14[%c0_80, %c0_81, %c0_82], %199 {strides = array<i32>} : memref<1x64x256xf32, #tpu.memory_space<vmem>>, vector<1x32x256xf32>,
    %200 = arith.addf %187, %189 : vector<32x256xf32>
    %c0_83 = arith.constant 0 : index
    %c32_84 = arith.constant 32 : index
    %c0_85 = arith.constant 0 : index
    %201 = vector.load %arg14[%c0_83, %c32_84, %c0_85] : memref<1x64x256xf32, #tpu.memory_space<vmem>>, vector<1x32x256xf32>
    %202 = vector.shape_cast %201 : vector<1x32x256xf32> to vector<32x256xf32>
    %203 = vector.shape_cast %200 : vector<32x256xf32> to vector<1x32x256xf32>
    tpu.vector_store %arg14[%c0_83, %c32_84, %c0_85], %203 {strides = array<i32>} : memref<1x64x256xf32, #tpu.memory_space<vmem>>, vector<1x32x256xf32>,
    return
  }
  func.func @transform_0(%arg0: i32) -> (i32, i32, i32) {
    %c0_i32 = arith.constant 0 : i32
    %c0_i32_0 = arith.constant 0 : i32
    %c0_i32_1 = arith.constant 0 : i32
    return %arg0, %c0_i32, %c0_i32_0 : i32, i32, i32
  }
  func.func @transform_1(%arg0: i32) -> (i32, i32, i32) {
    %c0_i32 = arith.constant 0 : i32
    %c0_i32_0 = arith.constant 0 : i32
    %c0_i32_1 = arith.constant 0 : i32
    return %arg0, %c0_i32, %c0_i32_0 : i32, i32, i32
  }
  func.func @transform_2(%arg0: i32) -> (i32, i32, i32) {
    %c0_i32 = arith.constant 0 : i32
    %c0_i32_0 = arith.constant 0 : i32
    %c0_i32_1 = arith.constant 0 : i32
    return %arg0, %c0_i32, %c0_i32_0 : i32, i32, i32
  }
  func.func @transform_3(%arg0: i32) -> (i32, i32, i32) {
    %c2_i32 = arith.constant 2 : i32
    %0 = arith.addi %c2_i32, %arg0 : i32
    %c0_i32 = arith.constant 0 : i32
    %c0_i32_0 = arith.constant 0 : i32
    %c0_i32_1 = arith.constant 0 : i32
    return %0, %c0_i32, %c0_i32_0 : i32, i32, i32
  }
  func.func @transform_4(%arg0: i32) -> (i32, i32, i32) {
    %c0_i32 = arith.constant 0 : i32
    %c0_i32_0 = arith.constant 0 : i32
    %c0_i32_1 = arith.constant 0 : i32
    %c0_i32_2 = arith.constant 0 : i32
    return %c0_i32, %c0_i32_0, %c0_i32_1 : i32, i32, i32
  }
  func.func @transform_5(%arg0: i32) -> (i32, i32, i32) {
    %c0_i32 = arith.constant 0 : i32
    %c0_i32_0 = arith.constant 0 : i32
    %c0_i32_1 = arith.constant 0 : i32
    %c0_i32_2 = arith.constant 0 : i32
    return %c0_i32, %c0_i32_0, %c0_i32_1 : i32, i32, i32
  }
  func.func @transform_6(%arg0: i32) -> (i32, i32) {
    %c0_i32 = arith.constant 0 : i32
    %c0_i32_0 = arith.constant 0 : i32
    %c0_i32_1 = arith.constant 0 : i32
    return %c0_i32, %c0_i32_0 : i32, i32
  }
  func.func @transform_7(%arg0: i32) -> (i32, i32) {
    %c0_i32 = arith.constant 0 : i32
    %c0_i32_0 = arith.constant 0 : i32
    %c0_i32_1 = arith.constant 0 : i32
    return %c0_i32, %c0_i32_0 : i32, i32
  }
  func.func @transform_8(%arg0: i32) -> (i32, i32) {
    %c0_i32 = arith.constant 0 : i32
    %c0_i32_0 = arith.constant 0 : i32
    %c0_i32_1 = arith.constant 0 : i32
    return %c0_i32, %c0_i32_0 : i32, i32
  }
  func.func @transform_9(%arg0: i32) -> (i32, i32) {
    %c0_i32 = arith.constant 0 : i32
    %c0_i32_0 = arith.constant 0 : i32
    %c0_i32_1 = arith.constant 0 : i32
    return %c0_i32, %c0_i32_0 : i32, i32
  }
  func.func @transform_10(%arg0: i32) -> (i32, i32) {
    %c0_i32 = arith.constant 0 : i32
    %c0_i32_0 = arith.constant 0 : i32
    %c0_i32_1 = arith.constant 0 : i32
    return %c0_i32, %c0_i32_0 : i32, i32
  }
  func.func @transform_11(%arg0: i32) -> (i32, i32, i32) {
    %c0_i32 = arith.constant 0 : i32
    %c0_i32_0 = arith.constant 0 : i32
    %c0_i32_1 = arith.constant 0 : i32
    return %arg0, %c0_i32, %c0_i32_0 : i32, i32, i32
  }
  func.func @transform_12(%arg0: i32) -> (i32, i32, i32) {
    %c0_i32 = arith.constant 0 : i32
    %c0_i32_0 = arith.constant 0 : i32
    %c0_i32_1 = arith.constant 0 : i32
    return %arg0, %c0_i32, %c0_i32_0 : i32, i32, i32
  }
  func.func @transform_13(%arg0: i32) -> (i32, i32, i32) {
    %c0_i32 = arith.constant 0 : i32
    %c0_i32_0 = arith.constant 0 : i32
    %c0_i32_1 = arith.constant 0 : i32
    return %arg0, %c0_i32, %c0_i32_0 : i32, i32, i32
  }
}

</mosaic_0001>

<bundles_post_ra>
// kernel: cfem_mid.3
= control target key start
LH: loop header
LB: loop body
LE: loop exit
PB: predicated region body
PF: predicated region fallthrough
CT: control target
= control target key end

     0   :  { %s1546_s25 = smov 0   ;;  %s1940_s0 = inlined_call_operand.vmem [shape: f32[2,32,256], index: 0, kind: input, shape index: {}]   ;;  %s1941_s1 = inlined_call_operand.vmem [shape: f32[2,32,256], index: 1, kind: input, shape index: {}]   ;;  %s1942_s2 = inlined_call_operand.vmem [shape: bf16[4,32,256], index: 2, kind: input, shape index: {}, may-alias: {2,3}]   ;;  %s1943_s3 = inlined_call_operand.vmem [shape: bf16[4,32,256], index: 3, kind: input, shape index: {}, may-alias: {2,3}]   ;;  %s1944_s4 = inlined_call_operand.vmem [shape: f32[2,32,1], index: 4, kind: input, shape index: {}]   ;;  %s1945_s5 = inlined_call_operand.vmem [shape: f32[2,32,1], index: 5, kind: input, shape index: {}]   ;;  %s1946_s6 = inlined_call_operand.vmem [shape: f32[56,256], index: 6, kind: input, shape index: {}]   ;;  %s1947_s7 = inlined_call_operand.vmem [shape: f32[32,2], index: 7, kind: input, shape index: {}]   ;;  %s1948_s8 = inlined_call_operand.vmem [shape: f32[32,2], index: 8, kind: input, shape index: {}]   ;;  %s1949_s9 = inlined_call_operand.vmem [shape: f32[32,2], index: 9, kind: input, shape index: {}]   ;;  %s1950_s10 = inlined_call_operand.vmem [shape: f32[32,2], index: 10, kind: input, shape index: {}]   ;;  %s1951_s11 = inlined_call_operand.vmem [shape: f32[2,32,256], index: 11, kind: output, shape index: {0}]   ;;  %s1952_s12 = inlined_call_operand.vmem [shape: f32[2,32,256], index: 12, kind: output, shape index: {1}]   ;;  %s1953_s13 = inlined_call_operand.vmem [shape: f32[2,64,256], index: 13, kind: output, shape index: {2}]  }
   0x1 LB: > { %s1552_s26 = sadd.s32 4294967295, %s1460_s25   ;;  %p1357_p0 = scmp.ge.s32.totalorder %s1460_s25, 1  ;;  %s1460_s25 = sphi %s1546_s25, %s24_s25  }
   0x2   : > { %p426_p1 = scmp.lt.s32.totalorder %s1460_s25, 3 }
   0x4   : > { %p427_p2 = pnand %p1357_p0, %p426_p1 }
   0x5   : > { %p506_p3 = scmp.lt.s32.totalorder (!%p427_p2), %s1552_s26, 3  ;;  %s511_s29 = sadd.s32 (!%p427_p2), 2, %s1552_s26 }
   0x6   : > { %430 = sbr.rel (%p427_p2) target bundleno = 847 (0x34f), region = 64  ;;  %p512_p4 = scmp.lt.s32.totalorder (!%p427_p2), %s511_s29, 3 }
   0x7   : > { %p496_p5 = scmp.lt.s32.totalorder (!%p427_p2), %s1552_s26, 1  ;;  %s1464_s15 = smov (!%p427_p2), 32  }
   0x8   : > { %s1465_s16 = smov (!%p427_p2), 16   ;;  %s1468_s19 = smov (!%p427_p2), 80  }
   0x9   : > { %s1470_s20 = smov (!%p427_p2), 3   ;;  %s1472_s23 = smov (!%p427_p2), 1  }
   0xa   : > { %s1473_s24 = smov (!%p427_p2), 127   ;;  %s1475_s28 = smov (!%p427_p2), 125  }
   0xb   : > { %v1372_v0 = vld [vmem:[%s1944_s4 + $0x20] sm:$0xff]  ;;  %v547_v1 = vld [vmem:[%s1944_s4 + $0x10] sm:$0xff]  ;;  %v1462_v3 = vmov 0   ;;  %v1373_v4 = vld [vmem:[%s1944_s4 + $0x28] sm:$0xff]  ;;  %s507_s30 = scalar_select %p506_p3, %s1552_s26, 3 }
   0xc   : > { %v545_v2 = vld [vmem:[%s1944_s4] sm:$0xff]  ;;  %1413 = vset.pattern.permute.xlu2 %v1462_v3  ;;  %1412 = vset.pattern.permute.xlu1 %v1462_v3  ;;  %v548_v5 = vld [vmem:[%s1944_s4 + $0x18] sm:$0xff]  ;;  %v546_v6 = vld [vmem:[%s1944_s4 + $0x8] sm:$0xff]  ;;  %s1955_s29 = smov (!%p512_p4, %s511_s29), 3  ;;  %s1957_s26 = smov (!%p496_p5, %s1552_s26), 1 }
   0xd   : > { %1411 = vset.pattern.permute.xlu0 %v1462_v3  ;;  %636 = vperm.xlu2 %1413, %v1372_v0   ;;  %v577_v7 = vld [vmem:[%s1945_s5] sm:$0xff]  ;;  %v1375_v8 = vld [vmem:[%s1944_s4 + $0x38] sm:$0xff]  ;;  %v1374_v9 = vld [vmem:[%s1944_s4 + $0x30] sm:$0xff]  ;;  %s1384_s14 = sshll.u32 %s507_s30, 5  ;;  %s1385_s18 = sshll.u32 %s1955_s29, 5 }
   0xe   : > { %561 = vperm.xlu1 %1412, %v547_v1   ;;  %551 = vperm.xlu0 %1411, %v545_v2   ;;  %v580_v10 = vld [vmem:[%s1945_s5 + $0x18] sm:$0xff]  ;;  %v579_v11 = vld [vmem:[%s1945_s5 + $0x10] sm:$0xff]  ;;  %v578_v12 = vld [vmem:[%s1945_s5 + $0x8] sm:$0xff]  ;;  %s510_s17 = scalar_lea.vmem %s1942_s2, %s1384_s14  ;;  %s1615_s21 = scalar_lea.vmem %s1943_s3, %s1385_s18 }
   0xf   : > { %v1378_v13 = vld [vmem:[%s1945_s5 + $0x30] sm:$0xff]  ;;  %v1377_v14 = vld [vmem:[%s1945_s5 + $0x28] sm:$0xff]  ;;  %v1376_v15 = vld [vmem:[%s1945_s5 + $0x20] sm:$0xff]  ;;  %s1625_s22 = sshll.u32 %s1957_s26, 6  ;;  %s1463_s14 = smov 48  }
  0x10   : > { %v1379_v16 = vld [vmem:[%s1945_s5 + $0x38] sm:$0xff]  ;;  %v533_v26 = vld [vmem:[%s510_s17] sm:$0xff]  ;;  %v618_v31 = vld [vmem:[%s1615_s21 + $0x8] sm:$0xff]  ;;  %s1631_s27 = scalar_lea.vmem %s1940_s0, %s1625_s22  ;;  %s1640_s30 = scalar_lea.vmem %s1941_s1, %s1625_s22 }
  0x11   : > { %v537_v27 = vunpack.c.l.bf16 %v533_v26  ;;  %v538_v28 = vunpack.c.h.bf16 %v533_v26  ;;  %v617_v29 = vld [vmem:[%s1615_s21] sm:$0xff]  ;;  %v536_v30 = vld [vmem:[%s510_s17 + $0x18] sm:$0xff]  ;;  %v535_v32 = vld [vmem:[%s510_s17 + $0x10] sm:$0xff]  ;;  %v623_v44 = vunpack.c.l.bf16 %v618_v31  ;;  %v624_v45 = vunpack.c.h.bf16 %v618_v31  ;;  %s1467_s18 = smov 96  }
  0x12   : > { %v619_v38 = vld [vmem:[%s1615_s21 + $0x10] sm:$0xff]  ;;  %v621_v39 = vunpack.c.l.bf16 %v617_v29  ;;  %v622_v40 = vunpack.c.h.bf16 %v617_v29  ;;  %v543_v41 = vunpack.c.l.bf16 %v536_v30  ;;  %v544_v42 = vunpack.c.h.bf16 %v536_v30  ;;  %v534_v43 = vld [vmem:[%s510_s17 + $0x8] sm:$0xff]  ;;  %v620_v0 = vld [vmem:[%s1615_s21 + $0x18] sm:$0xff]  ;;  %s1466_s17 = smov 112   ;;  %s1471_s21 = smov 2  }
  0x13   : > { %v541_v46 = vunpack.c.l.bf16 %v535_v32  ;;  %v542_v47 = vunpack.c.h.bf16 %v535_v32  ;;  %v625_v50 = vunpack.c.l.bf16 %v619_v38  ;;  %v626_v51 = vunpack.c.h.bf16 %v619_v38 }
  0x14   : > { %v539_v52 = vunpack.c.l.bf16 %v534_v43  ;;  %v540_v53 = vunpack.c.h.bf16 %v534_v43 }
  0x15   : > { %641 = vperm.xlu2 %1413, %v1373_v4  }
  0x16   : > { %566 = vperm.xlu1 %1412, %v548_v5   ;;  %556 = vperm.xlu0 %1411, %v546_v6  }
  0x1d   : > { %583 = vperm.xlu2 %1413, %v577_v7  }
  0x1e   : > { %651 = vperm.xlu1 %1412, %v1375_v8   ;;  %646 = vperm.xlu0 %1411, %v1374_v9   ;;  %v703_v9 = vld [vmem:[%s1631_s27] sm:$0xff] }
  0x25   : > { %598 = vperm.xlu2 %1413, %v580_v10   ;;  %v704_v10 = vld [vmem:[%s1631_s27 + $0x8] sm:$0xff] }
  0x26   : > { %593 = vperm.xlu1 %1412, %v579_v11   ;;  %588 = vperm.xlu0 %1411, %v578_v12  }
  0x2d   : > { %679 = vperm.xlu2 %1413, %v1378_v13  }
  0x2e   : > { %674 = vperm.xlu1 %1412, %v1377_v14   ;;  %669 = vperm.xlu0 %1411, %v1376_v15  }
  0x36   : > { %684 = vperm.xlu0 %1411, %v1379_v16   ;;  %v627_v16 = vunpack.c.l.bf16 %v620_v0 }
  0x67   : > { %v637_v17 = vpop.permute.xlu2 %636 }
  0x68   : > { %v654_v54 = vmul.f32 %v637_v17, %v621_v39  ;;  %v655_v55 = vmul.f32 %v637_v17, %v622_v40  ;;  %v628_v17 = vunpack.c.h.bf16 %v620_v0  ;;  %v723_v39 = vld [vmem:[%s1640_s30 + $0x20] sm:$0xff] }
  0x69   : > { %v707_v40 = vld [vmem:[%s1631_s27 + $0x20] sm:$0xff] }
  0x6f   : > { %v642_v20 = vpop.permute.xlu2 %641 }
  0x70   : > { %v656_v58 = vmul.f32 %v642_v20, %v623_v44  ;;  %v657_v59 = vmul.f32 %v642_v20, %v624_v45 }
  0x77   : > { %v584_v23 = vpop.permute.xlu2 %583 }
  0x7f   : > { %v599_v37 = vpop.permute.xlu2 %598 }
  0x80   : > { %v562_v18 = vpop.permute.xlu1 %561  ;;  %v552_v19 = vpop.permute.xlu0 %551 }
  0x81   : > { %v569_v33 = vmul.f32 %v552_v19, %v537_v27  ;;  %v570_v34 = vmul.f32 %v552_v19, %v538_v28  ;;  %v573_v60 = vmul.f32 %v562_v18, %v541_v46  ;;  %v574_v61 = vmul.f32 %v562_v18, %v542_v47  ;;  %v709_v27 = vld [vmem:[%s1631_s27 + $0x30] sm:$0xff]  ;;  %v710_v28 = vld [vmem:[%s1631_s27 + $0x38] sm:$0xff] }
  0x83   : > { %v601_v48 = vadd.f32 %v584_v23, %v569_v33  ;;  %v602_v49 = vadd.f32 %v584_v23, %v570_v34 }
  0x85   : > { %v609_v62 = vmax.f32 %v601_v48, 0.0  ;;  %v610_v63 = vmax.f32 %v602_v49, 0.0  ;;  %v721_v48 = vld [vmem:[%s1640_s30 + $0x10] sm:$0xff]  ;;  %v722_v49 = vld [vmem:[%s1640_s30 + $0x18] sm:$0xff] }
  0x87   : > { %v680_v15 = vpop.permute.xlu2 %679  ;;  %v1644_v26 = vadd.f32 %v704_v10, %v610_v63 }
  0x88   : > { %v567_v21 = vpop.permute.xlu1 %566  ;;  %v557_v22 = vpop.permute.xlu0 %556 }
  0x89   : > { %v575_v56 = vmul.f32 %v567_v21, %v543_v41  ;;  %v576_v57 = vmul.f32 %v567_v21, %v544_v42  ;;  %v571_v5 = vmul.f32 %v557_v22, %v539_v52  ;;  %v572_v6 = vmul.f32 %v557_v22, %v540_v53  ;;  %v708_v41 = vld [vmem:[%s1631_s27 + $0x28] sm:$0xff]  ;;  %v705_v52 = vld [vmem:[%s1631_s27 + $0x10] sm:$0xff]  ;;  %v706_v53 = vld [vmem:[%s1631_s27 + $0x18] sm:$0xff]  ;;  %s1474_s27 = smov 126  }
  0x8b   : > { %v607_v11 = vadd.f32 %v599_v37, %v575_v56  ;;  %v608_v12 = vadd.f32 %v599_v37, %v576_v57  ;;  %v720_v37 = vld [vmem:[%s1640_s30 + $0x8] sm:$0xff] }
  0x8d   : > { %v615_v31 = vmax.f32 %v607_v11, 0.0  ;;  %v616_v32 = vmax.f32 %v608_v12, 0.0 }
  0x8f   : > { %v1664_v57 = vadd.f32 %v709_v27, %v615_v31 }
  0x90   : > { %v1610_v24 = vpop.permute.xlu1 %651  ;;  %v647_v25 = vpop.permute.xlu0 %646 }
  0x91   : > { %v658_v1 = vmul.f32 %v647_v25, %v625_v50  ;;  %v659_v2 = vmul.f32 %v647_v25, %v626_v51  ;;  %v1642_v25 = vadd.f32 %v703_v9, %v609_v62  ;;  %v661_v38 = vmul.f32 %v1610_v24, %v628_v17  ;;  %v724_v51 = vld [vmem:[%s1640_s30 + $0x28] sm:$0xff]  ;;  %v726_v62 = vld [vmem:[%s1640_s30 + $0x38] sm:$0xff] }
  0x93   : > { %v691_v20 = vadd.f32 %v680_v15, %v658_v1  ;;  %v692_v21 = vadd.f32 %v680_v15, %v659_v2 }
  0x95   : > { %v699_v44 = vmax.f32 %v691_v20, 0.0  ;;  %v700_v45 = vmax.f32 %v692_v21, 0.0 }
  0x98   : > { %v594_v35 = vpop.permute.xlu1 %593  ;;  %v589_v36 = vpop.permute.xlu0 %588 }
  0x99   : > { %v605_v13 = vadd.f32 %v594_v35, %v573_v60  ;;  %v606_v14 = vadd.f32 %v594_v35, %v574_v61  ;;  %v603_v22 = vadd.f32 %v589_v36, %v571_v5  ;;  %v604_v23 = vadd.f32 %v589_v36, %v572_v6  ;;  %v719_v35 = vld [vmem:[%s1640_s30] sm:$0xff]  ;;  %v725_v61 = vld [vmem:[%s1640_s30 + $0x30] sm:$0xff] }
  0x9a   : > { %v660_v36 = vmul.f32 %v1610_v24, %v627_v16 }
  0x9b   : > { %v613_v33 = vmax.f32 %v605_v13, 0.0  ;;  %v614_v34 = vmax.f32 %v606_v14, 0.0  ;;  %v611_v46 = vmax.f32 %v603_v22, 0.0  ;;  %v612_v47 = vmax.f32 %v604_v23, 0.0 }
  0x9d   : > { %v1670_v60 = vadd.f32 %v708_v41, %v614_v34  ;;  %v1682_v5 = vadd.f32 %v705_v52, %v611_v46  ;;  %v1684_v6 = vadd.f32 %v706_v53, %v612_v47 }
  0xa0   : > { %v675_v3 = vpop.permute.xlu1 %674  ;;  %v670_v4 = vpop.permute.xlu0 %669 }
  0xa1   : > { %v687_v7 = vadd.f32 %v670_v4, %v654_v54  ;;  %v688_v8 = vadd.f32 %v670_v4, %v655_v55  ;;  %v689_v18 = vadd.f32 %v675_v3, %v656_v58  ;;  %v690_v19 = vadd.f32 %v675_v3, %v657_v59 }
  0xa2   : > { %v1666_v58 = vadd.f32 %v710_v28, %v616_v32  ;;  %v1668_v59 = vadd.f32 %v707_v40, %v613_v33  ;;  %v1678_v3 = vadd.f32 %v723_v39, %v699_v44  ;;  %v1680_v4 = vadd.f32 %v724_v51, %v700_v45 }
  0xa3   : > { %v695_v29 = vmax.f32 %v687_v7, 0.0  ;;  %v696_v30 = vmax.f32 %v688_v8, 0.0  ;;  %v697_v42 = vmax.f32 %v689_v18, 0.0  ;;  %v698_v43 = vmax.f32 %v690_v19, 0.0 }
  0xa4   : > { %v739_v11 = vmul.f32 %v1678_v3, %v1668_v59  ;;  %v740_v12 = vmul.f32 %v1680_v4, %v1670_v60  ;;  %v761_v40 = vlaneseq  ;;  %v1469_v51 = vmov 0.0  }
  0xa5   : > { %v1660_v54 = vadd.f32 %v719_v35, %v695_v29  ;;  %v1662_v24 = vadd.f32 %v720_v37, %v696_v30  ;;  %v1674_v63 = vadd.f32 %v721_v48, %v697_v42  ;;  %v1676_v0 = vadd.f32 %v722_v49, %v698_v43 }
  0xa6   : > { %v1722_v42 = vand.u32 127, %v761_v40  ;;  %v1724_v44 = vshrl.u32 %v761_v40, 7 }
  0xa7   : > { %v735_v7 = vmul.f32 %v1660_v54, %v1642_v25  ;;  %v736_v8 = vmul.f32 %v1662_v24, %v1644_v26  ;;  %v737_v13 = vmul.f32 %v1674_v63, %v1682_v5  ;;  %v738_v14 = vmul.f32 %v1676_v0, %v1684_v6 }
  0xa8   : > { %v685_v50 = vpop.permute.xlu0 %684  ;;  %vm769_vm0 = vcmp.lt.s32.totalorder %v1722_v42, 48  ;;  %vm784_vm1 = vcmp.lt.s32.totalorder %v1722_v42, 32  ;;  %vm787_vm2 = vcmp.eq.s32.totalorder %v1724_v44, 1  ;;  %vm772_vm3 = vcmp.eq.s32.totalorder %v1724_v44, 0 }
  0xa9   : > { %v693_v55 = vadd.f32 %v685_v50, %v660_v36  ;;  %v694_v56 = vadd.f32 %v685_v50, %v661_v38  ;;  %v743_v17 = vmax.f32 %v735_v7, %v739_v11  ;;  %v752_v18 = vmax.f32 %v736_v8, %v740_v12 }
  0xaa   : > { %vm799_vm4 = vcmp.lt.s32.totalorder %v1722_v42, 16  ;;  %v788_v52 = vsel %vm787_vm2, 1.0, %v1469_v51  ;;  %vm802_vm5 = vcmp.eq.s32.totalorder %v1724_v44, 2  ;;  %vm820_vm6 = vcmp.lt.s32.totalorder %v1722_v42, 112 }
  0xab   : > { %v701_v1 = vmax.f32 %v693_v55, 0.0  ;;  %v702_v2 = vmax.f32 %v694_v56, 0.0  ;;  %vm810_vm7 = vcmp.eq.s32.totalorder %v1724_v44, 3  ;;  %vm823_vm8 = vcmp.eq.s32.totalorder %v1724_v44, 4 }
  0xac   : > { %vm838_vm9 = vcmp.eq.s32.totalorder %v1724_v44, 5  ;;  %vm850_vm10 = vcmp.lt.s32.totalorder %v1722_v42, 80  ;;  %vm835_vm11 = vcmp.lt.s32.totalorder %v1722_v42, 96  ;;  %vm853_vm12 = vcmp.eq.s32.totalorder %v1724_v44, 6 }
  0xad   : > { %v1690_v9 = vadd.f32 %v725_v61, %v701_v1  ;;  %v1692_v10 = vadd.f32 %v726_v62, %v702_v2  ;;  %v773_v62 = vsel %vm772_vm3, 1.0, %v1469_v51  ;;  %v839_v40 = vsel %vm838_vm9, 1.0, %v1469_v51 }
  0xae   : > { %vm878_vm13 = vcmp.lt.s32.totalorder %v1722_v42, 2  ;;  %vm865_vm14 = vcmp.lt.s32.totalorder %v1722_v42, 3  ;;  %vm891_vm15 = vcmp.lt.s32.totalorder %v1722_v42, 1  ;;  %vm923_vm2 = vcmp.lt.s32.totalorder %v1722_v42, 126 }
  0xaf   : > { %v741_v15 = vmul.f32 %v1690_v9, %v1664_v57  ;;  %v742_v16 = vmul.f32 %v1692_v10, %v1666_v58  ;;  %vm1015_vm3 = vcmask 15360  }
  0xb1   : > { %v744_v19 = vmax.f32 %v737_v13, %v741_v15  ;;  %v753_v20 = vmax.f32 %v738_v14, %v742_v16 }
  0xb3   : > { %v745_v21 = vmax.f32 %v743_v17, %v744_v19  ;;  %v754_v22 = vmax.f32 %v752_v18, %v753_v20  ;;  %v803_v17 = vsel %vm802_vm5, 1.0, %v1469_v51 }
  0xb5   : > { %v746_v23 = vrot.slane %v745_v21, 4  ;;  %v755_v27 = vrot.slane %v754_v22, 4 }
  0xb7   : > { %v747_v28 = vmax.f32 %v745_v21, %v746_v23  ;;  %v756_v29 = vmax.f32 %v754_v22, %v755_v27 }
  0xb9   : > { %v748_v30 = vrot.slane %v747_v28, 2  ;;  %v757_v31 = vrot.slane %v756_v29, 2 }
  0xbb   : > { %v749_v32 = vmax.f32 %v747_v28, %v748_v30  ;;  %v758_v33 = vmax.f32 %v756_v29, %v757_v31  ;;  %v811_v28 = vsel %vm810_vm7, 1.0, %v1469_v51 }
  0xbd   : > { %v750_v34 = vrot.slane %v749_v32, 1  ;;  %v759_v35 = vrot.slane %v758_v33, 1 }
  0xbf   : > { %v1706_v37 = vmax.f32 %v749_v32, %v750_v34  ;;  %v1708_v36 = vmax.f32 %v758_v33, %v759_v35  ;;  %v824_v33 = vsel %vm823_vm8, 1.0, %v1469_v51 }
  0xc1   : > { %765 = vrot.lane.b32.xlu2 %v1708_v36, %s1463_s14  ;;  %780 = vrot.lane.b32.xlu0 %v1706_v37, %s1464_s15  ;;  %v813_v35 = vmul.f32 %v811_v28, %v1708_v36 }
  0xc2   : > { %763 = vrot.lane.b32.xlu1 %v1706_v37, %s1463_s14 }
  0xc9   : > { %795 = vrot.lane.b32.xlu2 %v1706_v37, %s1465_s16  ;;  %797 = vrot.lane.b32.xlu0 %v1708_v36, %s1465_s16 }
  0xca   : > { %782 = vrot.lane.b32.xlu1 %v1708_v36, %s1464_s15 }
  0xd1   : > { %818 = vrot.lane.b32.xlu2 %v1708_v36, %s1466_s17  ;;  %831 = vrot.lane.b32.xlu0 %v1706_v37, %s1467_s18 }
  0xd2   : > { %816 = vrot.lane.b32.xlu1 %v1706_v37, %s1466_s17 }
  0xd9   : > { %846 = vrot.lane.b32.xlu2 %v1706_v37, %s1468_s19  ;;  %848 = vrot.lane.b32.xlu0 %v1708_v36, %s1468_s19  ;;  %s1388_s19 = sshll.u32 %s1957_s26, 7 }
  0xda   : > { %833 = vrot.lane.b32.xlu1 %v1708_v36, %s1467_s18  ;;  %s1875_s18 = scalar_lea.vmem %s1951_s11, %s1625_s22  ;;  %s1901_s26 = scalar_lea.vmem %s1953_s13, %s1388_s19 }
 0x11b   : > { %v766_v38 = vpop.permute.xlu2 %765 }
 0x123   : > { %v796_v43 = vpop.permute.xlu2 %795 }
 0x12b   : > { %v819_v7 = vpop.permute.xlu2 %818 }
 0x133   : > { %v781_v39 = vpop.permute.xlu0 %780  ;;  %v847_v34 = vpop.permute.xlu2 %846 }
 0x134   : > { %v764_v41 = vpop.permute.xlu1 %763 }
 0x135   : > { %v770_v46 = vsel %vm769_vm0, %v764_v41, %v766_v38  ;;  %v771_v47 = vsel %vm769_vm0, %v766_v38, %v764_v41  ;;  %v812_v38 = vmul.f32 %v811_v28, %v1706_v37  ;;  %v854_v37 = vsel %vm853_vm12, 1.0, %v1469_v51 }
 0x136   : > { %v774_v56 = vperm.slane %v771_v47, 0  ;;  %v775_v61 = vperm.slane %v770_v46, 0  ;;  %vm910_vm0 = vcmp.lt.s32.totalorder %v1722_v42, 127 }
 0x138   : > { %v776_v12 = vmul.f32 %v774_v56, %v773_v62  ;;  %v777_v13 = vmul.f32 %v775_v61, %v773_v62 }
 0x13b   : > { %v798_v45 = vpop.permute.xlu0 %797 }
 0x13c   : > { %v783_v48 = vpop.permute.xlu1 %782  ;;  %v800_v1 = vsel %vm799_vm4, %v796_v43, %v798_v45  ;;  %v801_v2 = vsel %vm799_vm4, %v798_v45, %v796_v43 }
 0x13d   : > { %v785_v49 = vsel %vm784_vm1, %v781_v39, %v783_v48  ;;  %v786_v50 = vsel %vm784_vm1, %v783_v48, %v781_v39  ;;  %v804_v14 = vperm.slane %v801_v2, 0  ;;  %v805_v15 = vperm.slane %v800_v1, 0 }
 0x13e   : > { %v789_v53 = vperm.slane %v786_v50, 0  ;;  %v790_v55 = vperm.slane %v785_v49, 0  ;;  %vm936_vm1 = vcmp.lt.s32.totalorder %v1722_v42, 125  ;;  %v940_v42 = vld [vmem:[%s1946_s6 + $0x68] sm:$0xff] }
 0x13f   : > { %v806_v23 = vmul.f32 %v804_v14, %v803_v17  ;;  %v807_v27 = vmul.f32 %v805_v15, %v803_v17 }
 0x140   : > { %v791_v8 = vmul.f32 %v789_v53, %v788_v52  ;;  %v792_v11 = vmul.f32 %v790_v55, %v788_v52 }
 0x142   : > { %v793_v19 = vadd.f32 %v791_v8, %v776_v12  ;;  %v794_v20 = vadd.f32 %v792_v11, %v777_v13 }
 0x143   : > { %v832_v16 = vpop.permute.xlu0 %831 }
 0x144   : > { %v817_v18 = vpop.permute.xlu1 %816  ;;  %v808_v31 = vadd.f32 %v806_v23, %v793_v19  ;;  %v809_v32 = vadd.f32 %v807_v27, %v794_v20  ;;  %v881_v19 = vld [vmem:[%s1946_s6 + $0x10] sm:$0xff]  ;;  %v882_v20 = vld [vmem:[%s1946_s6 + $0x18] sm:$0xff]  ;;  %v868_v23 = vld [vmem:[%s1946_s6] sm:$0xff] }
 0x145   : > { %v821_v21 = vsel %vm820_vm6, %v817_v18, %v819_v7  ;;  %v822_v22 = vsel %vm820_vm6, %v819_v7, %v817_v18  ;;  %v869_v27 = vld [vmem:[%s1946_s6 + $0x8] sm:$0xff] }
 0x146   : > { %v825_v29 = vperm.slane %v821_v21, 0  ;;  %v826_v30 = vperm.slane %v822_v22, 0  ;;  %v815_v48 = vadd.f32 %v813_v35, %v809_v32  ;;  %v814_v49 = vadd.f32 %v812_v38, %v808_v31  ;;  %v894_v35 = vld [vmem:[%s1946_s6 + $0x20] sm:$0xff]  ;;  %v895_v38 = vld [vmem:[%s1946_s6 + $0x28] sm:$0xff] }
 0x148   : > { %v827_v41 = vmul.f32 %v825_v29, %v824_v33  ;;  %v828_v43 = vmul.f32 %v826_v30, %v824_v33 }
 0x14a   : > { %v829_v36 = vadd.f32 %v827_v41, %v814_v49  ;;  %v830_v62 = vadd.f32 %v828_v43, %v815_v48  ;;  %v900_v49 = vld [vmem:[%s1946_s6 + $0x30] sm:$0xff] }
 0x14b   : > { %v849_v39 = vpop.permute.xlu0 %848 }
 0x14c   : > { %v851_v45 = vsel %vm850_vm10, %v847_v34, %v849_v39  ;;  %v852_v46 = vsel %vm850_vm10, %v849_v39, %v847_v34  ;;  %v834_v47 = vpop.permute.xlu1 %833 }
 0x14d   : > { %v836_v50 = vsel %vm835_vm11, %v832_v16, %v834_v47  ;;  %v837_v52 = vsel %vm835_vm11, %v834_v47, %v832_v16  ;;  %v855_v53 = vperm.slane %v851_v45, 0  ;;  %v856_v55 = vperm.slane %v852_v46, 0 }
 0x14e   : > { %v840_v56 = vperm.slane %v836_v50, 0  ;;  %v841_v61 = vperm.slane %v837_v52, 0  ;;  %v901_v50 = vld [vmem:[%s1946_s6 + $0x38] sm:$0xff]  ;;  %v913_v52 = vld [vmem:[%s1946_s6 + $0x40] sm:$0xff] }
 0x14f   : > { %v857_v7 = vmul.f32 %v855_v53, %v854_v37  ;;  %v858_v8 = vmul.f32 %v856_v55, %v854_v37  ;;  %v914_v53 = vld [vmem:[%s1946_s6 + $0x48] sm:$0xff] }
 0x150   : > { %v842_v1 = vmul.f32 %v840_v56, %v839_v40  ;;  %v843_v2 = vmul.f32 %v841_v61, %v839_v40 }
 0x152   : > { %v844_v11 = vadd.f32 %v842_v1, %v829_v36  ;;  %v845_v12 = vadd.f32 %v843_v2, %v830_v62 }
 0x154   : > { %v859_v13 = vadd.f32 %v857_v7, %v844_v11  ;;  %v860_v14 = vadd.f32 %v858_v8, %v845_v12  ;;  %v926_v8 = vld [vmem:[%s1946_s6 + $0x50] sm:$0xff]  ;;  %v927_v11 = vld [vmem:[%s1946_s6 + $0x58] sm:$0xff] }
 0x156   : > { %863 = vrot.lane.b32.xlu2 %v860_v14, %s1470_s20  ;;  %874 = vrot.lane.b32.xlu0 %v859_v13, %s1471_s21  ;;  %v903_v36 = vmul.f32 %v901_v50, %v860_v14  ;;  %v902_v62 = vmul.f32 %v900_v49, %v859_v13 }
 0x157   : > { %861 = vrot.lane.b32.xlu1 %v859_v13, %s1470_s20 }
 0x15e   : > { %887 = vrot.lane.b32.xlu2 %v859_v13, %s1472_s23  ;;  %889 = vrot.lane.b32.xlu0 %v860_v14, %s1472_s23  ;;  %s1894_s23 = scalar_lea.vmem %s1952_s12, %s1625_s22 }
 0x15f   : > { %876 = vrot.lane.b32.xlu1 %v860_v14, %s1471_s21 }
 0x166   : > { %908 = vrot.lane.b32.xlu2 %v860_v14, %s1473_s24  ;;  %919 = vrot.lane.b32.xlu0 %v859_v13, %s1474_s27 }
 0x167   : > { %906 = vrot.lane.b32.xlu1 %v859_v13, %s1473_s24 }
 0x16e   : > { %932 = vrot.lane.b32.xlu2 %v859_v13, %s1475_s28  ;;  %934 = vrot.lane.b32.xlu0 %v860_v14, %s1475_s28  ;;  %v939_v13 = vld [vmem:[%s1946_s6 + $0x60] sm:$0xff] }
 0x16f   : > { %921 = vrot.lane.b32.xlu1 %v860_v14, %s1474_s27 }
 0x1b0   : > { %v864_v44 = vpop.permute.xlu2 %863 }
 0x1b8   : > { %v888_v16 = vpop.permute.xlu2 %887 }
 0x1c0   : > { %v909_v32 = vpop.permute.xlu2 %908 }
 0x1c8   : > { %v875_v51 = vpop.permute.xlu0 %874  ;;  %v933_v12 = vpop.permute.xlu2 %932 }
 0x1c9   : > { %v862_v15 = vpop.permute.xlu1 %861 }
 0x1ca   : > { %v866_v28 = vsel %vm865_vm14, %v862_v15, %v864_v44  ;;  %v867_v29 = vsel %vm865_vm14, %v864_v44, %v862_v15 }
 0x1cb   : > { %v870_v33 = vmul.f32 %v868_v23, %v867_v29  ;;  %v871_v34 = vmul.f32 %v869_v27, %v866_v28 }
 0x1d0   : > { %v890_v17 = vpop.permute.xlu0 %889 }
 0x1d1   : > { %v877_v18 = vpop.permute.xlu1 %876  ;;  %v892_v39 = vsel %vm891_vm15, %v888_v16, %v890_v17  ;;  %v893_v40 = vsel %vm891_vm15, %v890_v17, %v888_v16 }
 0x1d2   : > { %v879_v21 = vsel %vm878_vm13, %v875_v51, %v877_v18  ;;  %v880_v22 = vsel %vm878_vm13, %v877_v18, %v875_v51  ;;  %v896_v47 = vmul.f32 %v894_v35, %v893_v40  ;;  %v897_v48 = vmul.f32 %v895_v38, %v892_v39 }
 0x1d3   : > { %v883_v30 = vmul.f32 %v881_v19, %v880_v22  ;;  %v884_v31 = vmul.f32 %v882_v20, %v879_v21 }
 0x1d5   : > { %v885_v43 = vadd.f32 %v883_v30, %v870_v33  ;;  %v886_v45 = vadd.f32 %v884_v31, %v871_v34 }
 0x1d7   : > { %v898_v61 = vadd.f32 %v896_v47, %v885_v43  ;;  %v899_v37 = vadd.f32 %v897_v48, %v886_v45 }
 0x1d8   : > { %v920_v41 = vpop.permute.xlu0 %919 }
 0x1d9   : > { %v907_v46 = vpop.permute.xlu1 %906  ;;  %v905_v44 = vadd.f32 %v903_v36, %v899_v37  ;;  %v904_v51 = vadd.f32 %v902_v62, %v898_v61 }
 0x1da   : > { %v911_v55 = vsel %vm910_vm0, %v907_v46, %v909_v32  ;;  %v912_v56 = vsel %vm910_vm0, %v909_v32, %v907_v46 }
 0x1db   : > { %v915_v1 = vmul.f32 %v913_v52, %v911_v55  ;;  %v916_v2 = vmul.f32 %v914_v53, %v912_v56 }
 0x1dd   : > { %v917_v19 = vadd.f32 %v915_v1, %v904_v51  ;;  %v918_v20 = vadd.f32 %v916_v2, %v905_v44 }
 0x1e0   : > { %v935_v7 = vpop.permute.xlu0 %934 }
 0x1e1   : > { %v922_v14 = vpop.permute.xlu1 %921  ;;  %v937_v15 = vsel %vm936_vm1, %v933_v12, %v935_v7  ;;  %v938_v16 = vsel %vm936_vm1, %v935_v7, %v933_v12 }
 0x1e2   : > { %v924_v17 = vsel %vm923_vm2, %v920_v41, %v922_v14  ;;  %v925_v18 = vsel %vm923_vm2, %v922_v14, %v920_v41  ;;  %v941_v23 = vmul.f32 %v939_v13, %v937_v15  ;;  %v942_v27 = vmul.f32 %v940_v42, %v938_v16 }
 0x1e3   : > { %v928_v21 = vmul.f32 %v926_v8, %v924_v17  ;;  %v929_v22 = vmul.f32 %v927_v11, %v925_v18 }
 0x1e5   : > { %v930_v28 = vadd.f32 %v928_v21, %v917_v19  ;;  %v931_v29 = vadd.f32 %v929_v22, %v918_v20 }
 0x1e7   : > { %v943_v30 = vadd.f32 %v941_v23, %v930_v28  ;;  %v944_v31 = vadd.f32 %v942_v27, %v931_v29 }
 0x1e9   : > { %v945_v32 = vrot.slane %v943_v30, 4  ;;  %v951_v33 = vrot.slane %v944_v31, 4 }
 0x1eb   : > { %v946_v34 = vadd.f32 %v945_v32, %v943_v30  ;;  %v952_v35 = vadd.f32 %v951_v33, %v944_v31  ;;  %v1008_v32 = vld [vmem:[%s1947_s7 + $0x8] sm:$0xff]  ;;  %v1007_v33 = vld [vmem:[%s1947_s7] sm:$0xff] }
 0x1ed   : > { %v947_v38 = vrot.slane %v946_v34, 2  ;;  %v953_v39 = vrot.slane %v952_v35, 2 }
 0x1ef   : > { %v948_v40 = vadd.f32 %v947_v38, %v946_v34  ;;  %v954_v43 = vadd.f32 %v953_v39, %v952_v35  ;;  %v1010_v39 = vld [vmem:[%s1947_s7 + $0x18] sm:$0xff] }
 0x1f1   : > { %v949_v45 = vrot.slane %v948_v40, 1  ;;  %v955_v41 = vrot.slane %v954_v43, 1 }
 0x1f3   : > { %v950_v46 = vadd.f32 %v949_v45, %v948_v40  ;;  %v956_v47 = vadd.f32 %v955_v41, %v954_v43  ;;  %v1009_v40 = vld [vmem:[%s1947_s7 + $0x10] sm:$0xff] }
 0x1f5   : > { %v957_v48 = vsub.f32 0.0, %v950_v46  ;;  %v958_v49 = vsub.f32 0.0, %v956_v47  ;;  %v1031_v46 = vld [vmem:[%s1949_s9 + $0x8] sm:$0xff] }
 0x1f7   : > { %v959_v50 = vmul.f32 1.442695, %v957_v48  ;;  %v961_v52 = vmul.f32 1.442695, %v958_v49  ;;  %v1030_v49 = vld [vmem:[%s1949_s9] sm:$0xff] }
 0x1f9   : > { %1414 = vpow2.f32 %v959_v50 }
 0x1fa   : > { %1416 = vpow2.f32 %v961_v52 }
 0x1ff   : > { %v1415_v53 = vpop.eup %1414 }
 0x200   : > { %v1417_v55 = vpop.eup %1416  ;;  %v963_v56 = vadd.f32 1.0, %v1415_v53 }
 0x201   : > { %v964_v61 = vadd.f32 1.0, %v1417_v55 }
 0x202   : > { %1418 = vrcp.f32 %v963_v56 }
 0x203   : > { %1420 = vrcp.f32 %v964_v61 }
 0x208   : > { %v1419_v37 = vpop.eup %1418 }
 0x209   : > { %v1421_v36 = vpop.eup %1420  ;;  %v987_v62 = vmul.f32 %v1419_v37, %v1660_v54  ;;  %v969_v1 = vmul.f32 %v1419_v37, %v1682_v5  ;;  %v967_v2 = vmul.f32 %v1419_v37, %v1642_v25  ;;  %v973_v7 = vmul.f32 %v1419_v37, %v1664_v57 }
 0x20a   : > { %v988_v8 = vmul.f32 %v1421_v36, %v1662_v24  ;;  %v970_v11 = vmul.f32 %v1421_v36, %v1684_v6  ;;  %v968_v12 = vmul.f32 %v1421_v36, %v1644_v26  ;;  %v974_v44 = vmul.f32 %v1421_v36, %v1666_v58 }
 0x20b   : > { %v989_v51 = vmul.f32 %v1419_v37, %v1674_v63  ;;  %v990_v14 = vmul.f32 %v1421_v36, %v1676_v0  ;;  %v971_v13 = vmul.f32 %v1419_v37, %v1668_v59  ;;  %v972_v42 = vmul.f32 %v1421_v36, %v1670_v60 }
 0x20c   : > { %v995_v15 = vmax.f32 %v987_v62, %v988_v8  ;;  %v978_v16 = vmax.f32 %v969_v1, %v970_v11  ;;  %v975_v17 = vmax.f32 %v967_v2, %v968_v12  ;;  %v984_v18 = vmax.f32 %v973_v7, %v974_v44  ;;  %v1032_v62 = vld [vmem:[%s1949_s9 + $0x10] sm:$0xff]  ;;  %v1033_v7 = vld [vmem:[%s1949_s9 + $0x18] sm:$0xff] }
 0x20d   : > { %v998_v19 = vmax.f32 %v989_v51, %v990_v14  ;;  %v981_v20 = vmax.f32 %v971_v13, %v972_v42  ;;  %v991_v21 = vmul.f32 %v1419_v37, %v1678_v3  ;;  %v992_v22 = vmul.f32 %v1421_v36, %v1680_v4 }
 0x20e   : > { %996 = vmax.xlane.f32.xlu0 %v995_v15  ;;  %979 = vmax.xlane.f32.xlu2 %v978_v16  ;;  %v993_v23 = vmul.f32 %v1419_v37, %v1690_v9  ;;  %v994_v27 = vmul.f32 %v1421_v36, %v1692_v10 }
 0x20f   : > { %976 = vmax.xlane.f32.xlu1 %v975_v17  ;;  %v1001_v28 = vmax.f32 %v991_v21, %v992_v22 }
 0x210   : > { %v1004_v29 = vmax.f32 %v993_v23, %v994_v27 }
 0x216   : > { %985 = vmax.xlane.f32.xlu0 %v984_v18  ;;  %999 = vmax.xlane.f32.xlu2 %v998_v19 }
 0x217   : > { %982 = vmax.xlane.f32.xlu1 %v981_v20 }
 0x21e   : > { %1002 = vmax.xlane.f32.xlu2 %v1001_v28 }
 0x21f   : > { %1005 = vmax.xlane.f32.xlu1 %v1004_v29  ;;  %v1054_v29 = vld [vmem:[%s1948_s8 + $0x10] sm:$0xff] }
 0x281   : > { %v997_v30 = vpop.xlane.xlu0 %996  ;;  %v980_v31 = vpop.xlane.xlu2 %979 }
 0x282   : > { %v977_v34 = vpop.xlane.xlu1 %976  ;;  %v1012_v35 = vmul.f32 %v1008_v32, %v980_v31  ;;  %v1034_v61 = vmul.f32 %v1030_v49, %v997_v30  ;;  %v1053_v30 = vld [vmem:[%s1948_s8 + $0x8] sm:$0xff]  ;;  %v1052_v31 = vld [vmem:[%s1948_s8] sm:$0xff] }
 0x283   : > { %v1011_v38 = vmul.f32 %v1007_v33, %v977_v34 }
 0x284   : > { %v1017_v43 = vsel %vm1015_vm3, %v1012_v35, 0.0  ;;  %v1038_v11 = vsel %vm1015_vm3, %v1034_v61, 0.0 }
 0x285   : > { %v1016_v45 = vsel %vm1015_vm3, %v1011_v38, 0.0 }
 0x286   : > { %v1018_v53 = vadd.f32 %v1017_v43, %v1016_v45 }
 0x289   : > { %v986_v41 = vpop.xlane.xlu0 %985  ;;  %v1000_v47 = vpop.xlane.xlu2 %999 }
 0x28a   : > { %v983_v48 = vpop.xlane.xlu1 %982  ;;  %v1014_v50 = vmul.f32 %v1010_v39, %v986_v41  ;;  %v1035_v55 = vmul.f32 %v1031_v46, %v1000_v47  ;;  %v1055_v46 = vld [vmem:[%s1948_s8 + $0x18] sm:$0xff]  ;;  %v1093_v47 = vld [vmem:[%s1950_s10 + $0x8] sm:$0xff] }
 0x28b   : > { %v1013_v52 = vmul.f32 %v1009_v40, %v983_v48  ;;  %v1092_v48 = vld [vmem:[%s1950_s10] sm:$0xff] }
 0x28c   : > { %v1021_v36 = vsel %vm1015_vm3, %v1014_v50, 0.0  ;;  %v1039_v1 = vsel %vm1015_vm3, %v1035_v55, 0.0 }
 0x28d   : > { %v1019_v56 = vsel %vm1015_vm3, %v1013_v52, 0.0  ;;  %v1040_v14 = vadd.f32 %v1039_v1, %v1038_v11 }
 0x28e   : > { %v1020_v37 = vadd.f32 %v1019_v56, %v1018_v53 }
 0x290   : > { %v1022_v2 = vadd.f32 %v1021_v36, %v1020_v37  ;;  %v1095_v37 = vld [vmem:[%s1950_s10 + $0x18] sm:$0xff]  ;;  %v1094_v36 = vld [vmem:[%s1950_s10 + $0x10] sm:$0xff] }
 0x291   : > { %v1003_v8 = vpop.xlane.xlu2 %1002 }
 0x292   : > { %v1023_v12 = vrot.slane %v1022_v2, 4  ;;  %v1036_v44 = vmul.f32 %v1032_v62, %v1003_v8  ;;  %v1006_v51 = vpop.xlane.xlu1 %1005 }
 0x293   : > { %v1037_v13 = vmul.f32 %v1033_v7, %v1006_v51 }
 0x294   : > { %v1024_v42 = vadd.f32 %v1023_v12, %v1022_v2  ;;  %v1041_v15 = vsel %vm1015_vm3, %v1036_v44, 0.0 }
 0x295   : > { %v1042_v16 = vadd.f32 %v1041_v15, %v1040_v14  ;;  %v1043_v18 = vsel %vm1015_vm3, %v1037_v13, 0.0 }
 0x296   : > { %v1025_v17 = vrot.slane %v1024_v42, 2 }
 0x297   : > { %v1044_v19 = vadd.f32 %v1043_v18, %v1042_v16 }
 0x298   : > { %v1026_v20 = vadd.f32 %v1025_v17, %v1024_v42 }
 0x299   : > { %v1045_v21 = vrot.slane %v1044_v19, 4 }
 0x29a   : > { %v1027_v22 = vrot.slane %v1026_v20, 1 }
 0x29b   : > { %v1046_v23 = vadd.f32 %v1045_v21, %v1044_v19 }
 0x29c   : > { %v1028_v27 = vadd.f32 %v1027_v22, %v1026_v20 }
 0x29d   : > { %v1047_v28 = vrot.slane %v1046_v23, 2 }
 0x29e   : > { %v1029_v32 = vmax.f32 %v1028_v27, 0.0 }
 0x29f   : > { %v1048_v33 = vadd.f32 %v1047_v28, %v1046_v23 }
 0x2a0   : > { %v1058_v34 = vmul.f32 %v1054_v29, %v1029_v32  ;;  %v1057_v35 = vmul.f32 %v1053_v30, %v1029_v32  ;;  %v1056_v38 = vmul.f32 %v1052_v31, %v1029_v32  ;;  %v1059_v50 = vmul.f32 %v1055_v46, %v1029_v32 }
 0x2a1   : > { %v1049_v39 = vrot.slane %v1048_v33, 1 }
 0x2a2   : > { %v1066_v40 = vsel %vm1015_vm3, %v1058_v34, 0.0  ;;  %v1063_v43 = vsel %vm1015_vm3, %v1057_v35, 0.0  ;;  %v1060_v45 = vsel %vm1015_vm3, %v1056_v38, 0.0  ;;  %v1069_v61 = vsel %vm1015_vm3, %v1059_v50, 0.0 }
 0x2a3   : > { %v1050_v41 = vadd.f32 %v1049_v39, %v1048_v33  ;;  %1067 = vadd.xlane.f32.xlu1 %v1066_v40  ;;  %1064 = vadd.xlane.f32.xlu0 %v1063_v43 }
 0x2a4   : > { %1061 = vadd.xlane.f32.xlu2 %v1060_v45 }
 0x2a5   : > { %v1051_v49 = vmax.f32 %v1050_v41, 0.0 }
 0x2a7   : > { %v1097_v52 = vmul.f32 %v1093_v47, %v1051_v49  ;;  %v1096_v53 = vmul.f32 %v1092_v48, %v1051_v49  ;;  %v1099_v62 = vmul.f32 %v1095_v37, %v1051_v49  ;;  %v1098_v1 = vmul.f32 %v1094_v36, %v1051_v49 }
 0x2a9   : > { %v1103_v55 = vsel %vm1015_vm3, %v1097_v52, 0.0  ;;  %v1100_v56 = vsel %vm1015_vm3, %v1096_v53, 0.0  ;;  %v1109_v2 = vsel %vm1015_vm3, %v1099_v62, 0.0  ;;  %v1106_v7 = vsel %vm1015_vm3, %v1098_v1, 0.0 }
 0x2ab   : > { %1104 = vadd.xlane.f32.xlu1 %v1103_v55  ;;  %1101 = vadd.xlane.f32.xlu0 %v1100_v56 }
 0x2ac   : > { %1070 = vadd.xlane.f32.xlu2 %v1069_v61 }
 0x2b3   : > { %1110 = vadd.xlane.f32.xlu0 %v1109_v2 }
 0x2b4   : > { %1107 = vadd.xlane.f32.xlu2 %v1106_v7 }
 0x316   : > { %v1065_v8 = vpop.xlane.xlu0 %1064  ;;  %v1068_v11 = vpop.xlane.xlu1 %1067 }
 0x317   : > { %v1073_v12 = vsub.f32 0.0, %v1065_v8  ;;  %v1062_v44 = vpop.xlane.xlu2 %1061  ;;  %v1074_v51 = vsub.f32 0.0, %v1068_v11 }
 0x318   : > { %v1072_v14 = vsub.f32 0.0, %v1062_v44 }
 0x319   : > { %v1078_v13 = vmul.f32 1.442695, %v1073_v12  ;;  %v1080_v42 = vmul.f32 1.442695, %v1074_v51 }
 0x31a   : > { %v1076_v15 = vmul.f32 1.442695, %v1072_v14 }
 0x31b   : > { %1422 = vpow2.f32 %v1078_v13 }
 0x31c   : > { %1424 = vpow2.f32 %v1076_v15 }
 0x31d   : > { %1426 = vpow2.f32 %v1080_v42 }
 0x31e   : > { %v1102_v16 = vpop.xlane.xlu0 %1101  ;;  %v1105_v17 = vpop.xlane.xlu1 %1104 }
 0x31f   : > { %v1071_v18 = vpop.xlane.xlu2 %1070  ;;  %v1112_v19 = vsub.f32 0.0, %v1102_v16  ;;  %v1113_v21 = vsub.f32 0.0, %v1105_v17 }
 0x320   : > { %v1075_v20 = vsub.f32 0.0, %v1071_v18 }
 0x321   : > { %v1423_v22 = vpop.eup %1422  ;;  %v1116_v23 = vmul.f32 1.442695, %v1112_v19  ;;  %v1118_v33 = vmul.f32 1.442695, %v1113_v21 }
 0x322   : > { %v1425_v27 = vpop.eup %1424  ;;  %v1085_v28 = vadd.f32 1.0, %v1423_v22  ;;  %v1082_v31 = vmul.f32 1.442695, %v1075_v20 }
 0x323   : > { %v1427_v29 = vpop.eup %1426  ;;  %v1084_v30 = vadd.f32 1.0, %v1425_v27  ;;  %1428 = vpow2.f32 %v1116_v23 }
 0x324   : > { %1430 = vrcp.f32 %v1085_v28  ;;  %v1086_v32 = vadd.f32 1.0, %v1427_v29 }
 0x325   : > { %1432 = vrcp.f32 %v1084_v30 }
 0x326   : > { %1434 = vrcp.f32 %v1086_v32  ;;  %v1111_v34 = vpop.xlane.xlu0 %1110 }
 0x327   : > { %1436 = vpow2.f32 %v1082_v31  ;;  %v1108_v35 = vpop.xlane.xlu2 %1107  ;;  %v1115_v38 = vsub.f32 0.0, %v1111_v34 }
 0x328   : > { %1438 = vpow2.f32 %v1118_v33  ;;  %v1114_v39 = vsub.f32 0.0, %v1108_v35 }
 0x329   : > { %v1429_v40 = vpop.eup %1428  ;;  %v1122_v43 = vmul.f32 1.442695, %v1115_v38 }
 0x32a   : > { %v1431_v45 = vpop.eup %1430  ;;  %v1124_v41 = vadd.f32 1.0, %v1429_v40  ;;  %v1120_v46 = vmul.f32 1.442695, %v1114_v39 }
 0x32b   : > { %v1433_v47 = vpop.eup %1432  ;;  %v1134_v48 = vmul.f32 %v1431_v45, %v1682_v5  ;;  %v1135_v49 = vmul.f32 %v1431_v45, %v1684_v6  ;;  %1440 = vpow2.f32 %v1122_v43 }
 0x32c   : > { %v1435_v50 = vpop.eup %1434  ;;  %v1132_v52 = vmul.f32 %v1433_v47, %v1642_v25  ;;  %v1133_v53 = vmul.f32 %v1433_v47, %v1644_v26  ;;  %1442 = vrcp.f32 %v1124_v41 }
 0x32d   : > { %v1437_v55 = vpop.eup %1436  ;;  %1150 = vst [vmem:[%s1875_s18 + $0x10] sm:$0xff] %v1134_v48  ;;  %v1136_v56 = vmul.f32 %v1435_v50, %v1668_v59  ;;  %1444 = vpow2.f32 %v1120_v46  ;;  %v1137_v6 = vmul.f32 %v1435_v50, %v1670_v60 }
 0x32e   : > { %v1439_v5 = vpop.eup %1438  ;;  %1151 = vst [vmem:[%s1875_s18 + $0x18] sm:$0xff] %v1135_v49  ;;  %v1087_v61 = vadd.f32 1.0, %v1437_v55 }
 0x32f   : > { %1148 = vst [vmem:[%s1875_s18] sm:$0xff] %v1132_v52  ;;  %v1125_v37 = vadd.f32 1.0, %v1439_v5 }
 0x330   : > { %1149 = vst [vmem:[%s1875_s18 + $0x8] sm:$0xff] %v1133_v53  ;;  %1446 = vrcp.f32 %v1087_v61 }
 0x331   : > { %v1441_v25 = vpop.eup %1440  ;;  %1152 = vst [vmem:[%s1875_s18 + $0x20] sm:$0xff] %v1136_v56  ;;  %1448 = vrcp.f32 %v1125_v37 }
 0x332   : > { %v1443_v26 = vpop.eup %1442  ;;  %1153 = vst [vmem:[%s1875_s18 + $0x28] sm:$0xff] %v1137_v6 }
 0x333   : > { %v1445_v59 = vpop.eup %1444  ;;  %v1140_v60 = vmul.f32 %v1443_v26, %v1660_v54  ;;  %v1141_v36 = vmul.f32 %v1443_v26, %v1662_v24  ;;  %v1127_v54 = vadd.f32 1.0, %v1441_v25 }
 0x334   : > { %v1126_v62 = vadd.f32 1.0, %v1445_v59 }
 0x335   : > { %1156 = vst [vmem:[%s1894_s23] sm:$0xff] %v1140_v60  ;;  %v1164_v1 = vmul.f32 %v1140_v60, %v1132_v52  ;;  %v1165_v2 = vmul.f32 %v1141_v36, %v1133_v53  ;;  %v1180_v12 = vadd.f32 %v1140_v60, %v1132_v52  ;;  %v1181_v44 = vadd.f32 %v1141_v36, %v1133_v53 }
 0x336   : > { %v1447_v7 = vpop.eup %1446  ;;  %1157 = vst [vmem:[%s1894_s23 + $0x8] sm:$0xff] %v1141_v36  ;;  %1450 = vrcp.f32 %v1126_v62 }
 0x337   : > { %v1449_v24 = vpop.eup %1448  ;;  %v1138_v8 = vmul.f32 %v1447_v7, %v1664_v57  ;;  %v1139_v11 = vmul.f32 %v1447_v7, %v1666_v58  ;;  %1172 = vst [vmem:[%s1901_s26] sm:$0xff] %v1164_v1  ;;  %1452 = vrcp.f32 %v1127_v54 }
 0x338   : > { %1173 = vst [vmem:[%s1901_s26 + $0x8] sm:$0xff] %v1165_v2  ;;  %v1142_v51 = vmul.f32 %v1449_v24, %v1674_v63  ;;  %v1143_v14 = vmul.f32 %v1449_v24, %v1676_v0 }
 0x339   : > { %1154 = vst [vmem:[%s1875_s18 + $0x30] sm:$0xff] %v1138_v8 }
 0x33a   : > { %1155 = vst [vmem:[%s1875_s18 + $0x38] sm:$0xff] %v1139_v11  ;;  %v1166_v57 = vmul.f32 %v1142_v51, %v1134_v48  ;;  %v1167_v58 = vmul.f32 %v1143_v14, %v1135_v49  ;;  %v1182_v42 = vadd.f32 %v1142_v51, %v1134_v48  ;;  %v1183_v0 = vadd.f32 %v1143_v14, %v1135_v49 }
 0x33b   : > { %1188 = vst [vmem:[%s1901_s26 + $0x40] sm:$0xff] %v1180_v12 }
 0x33c   : > { %v1451_v13 = vpop.eup %1450  ;;  %1189 = vst [vmem:[%s1901_s26 + $0x48] sm:$0xff] %v1181_v44 }
 0x33d   : > { %1158 = vst [vmem:[%s1894_s23 + $0x10] sm:$0xff] %v1142_v51  ;;  %v1144_v63 = vmul.f32 %v1451_v13, %v1678_v3  ;;  %v1145_v15 = vmul.f32 %v1451_v13, %v1680_v4  ;;  %v1453_v16 = vpop.eup %1452 }
 0x33e   : > { %1159 = vst [vmem:[%s1894_s23 + $0x18] sm:$0xff] %v1143_v14  ;;  %v1146_v19 = vmul.f32 %v1453_v16, %v1690_v9  ;;  %v1147_v20 = vmul.f32 %v1453_v16, %v1692_v10 }
 0x33f   : > { %1174 = vst [vmem:[%s1901_s26 + $0x10] sm:$0xff] %v1166_v57  ;;  %v1168_v17 = vmul.f32 %v1144_v63, %v1136_v56  ;;  %v1169_v18 = vmul.f32 %v1145_v15, %v1137_v6  ;;  %v1184_v3 = vadd.f32 %v1144_v63, %v1136_v56  ;;  %v1185_v4 = vadd.f32 %v1145_v15, %v1137_v6 }
 0x340   : > { %1175 = vst [vmem:[%s1901_s26 + $0x18] sm:$0xff] %v1167_v58  ;;  %v1170_v21 = vmul.f32 %v1146_v19, %v1138_v8  ;;  %v1171_v22 = vmul.f32 %v1147_v20, %v1139_v11  ;;  %v1186_v23 = vadd.f32 %v1146_v19, %v1138_v8  ;;  %v1187_v27 = vadd.f32 %v1147_v20, %v1139_v11 }
 0x341   : > { %1190 = vst [vmem:[%s1901_s26 + $0x50] sm:$0xff] %v1182_v42 }
 0x342   : > { %1191 = vst [vmem:[%s1901_s26 + $0x58] sm:$0xff] %v1183_v0 }
 0x343   : > { %1160 = vst [vmem:[%s1894_s23 + $0x20] sm:$0xff] %v1144_v63 }
 0x344   : > { %1161 = vst [vmem:[%s1894_s23 + $0x28] sm:$0xff] %v1145_v15 }
 0x345   : > { %1176 = vst [vmem:[%s1901_s26 + $0x20] sm:$0xff] %v1168_v17 }
 0x346   : > { %1177 = vst [vmem:[%s1901_s26 + $0x28] sm:$0xff] %v1169_v18 }
 0x347   : > { %1192 = vst [vmem:[%s1901_s26 + $0x60] sm:$0xff] %v1184_v3 }
 0x348   : > { %1193 = vst [vmem:[%s1901_s26 + $0x68] sm:$0xff] %v1185_v4 }
 0x349   : > { %1162 = vst [vmem:[%s1894_s23 + $0x30] sm:$0xff] %v1146_v19 }
 0x34a   : > { %1163 = vst [vmem:[%s1894_s23 + $0x38] sm:$0xff] %v1147_v20 }
 0x34b   : > { %1178 = vst [vmem:[%s1901_s26 + $0x30] sm:$0xff] %v1170_v21 }
 0x34c   : > { %1179 = vst [vmem:[%s1901_s26 + $0x38] sm:$0xff] %v1171_v22 }
 0x34d   : > { %1194 = vst [vmem:[%s1901_s26 + $0x70] sm:$0xff] %v1186_v23 }
 0x34e   : > { %1195 = vst [vmem:[%s1901_s26 + $0x78] sm:$0xff] %v1187_v27 }
 0x34f PF: > { %s24_s25 = sadd.s32 1, %s1460_s25  }
 0x350   : > { %p21_p6 = scmp.ge.s32.totalorder %s24_s25, 4  }
 0x352   :  { %23 = sbr.rel (!%p21_p6) target bundleno = 1 (0x1), region = 129 }

// kernel: cfem_mid.2
= control target key start
LH: loop header
LB: loop body
LE: loop exit
PB: predicated region body
PF: predicated region fallthrough
CT: control target
= control target key end

     0   :  { %s2131_s27 = smov 0   ;;  %s2133_s28 = smov 0   ;;  %s3657_s0 = inlined_call_operand.vmem [shape: f32[2,16,1024], index: 0, kind: input, shape index: {}]   ;;  %s3658_s1 = inlined_call_operand.vmem [shape: f32[2,16,1024], index: 1, kind: input, shape index: {}]   ;;  %s3659_s2 = inlined_call_operand.vmem [shape: f32[32,16], index: 2, kind: input, shape index: {}]   ;;  %s3660_s3 = inlined_call_operand.vmem [shape: f32[1024,256], index: 3, kind: input, shape index: {}]   ;;  %s3661_s4 = inlined_call_operand.vmem [shape: f32[32,1], index: 4, kind: input, shape index: {}]   ;;  %s3662_s5 = inlined_call_operand.vmem [shape: f32[32,1], index: 5, kind: input, shape index: {}]   ;;  %s3663_s6 = inlined_call_operand.vmem [shape: bf16[4,32,256], index: 6, kind: output, shape index: {0}]   ;;  %s3664_s7 = inlined_call_operand.vmem [shape: f32[2,32,1], index: 7, kind: output, shape index: {1}]   ;;  %s3665_s8 = inlined_call_operand.vmem [shape: f32[2,32,1], index: 8, kind: output, shape index: {2}]  }
   0x1   :  { %s2135_s29 = smov 0   ;;  %s2137_s30 = smov 0  }
   0x2   :  { %s2139_s9 = smov 0  }
   0x3 LB: > { %s28_s10 = sadd.s32 1, %s2071_s29  ;;  %s31_s11 = sadd.s32 1, %s2075_s30  ;;  %s2079_s9 = sphi %s2139_s9, %s19_s9   ;;  %s2075_s30 = sphi %s2137_s30, %s3677_s30   ;;  %s2071_s29 = sphi %s2135_s29, %s3676_s29   ;;  %s2067_s28 = sphi %s2133_s28, %s3675_s28   ;;  %s2063_s27 = sphi %s2131_s27, %s3674_s27  }
   0x4   : > { %p29_p0 = scmp.ge.s32.totalorder %s28_s10, 2  ;;  %p1807_p1 = scmp.ge.s32.totalorder %s2079_s9, 1 }
   0x5   : > { %p305_p2 = scmp.lt.s32.totalorder %s2079_s9, 5 }
   0x6   : > { %s3679_s10 = smov (%p29_p0, %s28_s10), 0  ;;  %s3681_s11 = smov (!%p29_p0, %s31_s11), %s2075_s30 }
   0x7   : > { %p306_p3 = pnand %p1807_p1, %p305_p2  ;;  %p33_p4 = scmp.ge.s32.totalorder %s3681_s11, 2 }
   0x8   : > { %s359_s12 = ssub.s32 (!%p306_p3), 1, %s2067_s28  ;;  %s368_s13 = smul.u32 (!%p306_p3), %s2063_s27, %s2067_s28 }
   0x9   : > { %s3683_s11 = smov (%p33_p4, %s3681_s11), 0  ;;  %309 = sbr.rel (%p306_p3) target bundleno = 741 (0x2e5), region = 44 }
   0xa   : > { %s360_s14 = smul.u32 (!%p306_p3), %s2063_s27, %s359_s12  ;;  %p369_p5 = scmp.lt.s32.totalorder (!%p306_p3), %s368_s13, 1 }
   0xb   : > { %p394_p7 = scmp.eq.s32.totalorder (!%p306_p3), %s2067_s28, 0  ;;  %p384_p8 = scmp.lt.s32.totalorder (!%p306_p3), %s2067_s28, 1 }
   0xc   : > { %p361_p6 = scmp.lt.s32.totalorder (!%p306_p3), %s360_s14, 1  ;;  %s3668_s20 = smov (!%p306_p3), 127  }
   0xd   : > { %s2082_s21 = smov (!%p306_p3), 95   ;;  %p1827_p10 = scmp.ne.s32.totalorder (!%p306_p3), %s2063_s27, 0 }
   0xe   : > { %s3685_s13 = smov (!%p369_p5, %s368_s13), 1  ;;  %s3687_s14 = smov (!%p361_p6, %s360_s14), 1  ;;  %v707_v60 = vld [vmem:[%s3660_s3 + $0xf0] sm:$0xff]  ;;  %vm1305_vm3 = vcmask 130048  }
   0xf   : > { %s1832_s15 = sshll.u32 %s3685_s13, 7  ;;  %s1831_s16 = sshll.u32 %s3687_s14, 7  ;;  %v739_v61 = vld [vmem:[%s3660_s3 + $0x1f0] sm:$0xff]  ;;  %933 = vmatpush.msra.mxu0 %v707_v60 }
  0x10   : > { %s2173_s19 = scalar_lea.vmem %s3658_s1, %s1832_s15  ;;  %s2178_s22 = scalar_lea.vmem %s3657_s0, %s1831_s16  ;;  %v771_v62 = vld [vmem:[%s3660_s3 + $0x2f0] sm:$0xff]  ;;  %956 = vmatpush.msra.mxu1 %v739_v61 }
  0x11   : > { %s395_s23 = scalar_select %p394_p7, 1, 0  ;;  %v401_v0 = vld [vmem:[%s2178_s22 + $0x20] sm:$0xff]  ;;  %v407_v1 = vld [vmem:[%s2178_s22 + $0x50] sm:$0xff]  ;;  %v400_v3 = vld [vmem:[%s2178_s22 + $0x18] sm:$0xff]  ;;  %979 = vmatpush.msra.mxu2 %v771_v62 }
  0x12   : > { %s385_s24 = scalar_select %p384_p8, %s2067_s28, 1  ;;  %v399_v2 = vld [vmem:[%s2178_s22 + $0x10] sm:$0xff]  ;;  %v435_v4 = vld [vmem:[%s2173_s19 + $0x20] sm:$0xff]  ;;  %v434_v8 = vld [vmem:[%s2173_s19 + $0x18] sm:$0xff] }
  0x13   : > { %s396_s25 = scvt.s32.f32 %s395_s23  ;;  %v441_v5 = vld [vmem:[%s2173_s19 + $0x50] sm:$0xff]  ;;  %v397_v9 = vld [vmem:[%s2178_s22] sm:$0xff]  ;;  %v398_v14 = vld [vmem:[%s2178_s22 + $0x8] sm:$0xff]  ;;  %s3666_s23 = smov 96  }
  0x14   : > { %s1834_s26 = sshll.u32 %s385_s24, 5  ;;  %v433_v7 = vld [vmem:[%s2173_s19 + $0x10] sm:$0xff]  ;;  %v431_v15 = vld [vmem:[%s2173_s19] sm:$0xff]  ;;  %v432_v16 = vld [vmem:[%s2173_s19 + $0x8] sm:$0xff]  ;;  %s3670_s24 = smov 96  }
  0x15   : > { %v2188_v6 = vstv %s396_s25  ;;  %s430_s12 = ssub.f32 1.0, %s396_s25  ;;  %s2196_s15 = scalar_lea.vmem %s3664_s7, %s1834_s26  ;;  %v405_v35 = vld [vmem:[%s2178_s22 + $0x40] sm:$0xff]  ;;  %v408_v36 = vld [vmem:[%s2178_s22 + $0x58] sm:$0xff]  ;;  %v406_v45 = vld [vmem:[%s2178_s22 + $0x48] sm:$0xff] }
  0x16   : > { %v418_v10 = vmul.f32 %v2188_v6, %v401_v0  ;;  %v424_v11 = vmul.f32 %v2188_v6, %v407_v1  ;;  %v416_v12 = vmul.f32 %v2188_v6, %v399_v2  ;;  %v417_v13 = vmul.f32 %v2188_v6, %v400_v3  ;;  %s2208_s18 = scalar_lea.vmem %s3665_s8, %s1834_s26  ;;  %v439_v37 = vld [vmem:[%s2173_s19 + $0x40] sm:$0xff]  ;;  %v442_v38 = vld [vmem:[%s2173_s19 + $0x58] sm:$0xff]  ;;  %v440_v47 = vld [vmem:[%s2173_s19 + $0x48] sm:$0xff] }
  0x17   : > { %v2210_v17 = vstv %s430_s12  ;;  %v414_v22 = vmul.f32 %v2188_v6, %v397_v9  ;;  %v415_v23 = vmul.f32 %v2188_v6, %v398_v14  ;;  %v422_v39 = vmul.f32 %v2188_v6, %v405_v35  ;;  %v409_v46 = vld [vmem:[%s2178_s22 + $0x60] sm:$0xff]  ;;  %v403_v54 = vld [vmem:[%s2178_s22 + $0x30] sm:$0xff]  ;;  %v404_v55 = vld [vmem:[%s2178_s22 + $0x38] sm:$0xff] }
  0x18   : > { %v452_v18 = vmul.f32 %v2210_v17, %v435_v4  ;;  %v458_v19 = vmul.f32 %v2210_v17, %v441_v5  ;;  %v450_v20 = vmul.f32 %v2210_v17, %v433_v7  ;;  %v451_v21 = vmul.f32 %v2210_v17, %v434_v8  ;;  %v443_v48 = vld [vmem:[%s2173_s19 + $0x60] sm:$0xff]  ;;  %v437_v58 = vld [vmem:[%s2173_s19 + $0x30] sm:$0xff]  ;;  %v438_v59 = vld [vmem:[%s2173_s19 + $0x38] sm:$0xff] }
  0x19   : > { %v448_v24 = vmul.f32 %v2210_v17, %v431_v15  ;;  %v449_v25 = vmul.f32 %v2210_v17, %v432_v16  ;;  %v425_v40 = vmul.f32 %v2188_v6, %v408_v36  ;;  %v456_v41 = vmul.f32 %v2210_v17, %v439_v37  ;;  %v803_v63 = vld [vmem:[%s3660_s3 + $0x3f0] sm:$0xff]  ;;  %v705_v0 = vld [vmem:[%s3660_s3 + $0xe0] sm:$0xff]  ;;  %v402_v14 = vld [vmem:[%s2178_s22 + $0x28] sm:$0xff] }
  0x1a   : > { %v2220_v26 = vadd.f32 %v452_v18, %v418_v10  ;;  %v2222_v27 = vadd.f32 %v458_v19, %v424_v11  ;;  %v2224_v28 = vadd.f32 %v450_v20, %v416_v12  ;;  %v2226_v29 = vadd.f32 %v451_v21, %v417_v13  ;;  %v737_v1 = vld [vmem:[%s3660_s3 + $0x1e0] sm:$0xff]  ;;  %1002 = vmatpush.msra.mxu3 %v803_v63  ;;  %v703_v8 = vld [vmem:[%s3660_s3 + $0xd0] sm:$0xff]  ;;  %v436_v16 = vld [vmem:[%s2173_s19 + $0x28] sm:$0xff] }
  0x1b   : > { %v2234_v32 = vadd.f32 %v448_v24, %v414_v22  ;;  %v2236_v33 = vadd.f32 %v449_v25, %v415_v23  ;;  %v459_v42 = vmul.f32 %v2210_v17, %v442_v38  ;;  %v2254_v43 = vadd.f32 %v456_v41, %v422_v39  ;;  %v769_v5 = vld [vmem:[%s3660_s3 + $0x2e0] sm:$0xff]  ;;  %934 = vmatpush.msra.mxu0 %v705_v0  ;;  %v735_v11 = vld [vmem:[%s3660_s3 + $0x1d0] sm:$0xff] }
  0x1c   : > { %v1933_v30 = vpack.i.bf16 %v2222_v27, %v2220_v26  ;;  %v1923_v31 = vpack.i.bf16 %v2226_v29, %v2224_v28  ;;  %v423_v49 = vmul.f32 %v2188_v6, %v406_v45  ;;  %v426_v50 = vmul.f32 %v2188_v6, %v409_v46  ;;  %v801_v7 = vld [vmem:[%s3660_s3 + $0x3e0] sm:$0xff]  ;;  %957 = vmatpush.msra.mxu1 %v737_v1  ;;  %v767_v12 = vld [vmem:[%s3660_s3 + $0x2d0] sm:$0xff] }
  0x1d   : > { %v1938_v34 = vpack.i.bf16 %v2236_v33, %v2234_v32  ;;  %v2256_v44 = vadd.f32 %v459_v42, %v425_v40  ;;  %v457_v52 = vmul.f32 %v2210_v17, %v440_v47  ;;  %v460_v53 = vmul.f32 %v2210_v17, %v443_v48  ;;  %v799_v13 = vld [vmem:[%s3660_s3 + $0x3d0] sm:$0xff]  ;;  %980 = vmatpush.msra.mxu2 %v769_v5  ;;  %v701_v18 = vld [vmem:[%s3660_s3 + $0xc0] sm:$0xff] }
  0x1e   : > { %1934 = vrot.lane.b32.xlu2 %v1933_v30, %s3668_s20  ;;  %1924 = vrot.lane.b32.xlu1 %v1923_v31, %s2082_s21  ;;  %v420_v2 = vmul.f32 %v2188_v6, %v403_v54  ;;  %v421_v3 = vmul.f32 %v2188_v6, %v404_v55  ;;  %v454_v4 = vmul.f32 %v2210_v17, %v437_v58  ;;  %v411_v15 = vld [vmem:[%s2178_s22 + $0x70] sm:$0xff]  ;;  %v733_v20 = vld [vmem:[%s3660_s3 + $0x1c0] sm:$0xff] }
  0x1f   : > { %1914 = vrot.lane.b32.xlu0 %v1923_v31, %s3668_s20  ;;  %v1968_v51 = vpack.i.bf16 %v2254_v43, %v2256_v44  ;;  %v2273_v56 = vadd.f32 %v457_v52, %v423_v49  ;;  %v2275_v57 = vadd.f32 %v460_v53, %v426_v50  ;;  %v455_v10 = vmul.f32 %v2210_v17, %v438_v59  ;;  %v445_v19 = vld [vmem:[%s2173_s19 + $0x70] sm:$0xff]  ;;  %v765_v21 = vld [vmem:[%s3660_s3 + $0x2c0] sm:$0xff]  ;;  %v410_v52 = vld [vmem:[%s2178_s22 + $0x68] sm:$0xff] }
  0x20   : > { %1003 = vmatpush.msra.mxu3 %v801_v7  ;;  %935 = vmatpush.msra.mxu0 %v703_v8  ;;  %v2337_v22 = vadd.f32 %v454_v4, %v420_v2  ;;  %v797_v24 = vld [vmem:[%s3660_s3 + $0x3c0] sm:$0xff]  ;;  %v699_v25 = vld [vmem:[%s3660_s3 + $0xb0] sm:$0xff]  ;;  %v428_v37 = vmul.f32 %v2188_v6, %v411_v15  ;;  %v453_v38 = vmul.f32 %v2210_v17, %v436_v16  ;;  %v412_v53 = vld [vmem:[%s2178_s22 + $0x78] sm:$0xff] }
  0x21   : > { %v1983_v9 = vpack.i.bf16 %v2275_v57, %v2273_v56  ;;  %958 = vmatpush.msra.mxu1 %v735_v11  ;;  %981 = vmatpush.msra.mxu2 %v767_v12  ;;  %v2339_v23 = vadd.f32 %v455_v10, %v421_v3  ;;  %v795_v35 = vld [vmem:[%s3660_s3 + $0x3b0] sm:$0xff]  ;;  %v697_v36 = vld [vmem:[%s3660_s3 + $0xa0] sm:$0xff]  ;;  %v462_v39 = vmul.f32 %v2210_v17, %v445_v19  ;;  %v444_v54 = vld [vmem:[%s2173_s19 + $0x68] sm:$0xff] }
  0x22   : > { %1004 = vmatpush.msra.mxu3 %v799_v13  ;;  %936 = vmatpush.msra.mxu0 %v701_v18  ;;  %v729_v40 = vld [vmem:[%s3660_s3 + $0x1a0] sm:$0xff]  ;;  %v695_v46 = vld [vmem:[%s3660_s3 + $0x90] sm:$0xff]  ;;  %v446_v55 = vld [vmem:[%s2173_s19 + $0x78] sm:$0xff]  ;;  %v427_v59 = vmul.f32 %v2188_v6, %v410_v52  ;;  %v429_v60 = vmul.f32 %v2188_v6, %v412_v53  ;;  %v461_v61 = vmul.f32 %v2210_v17, %v444_v54 }
  0x23   : > { %959 = vmatpush.msra.mxu1 %v733_v20  ;;  %982 = vmatpush.msra.mxu2 %v765_v21  ;;  %v761_v41 = vld [vmem:[%s3660_s3 + $0x2a0] sm:$0xff]  ;;  %v1998_v42 = vpack.i.bf16 %v2339_v23, %v2337_v22  ;;  %v727_v47 = vld [vmem:[%s3660_s3 + $0x190] sm:$0xff]  ;;  %v2383_v49 = vadd.f32 %v462_v39, %v428_v37  ;;  %v463_v62 = vmul.f32 %v2210_v17, %v446_v55 }
  0x24   : > { %1005 = vmatpush.msra.mxu3 %v797_v24  ;;  %937 = vmatpush.msra.mxu0 %v699_v25  ;;  %v793_v45 = vld [vmem:[%s3660_s3 + $0x3a0] sm:$0xff]  ;;  %v759_v50 = vld [vmem:[%s3660_s3 + $0x290] sm:$0xff]  ;;  %v2406_v63 = vadd.f32 %v461_v61, %v427_v59 }
  0x25   : > { %v2408_v0 = vadd.f32 %v463_v62, %v429_v60  ;;  %v725_v17 = vld [vmem:[%s3660_s3 + $0x180] sm:$0xff]  ;;  %v691_v4 = vld [vmem:[%s3660_s3 + $0x70] sm:$0xff] }
  0x26   : > { %1939 = vrot.lane.b32.xlu2 %v1938_v34, %s3666_s23  ;;  %1929 = vrot.lane.b32.xlu1 %v1938_v34, %s3668_s20  ;;  %v757_v2 = vld [vmem:[%s3660_s3 + $0x280] sm:$0xff]  ;;  %v723_v5 = vld [vmem:[%s3660_s3 + $0x170] sm:$0xff] }
  0x27   : > { %1919 = vrot.lane.b32.xlu0 %v1923_v31, %s3666_s23  ;;  %v763_v31 = vld [vmem:[%s3660_s3 + $0x2b0] sm:$0xff]  ;;  %1006 = vmatpush.msra.mxu3 %v795_v35  ;;  %v2028_v1 = vpack.i.bf16 %v2406_v63, %v2408_v0  ;;  %v789_v3 = vld [vmem:[%s3660_s3 + $0x380] sm:$0xff] }
  0x28   : > { %983 = vmatpush.msra.mxu2 %v763_v31  ;;  %938 = vmatpush.msra.mxu0 %v697_v36  ;;  %v755_v7 = vld [vmem:[%s3660_s3 + $0x270] sm:$0xff]  ;;  %v721_v10 = vld [vmem:[%s3660_s3 + $0x160] sm:$0xff] }
  0x29   : > { %1007 = vmatpush.msra.mxu3 %v793_v45  ;;  %v787_v8 = vld [vmem:[%s3660_s3 + $0x370] sm:$0xff]  ;;  %v753_v11 = vld [vmem:[%s3660_s3 + $0x260] sm:$0xff] }
  0x2a   : > { %984 = vmatpush.msra.mxu2 %v761_v41  ;;  %939 = vmatpush.msra.mxu0 %v695_v46  ;;  %v785_v12 = vld [vmem:[%s3660_s3 + $0x360] sm:$0xff]  ;;  %v687_v13 = vld [vmem:[%s3660_s3 + $0x50] sm:$0xff] }
  0x2b   : > { %v751_v15 = vld [vmem:[%s3660_s3 + $0x250] sm:$0xff]  ;;  %v685_v18 = vld [vmem:[%s3660_s3 + $0x40] sm:$0xff] }
  0x2c   : > { %985 = vmatpush.msra.mxu2 %v759_v50  ;;  %v783_v16 = vld [vmem:[%s3660_s3 + $0x350] sm:$0xff]  ;;  %v717_v19 = vld [vmem:[%s3660_s3 + $0x140] sm:$0xff] }
  0x2d   : > { %v749_v20 = vld [vmem:[%s3660_s3 + $0x240] sm:$0xff]  ;;  %v683_v24 = vld [vmem:[%s3660_s3 + $0x30] sm:$0xff] }
  0x2e   : > { %1954 = vrot.lane.b32.xlu2 %v1933_v30, %s2082_s21  ;;  %1949 = vrot.lane.b32.xlu1 %v1938_v34, %s2082_s21  ;;  %v419_v34 = vmul.f32 %v2188_v6, %v402_v14  ;;  %v693_v6 = vld [vmem:[%s3660_s3 + $0x80] sm:$0xff]  ;;  %v719_v14 = vld [vmem:[%s3660_s3 + $0x150] sm:$0xff] }
  0x2f   : > { %1944 = vrot.lane.b32.xlu0 %v1933_v30, %s3666_s23  ;;  %v731_v30 = vld [vmem:[%s3660_s3 + $0x1b0] sm:$0xff]  ;;  %940 = vmatpush.msra.mxu0 %v693_v6  ;;  %v781_v21 = vld [vmem:[%s3660_s3 + $0x340] sm:$0xff] }
  0x30   : > { %960 = vmatpush.msra.mxu1 %v731_v30  ;;  %v2381_v48 = vadd.f32 %v453_v38, %v419_v34  ;;  %986 = vmatpush.msra.mxu2 %v757_v2  ;;  %v715_v25 = vld [vmem:[%s3660_s3 + $0x130] sm:$0xff]  ;;  %v681_v34 = vld [vmem:[%s3660_s3 + $0x20] sm:$0xff] }
  0x31   : > { %941 = vmatpush.msra.mxu0 %v691_v4  ;;  %v747_v30 = vld [vmem:[%s3660_s3 + $0x230] sm:$0xff]  ;;  %v713_v35 = vld [vmem:[%s3660_s3 + $0x120] sm:$0xff] }
  0x32   : > { %961 = vmatpush.msra.mxu1 %v729_v40  ;;  %v2013_v58 = vpack.i.bf16 %v2383_v49, %v2381_v48  ;;  %987 = vmatpush.msra.mxu2 %v755_v7  ;;  %v779_v31 = vld [vmem:[%s3660_s3 + $0x330] sm:$0xff]  ;;  %v745_v36 = vld [vmem:[%s3660_s3 + $0x220] sm:$0xff] }
  0x33   : > { %v777_v37 = vld [vmem:[%s3660_s3 + $0x320] sm:$0xff]  ;;  %v679_v38 = vld [vmem:[%s3660_s3 + $0x10] sm:$0xff] }
  0x34   : > { %962 = vmatpush.msra.mxu1 %v727_v47  ;;  %988 = vmatpush.msra.mxu2 %v753_v11  ;;  %v711_v39 = vld [vmem:[%s3660_s3 + $0x110] sm:$0xff]  ;;  %v709_v45 = vld [vmem:[%s3660_s3 + $0x100] sm:$0xff] }
  0x35   : > { %v743_v40 = vld [vmem:[%s3660_s3 + $0x210] sm:$0xff]  ;;  %v741_v46 = vld [vmem:[%s3660_s3 + $0x200] sm:$0xff] }
  0x36   : > { %1969 = vrot.lane.b32.xlu2 %v1968_v51, %s2082_s21  ;;  %1964 = vrot.lane.b32.xlu1 %v1968_v51, %s3666_s23  ;;  %s3671_s23 = smov 127   ;;  %v775_v41 = vld [vmem:[%s3660_s3 + $0x310] sm:$0xff]  ;;  %v773_v47 = vld [vmem:[%s3660_s3 + $0x300] sm:$0xff] }
  0x37   : > { %1959 = vrot.lane.b32.xlu0 %v1968_v51, %s3668_s20  ;;  %v791_v51 = vld [vmem:[%s3660_s3 + $0x390] sm:$0xff]  ;;  %963 = vmatpush.msra.mxu1 %v725_v17  ;;  %v833_v54 = vld [vmem:[%s3660_s3 + $0x4e0] sm:$0xff] }
  0x38   : > { %1008 = vmatpush.msra.mxu3 %v791_v51  ;;  %989 = vmatpush.msra.mxu2 %v751_v15  ;;  %v835_v50 = vld [vmem:[%s3660_s3 + $0x4f0] sm:$0xff]  ;;  %v865_v55 = vld [vmem:[%s3660_s3 + $0x5e0] sm:$0xff] }
  0x39   : > { %964 = vmatpush.msra.mxu1 %v723_v5  ;;  %v867_v51 = vld [vmem:[%s3660_s3 + $0x5f0] sm:$0xff]  ;;  %v929_v59 = vld [vmem:[%s3660_s3 + $0x7e0] sm:$0xff] }
  0x3a   : > { %1009 = vmatpush.msra.mxu3 %v789_v3  ;;  %990 = vmatpush.msra.mxu2 %v749_v20  ;;  %v899_v52 = vld [vmem:[%s3660_s3 + $0x6f0] sm:$0xff]  ;;  %v829_v6 = vld [vmem:[%s3660_s3 + $0x4c0] sm:$0xff] }
  0x3b   : > { %965 = vmatpush.msra.mxu1 %v721_v10  ;;  %v931_v53 = vld [vmem:[%s3660_s3 + $0x7f0] sm:$0xff]  ;;  %v861_v17 = vld [vmem:[%s3660_s3 + $0x5c0] sm:$0xff] }
  0x3c   : > { %1010 = vmatpush.msra.mxu3 %v787_v8  ;;  %991 = vmatpush.msra.mxu2 %v747_v30  ;;  %v831_v60 = vld [vmem:[%s3660_s3 + $0x4d0] sm:$0xff]  ;;  %v893_v2 = vld [vmem:[%s3660_s3 + $0x6c0] sm:$0xff] }
  0x3d   : > { %966 = vmatpush.msra.mxu1 %v719_v14  ;;  %v863_v61 = vld [vmem:[%s3660_s3 + $0x5d0] sm:$0xff]  ;;  %v925_v3 = vld [vmem:[%s3660_s3 + $0x7c0] sm:$0xff] }
  0x3e   : > { %1984 = vrot.lane.b32.xlu2 %v1983_v9, %s2082_s21  ;;  %1979 = vrot.lane.b32.xlu1 %v1983_v9, %s3670_s24  ;;  %v895_v62 = vld [vmem:[%s3660_s3 + $0x6d0] sm:$0xff]  ;;  %v857_v10 = vld [vmem:[%s3660_s3 + $0x5a0] sm:$0xff] }
  0x3f   : > { %1974 = vrot.lane.b32.xlu0 %v1983_v9, %s3671_s23  ;;  %v689_v9 = vld [vmem:[%s3660_s3 + $0x60] sm:$0xff]  ;;  %1011 = vmatpush.msra.mxu3 %v785_v12  ;;  %v827_v4 = vld [vmem:[%s3660_s3 + $0x4b0] sm:$0xff] }
  0x40   : > { %942 = vmatpush.msra.mxu0 %v689_v9  ;;  %967 = vmatpush.msra.mxu1 %v717_v19  ;;  %v859_v5 = vld [vmem:[%s3660_s3 + $0x5b0] sm:$0xff]  ;;  %v825_v9 = vld [vmem:[%s3660_s3 + $0x4a0] sm:$0xff] }
  0x41   : > { %1012 = vmatpush.msra.mxu3 %v783_v16  ;;  %992 = vmatpush.msra.mxu2 %v745_v36  ;;  %v891_v7 = vld [vmem:[%s3660_s3 + $0x6b0] sm:$0xff]  ;;  %v889_v11 = vld [vmem:[%s3660_s3 + $0x6a0] sm:$0xff] }
  0x42   : > { %943 = vmatpush.msra.mxu0 %v687_v13  ;;  %968 = vmatpush.msra.mxu1 %v715_v25  ;;  %v923_v8 = vld [vmem:[%s3660_s3 + $0x7b0] sm:$0xff]  ;;  %v921_v12 = vld [vmem:[%s3660_s3 + $0x7a0] sm:$0xff] }
  0x43   : > { %1013 = vmatpush.msra.mxu3 %v781_v21  ;;  %993 = vmatpush.msra.mxu2 %v743_v40  ;;  %v823_v13 = vld [vmem:[%s3660_s3 + $0x490] sm:$0xff]  ;;  %v853_v19 = vld [vmem:[%s3660_s3 + $0x580] sm:$0xff] }
  0x44   : > { %944 = vmatpush.msra.mxu0 %v685_v18  ;;  %969 = vmatpush.msra.mxu1 %v713_v35  ;;  %v855_v14 = vld [vmem:[%s3660_s3 + $0x590] sm:$0xff]  ;;  %v821_v18 = vld [vmem:[%s3660_s3 + $0x480] sm:$0xff] }
  0x45   : > { %1014 = vmatpush.msra.mxu3 %v779_v31  ;;  %994 = vmatpush.msra.mxu2 %v741_v46  ;;  %v887_v15 = vld [vmem:[%s3660_s3 + $0x690] sm:$0xff]  ;;  %v885_v20 = vld [vmem:[%s3660_s3 + $0x680] sm:$0xff] }
  0x46   : > { %1999 = vrot.lane.b32.xlu2 %v1998_v42, %s2082_s21  ;;  %1994 = vrot.lane.b32.xlu1 %v1998_v42, %s3670_s24  ;;  %v919_v16 = vld [vmem:[%s3660_s3 + $0x790] sm:$0xff]  ;;  %v917_v21 = vld [vmem:[%s3660_s3 + $0x780] sm:$0xff] }
  0x47   : > { %1989 = vrot.lane.b32.xlu0 %v1998_v42, %s3671_s23  ;;  %945 = vmatpush.msra.mxu0 %v683_v24  ;;  %v677_v42 = vld [vmem:[%s3660_s3] sm:$0xff]  ;;  %v819_v24 = vld [vmem:[%s3660_s3 + $0x470] sm:$0xff] }
  0x48   : > { %1015 = vmatpush.msra.mxu3 %v777_v37  ;;  %970 = vmatpush.msra.mxu1 %v711_v39  ;;  %v851_v25 = vld [vmem:[%s3660_s3 + $0x570] sm:$0xff]  ;;  %v817_v35 = vld [vmem:[%s3660_s3 + $0x460] sm:$0xff] }
  0x49   : > { %946 = vmatpush.msra.mxu0 %v681_v34  ;;  %1071 = vmatpush.msrb.mxu2 %v899_v52  ;;  %v883_v31 = vld [vmem:[%s3660_s3 + $0x670] sm:$0xff]  ;;  %v849_v36 = vld [vmem:[%s3660_s3 + $0x560] sm:$0xff] }
  0x4a   : > { %1016 = vmatpush.msra.mxu3 %v775_v41  ;;  %971 = vmatpush.msra.mxu1 %v709_v45  ;;  %v915_v34 = vld [vmem:[%s3660_s3 + $0x770] sm:$0xff]  ;;  %v881_v37 = vld [vmem:[%s3660_s3 + $0x660] sm:$0xff] }
  0x4b   : > { %947 = vmatpush.msra.mxu0 %v679_v38  ;;  %v913_v38 = vld [vmem:[%s3660_s3 + $0x760] sm:$0xff]  ;;  %v815_v39 = vld [vmem:[%s3660_s3 + $0x450] sm:$0xff] }
  0x4c   : > { %1017 = vmatpush.msra.mxu3 %v773_v47  ;;  %1048 = vmatpush.msrb.mxu1 %v867_v51  ;;  %v847_v40 = vld [vmem:[%s3660_s3 + $0x550] sm:$0xff]  ;;  %v813_v45 = vld [vmem:[%s3660_s3 + $0x440] sm:$0xff] }
  0x4d   : > { %948 = vmatpush.msra.mxu0 %v677_v42  ;;  %v879_v41 = vld [vmem:[%s3660_s3 + $0x650] sm:$0xff]  ;;  %v845_v46 = vld [vmem:[%s3660_s3 + $0x540] sm:$0xff] }
  0x4e   : > { %2014 = vrot.lane.b32.xlu2 %v2013_v58, %s2082_s21  ;;  %2009 = vrot.lane.b32.xlu1 %v2013_v58, %s3670_s24  ;;  %v911_v42 = vld [vmem:[%s3660_s3 + $0x750] sm:$0xff]  ;;  %v877_v47 = vld [vmem:[%s3660_s3 + $0x640] sm:$0xff] }
  0x4f   : > { %2004 = vrot.lane.b32.xlu0 %v2013_v58, %s3671_s23  ;;  %1025 = vmatpush.msrb.mxu0 %v835_v50  ;;  %v897_v58 = vld [vmem:[%s3660_s3 + $0x6e0] sm:$0xff]  ;;  %v811_v51 = vld [vmem:[%s3660_s3 + $0x430] sm:$0xff] }
  0x50   : > { %1094 = vmatpush.msrb.mxu3 %v931_v53  ;;  %1049 = vmatpush.msrb.mxu1 %v865_v55  ;;  %v909_v50 = vld [vmem:[%s3660_s3 + $0x740] sm:$0xff]  ;;  %v843_v52 = vld [vmem:[%s3660_s3 + $0x530] sm:$0xff] }
  0x51   : > { %1026 = vmatpush.msrb.mxu0 %v833_v54  ;;  %1072 = vmatpush.msrb.mxu2 %v897_v58  ;;  %v875_v53 = vld [vmem:[%s3660_s3 + $0x630] sm:$0xff]  ;;  %v809_v55 = vld [vmem:[%s3660_s3 + $0x420] sm:$0xff] }
  0x52   : > { %1095 = vmatpush.msrb.mxu3 %v929_v59  ;;  %1050 = vmatpush.msrb.mxu1 %v863_v61  ;;  %v907_v54 = vld [vmem:[%s3660_s3 + $0x730] sm:$0xff]  ;;  %v841_v58 = vld [vmem:[%s3660_s3 + $0x520] sm:$0xff] }
  0x53   : > { %1027 = vmatpush.msrb.mxu0 %v831_v60  ;;  %1073 = vmatpush.msrb.mxu2 %v895_v62  ;;  %v873_v60 = vld [vmem:[%s3660_s3 + $0x620] sm:$0xff]  ;;  %v807_v62 = vld [vmem:[%s3660_s3 + $0x410] sm:$0xff] }
  0x54   : > { %1051 = vmatpush.msrb.mxu1 %v861_v17  ;;  %v905_v61 = vld [vmem:[%s3660_s3 + $0x720] sm:$0xff]  ;;  %v903_v17 = vld [vmem:[%s3660_s3 + $0x710] sm:$0xff] }
  0x55   : > { %1028 = vmatpush.msrb.mxu0 %v829_v6  ;;  %1074 = vmatpush.msrb.mxu2 %v893_v2  ;;  %v871_v6 = vld [vmem:[%s3660_s3 + $0x610] sm:$0xff]  ;;  %v805_v2 = vld [vmem:[%s3660_s3 + $0x400] sm:$0xff] }
  0x56   : > { %2029 = vrot.lane.b32.xlu2 %v2028_v1, %s2082_s21  ;;  %2024 = vrot.lane.b32.xlu1 %v2028_v1, %s3670_s24 }
  0x57   : > { %2019 = vrot.lane.b32.xlu0 %v2028_v1, %s3671_s23  ;;  %v927_v1 = vld [vmem:[%s3660_s3 + $0x7d0] sm:$0xff]  ;;  %1029 = vmatpush.msrb.mxu0 %v827_v4  ;;  %v869_v4 = vld [vmem:[%s3660_s3 + $0x600] sm:$0xff]  ;;  %s1812_s23 = sshll.u32 %s2067_s28, 1 }
  0x58   : > { %1096 = vmatpush.msrb.mxu3 %v927_v1  ;;  %1052 = vmatpush.msrb.mxu1 %v859_v5  ;;  %v839_v1 = vld [vmem:[%s3660_s3 + $0x510] sm:$0xff]  ;;  %v901_v5 = vld [vmem:[%s3660_s3 + $0x700] sm:$0xff]  ;;  %s376_s17 = sadd.s32 %s2063_s27, %s1812_s23 }
  0x59   : > { %1075 = vmatpush.msrb.mxu2 %v891_v7  ;;  %1030 = vmatpush.msrb.mxu0 %v825_v9  ;;  %p377_p9 = scmp.lt.s32.totalorder %s376_s17, 3 }
  0x5a   : > { %1097 = vmatpush.msrb.mxu3 %v925_v3  ;;  %1053 = vmatpush.msrb.mxu1 %v857_v10  ;;  %v837_v3 = vld [vmem:[%s3660_s3 + $0x500] sm:$0xff] }
  0x5b   : > { %1076 = vmatpush.msrb.mxu2 %v889_v11  ;;  %1031 = vmatpush.msrb.mxu0 %v823_v13  ;;  %s3689_s17 = smov (!%p377_p9, %s376_s17), 3 }
  0x5c   : > { %1098 = vmatpush.msrb.mxu3 %v923_v8  ;;  %1054 = vmatpush.msrb.mxu1 %v855_v14  ;;  %v512_v8 = vlaneseq  ;;  %s1833_s25 = sshll.u32 %s3689_s17, 5 }
  0x5d   : > { %1077 = vmatpush.msrb.mxu2 %v887_v15  ;;  %1032 = vmatpush.msrb.mxu0 %v821_v18  ;;  %s381_s22 = scalar_lea.vmem %s3663_s6, %s1833_s25 }
  0x5e   : > { %1099 = vmatpush.msrb.mxu3 %v921_v12  ;;  %1055 = vmatpush.msrb.mxu1 %v853_v19  ;;  %v2722_v11 = vand.u32 127, %v512_v8 }
  0x5f   : > { %1078 = vmatpush.msrb.mxu2 %v885_v20  ;;  %1033 = vmatpush.msrb.mxu0 %v819_v24 }
  0x60   : > { %1100 = vmatpush.msrb.mxu3 %v919_v16  ;;  %1056 = vmatpush.msrb.mxu1 %v851_v25  ;;  %vm514_vm0 = vcmp.lt.s32.totalorder %v2722_v11, 127  ;;  %vm579_vm1 = vcmp.lt.s32.totalorder %v2722_v11, 96  ;;  %vm628_vm2 = vcmp.lt.s32.totalorder %v2722_v11, 95  ;;  %v860_v11 = vld [vmem:[%s3660_s3 + $0x5b8] sm:$0xff] }
  0x61   : > { %1079 = vmatpush.msrb.mxu2 %v883_v31  ;;  %1034 = vmatpush.msrb.mxu0 %v817_v35 }
  0x62   : > { %1101 = vmatpush.msrb.mxu3 %v917_v21  ;;  %1057 = vmatpush.msrb.mxu1 %v849_v36 }
  0x63   : > { %1080 = vmatpush.msrb.mxu2 %v881_v37  ;;  %1035 = vmatpush.msrb.mxu0 %v815_v39 }
  0x64   : > { %1102 = vmatpush.msrb.mxu3 %v915_v34  ;;  %1058 = vmatpush.msrb.mxu1 %v847_v40 }
  0x65   : > { %1081 = vmatpush.msrb.mxu2 %v879_v41  ;;  %1036 = vmatpush.msrb.mxu0 %v813_v45  ;;  %v772_v45 = vld [vmem:[%s3660_s3 + $0x2f8] sm:$0xff] }
  0x66   : > { %1103 = vmatpush.msrb.mxu3 %v913_v38  ;;  %1059 = vmatpush.msrb.mxu1 %v845_v46 }
  0x67   : > { %1082 = vmatpush.msrb.mxu2 %v877_v47  ;;  %1037 = vmatpush.msrb.mxu0 %v811_v51 }
  0x68   : > { %1104 = vmatpush.msrb.mxu3 %v911_v42  ;;  %1060 = vmatpush.msrb.mxu1 %v843_v52 }
  0x69   : > { %1083 = vmatpush.msrb.mxu2 %v875_v53  ;;  %1038 = vmatpush.msrb.mxu0 %v809_v55  ;;  %v770_v53 = vld [vmem:[%s3660_s3 + $0x2e8] sm:$0xff] }
  0x6a   : > { %1105 = vmatpush.msrb.mxu3 %v909_v50  ;;  %1061 = vmatpush.msrb.mxu1 %v841_v58 }
  0x6b   : > { %1084 = vmatpush.msrb.mxu2 %v873_v60  ;;  %1039 = vmatpush.msrb.mxu0 %v807_v62 }
  0x6c   : > { %1106 = vmatpush.msrb.mxu3 %v907_v54  ;;  %1062 = vmatpush.msrb.mxu1 %v839_v1 }
  0x6d   : > { %1085 = vmatpush.msrb.mxu2 %v871_v6  ;;  %1040 = vmatpush.msrb.mxu0 %v805_v2  ;;  %v768_v2 = vld [vmem:[%s3660_s3 + $0x2d8] sm:$0xff] }
  0x6e   : > { %1107 = vmatpush.msrb.mxu3 %v905_v61  ;;  %1063 = vmatpush.msrb.mxu1 %v837_v3 }
  0x6f   : > { %1086 = vmatpush.msrb.mxu2 %v869_v4 }
  0x70   : > { %1108 = vmatpush.msrb.mxu3 %v903_v17 }
  0x72   : > { %1109 = vmatpush.msrb.mxu3 %v901_v5 }
  0x78   : > { %v2626_v30 = vpop.permute.xlu2 %1934 }
  0x79   : > { %v1936_v38 = vunpack.i.l.bf16 %v2626_v30 }
  0x80   : > { %v2688_v59 = vpop.permute.xlu2 %1939 }
  0x81   : > { %v1942_v39 = vunpack.i.h.bf16 %v2688_v59  ;;  %v1941_v40 = vunpack.i.l.bf16 %v2688_v59 }
  0x83   : > { %v592_v60 = vsel %vm579_vm1, %v1941_v40, %v1942_v39 }
  0x88   : > { %v2720_v7 = vpop.permute.xlu2 %1954 }
  0x89   : > { %v1956_v41 = vunpack.i.l.bf16 %v2720_v7 }
  0x90   : > { %v1925_v9 = vpop.permute.xlu1 %1924  ;;  %v2727_v18 = vpop.permute.xlu2 %1969 }
  0x91   : > { %v1915_v10 = vpop.permute.xlu0 %1914  ;;  %v1927_v14 = vunpack.i.h.bf16 %v1925_v9  ;;  %v1926_v15 = vunpack.i.l.bf16 %v1925_v9 }
  0x92   : > { %v1917_v12 = vunpack.i.h.bf16 %v1915_v10  ;;  %v1916_v13 = vunpack.i.l.bf16 %v1915_v10 }
  0x93   : > { %v637_v35 = vsel %vm628_vm2, %v1926_v15, %v1927_v14  ;;  %v635_v58 = vsel %vm628_vm2, %v1927_v14, %v1956_v41  ;;  %v1957_v14 = vunpack.i.h.bf16 %v2720_v7  ;;  %v778_v7 = vld [vmem:[%s3660_s3 + $0x328] sm:$0xff] }
  0x94   : > { %v523_v24 = vsel %vm514_vm0, %v1916_v13, %v1917_v12  ;;  %v521_v55 = vsel %vm514_vm0, %v1917_v12, %v1936_v38 }
  0x95   : > { %v533_v36 = vmax.f32 %v2224_v28, %v523_v24  ;;  %v534_v8 = vmax.f32 %v2226_v29, %v521_v55  ;;  %v740_v29 = vld [vmem:[%s3660_s3 + $0x1f8] sm:$0xff]  ;;  %v766_v24 = vld [vmem:[%s3660_s3 + $0x2c8] sm:$0xff] }
  0x98   : > { %v2725_v16 = vpop.permute.xlu1 %1929  ;;  %v2778_v61 = vpop.permute.xlu2 %1984 }
  0x99   : > { %v1920_v19 = vpop.permute.xlu0 %1919  ;;  %v1932_v25 = vunpack.i.h.bf16 %v2725_v16  ;;  %v1931_v31 = vunpack.i.l.bf16 %v2725_v16  ;;  %v784_v16 = vld [vmem:[%s3660_s3 + $0x358] sm:$0xff] }
  0x9a   : > { %v1922_v20 = vunpack.i.h.bf16 %v1920_v19  ;;  %v1921_v21 = vunpack.i.l.bf16 %v1920_v19 }
  0x9b   : > { %v527_v28 = vsel %vm514_vm0, %v1931_v31, %v1932_v25  ;;  %v525_v52 = vsel %vm514_vm0, %v1932_v25, %v1916_v13  ;;  %v708_v13 = vld [vmem:[%s3660_s3 + $0xf8] sm:$0xff] }
  0x9c   : > { %v588_v34 = vsel %vm579_vm1, %v1921_v21, %v1922_v20  ;;  %v531_v62 = vmax.f32 %v2234_v32, %v527_v28  ;;  %v590_v6 = vsel %vm579_vm1, %v1942_v39, %v1921_v21  ;;  %v532_v4 = vmax.f32 %v2236_v33, %v525_v52  ;;  %v804_v33 = vld [vmem:[%s3660_s3 + $0x3f8] sm:$0xff]  ;;  %v706_v21 = vld [vmem:[%s3660_s3 + $0xe8] sm:$0xff] }
  0x9d   : > { %v647_v37 = vmax.f32 %v588_v34, %v637_v35  ;;  %v1937_v39 = vunpack.i.h.bf16 %v2626_v30  ;;  %v704_v28 = vld [vmem:[%s3660_s3 + $0xd8] sm:$0xff] }
  0x9e   : > { %v736_v52 = vld [vmem:[%s3660_s3 + $0x1d8] sm:$0xff] }
  0x9f   : > { %v2744_v42 = vmax.f32 %v533_v36, %v647_v37  ;;  %v738_v36 = vld [vmem:[%s3660_s3 + $0x1e8] sm:$0xff]  ;;  %v744_v30 = vld [vmem:[%s3660_s3 + $0x218] sm:$0xff] }
  0xa0   : > { %v2749_v46 = vpop.permute.xlu1 %1949  ;;  %v802_v37 = vld [vmem:[%s3660_s3 + $0x3e8] sm:$0xff] }
  0xa1   : > { %v2755_v47 = vpop.permute.xlu0 %1944  ;;  %995 = vmatmul.f32.vlgmr.msra.gmra.mxu2 %v2744_v42  ;;  %v1952_v50 = vunpack.i.h.bf16 %v2749_v46  ;;  %v1951_v51 = vunpack.i.l.bf16 %v2749_v46  ;;  %v688_v46 = vld [vmem:[%s3660_s3 + $0x58] sm:$0xff] }
  0xa2   : > { %v1946_v54 = vunpack.i.l.bf16 %v2755_v47  ;;  %1163 = vmatpush.msra.mxu2 %v772_v45  ;;  %v1947_v25 = vunpack.i.h.bf16 %v2755_v47 }
  0xa3   : > { %v641_v1 = vsel %vm628_vm2, %v1951_v51, %v1952_v50  ;;  %v639_v17 = vsel %vm628_vm2, %v1952_v50, %v1926_v15  ;;  %v1971_v15 = vunpack.i.l.bf16 %v2727_v18  ;;  %v764_v50 = vld [vmem:[%s3660_s3 + $0x2b8] sm:$0xff] }
  0xa4   : > { %v586_v32 = vsel %vm579_vm1, %v1922_v20, %v1946_v54  ;;  %v645_v3 = vmax.f32 %v592_v60, %v641_v1  ;;  %v646_v5 = vmax.f32 %v590_v6, %v639_v17  ;;  %1164 = vmatpush.msra.mxu2 %v770_v53  ;;  %v800_v53 = vld [vmem:[%s3660_s3 + $0x3d8] sm:$0xff]  ;;  %v1972_v60 = vunpack.i.h.bf16 %v2727_v18  ;;  %v702_v6 = vld [vmem:[%s3660_s3 + $0xc8] sm:$0xff] }
  0xa5   : > { %v648_v9 = vmax.f32 %v586_v32, %v635_v58  ;;  %v638_v58 = vsel %vm628_vm2, %v1957_v14, %v1971_v15  ;;  %v762_v17 = vld [vmem:[%s3660_s3 + $0x2a8] sm:$0xff]  ;;  %v2876_v32 = vpop.permute.xlu2 %1999 }
  0xa6   : > { %v2798_v10 = vmax.f32 %v531_v62, %v645_v3  ;;  %v2800_v12 = vmax.f32 %v532_v4, %v646_v5  ;;  %1165 = vmatpush.msra.mxu2 %v768_v2  ;;  %v1986_v2 = vunpack.i.l.bf16 %v2778_v61  ;;  %v798_v3 = vld [vmem:[%s3660_s3 + $0x3c8] sm:$0xff] }
  0xa7   : > { %v2807_v19 = vmax.f32 %v534_v8, %v648_v9  ;;  %v734_v5 = vld [vmem:[%s3660_s3 + $0x1c8] sm:$0xff]  ;;  %v1987_v8 = vunpack.i.h.bf16 %v2778_v61  ;;  %v700_v9 = vld [vmem:[%s3660_s3 + $0xb8] sm:$0xff] }
  0xa8   : > { %v2815_v20 = vpop.permute.xlu1 %1964  ;;  %949 = vmatmul.f32.vlgmr.msra.gmra.mxu0 %v2798_v10  ;;  %972 = vmatmul.f32.vlgmr.msra.gmra.mxu1 %v2800_v12  ;;  %v868_v61 = vld [vmem:[%s3660_s3 + $0x5f8] sm:$0xff] }
  0xa9   : > { %v2826_v34 = vpop.permute.xlu0 %1959  ;;  %1018 = vmatmul.f32.vlgmr.msra.gmra.mxu3 %v2807_v19  ;;  %v1966_v35 = vunpack.i.l.bf16 %v2815_v20  ;;  %1117 = vmatpush.msra.mxu0 %v708_v13 }
  0xaa   : > { %v1961_v45 = vunpack.i.l.bf16 %v2826_v34  ;;  %1140 = vmatpush.msra.mxu1 %v740_v29  ;;  %1186 = vmatpush.msra.mxu3 %v804_v33  ;;  %v796_v29 = vld [vmem:[%s3660_s3 + $0x3b8] sm:$0xff] }
  0xab   : > { %1118 = vmatpush.msra.mxu0 %v706_v21  ;;  %1166 = vmatpush.msra.mxu2 %v766_v24  ;;  %v589_v55 = vsel %vm579_vm1, %v1947_v25, %v1966_v35  ;;  %v698_v21 = vld [vmem:[%s3660_s3 + $0xa8] sm:$0xff]  ;;  %v760_v24 = vld [vmem:[%s3660_s3 + $0x298] sm:$0xff] }
  0xac   : > { %1141 = vmatpush.msra.mxu1 %v738_v36  ;;  %1187 = vmatpush.msra.mxu3 %v802_v37  ;;  %v524_v62 = vsel %vm514_vm0, %v1937_v39, %v1961_v45  ;;  %v655_v1 = vmax.f32 %v589_v55, %v638_v58  ;;  %v642_v36 = vsel %vm628_vm2, %v1972_v60, %v1986_v2  ;;  %v1967_v37 = vunpack.i.h.bf16 %v2815_v20  ;;  %v794_v55 = vld [vmem:[%s3660_s3 + $0x3a8] sm:$0xff]  ;;  %v892_v20 = vld [vmem:[%s3660_s3 + $0x6b8] sm:$0xff] }
  0xad   : > { %1119 = vmatpush.msra.mxu0 %v704_v28  ;;  %v541_v4 = vmax.f32 %v2222_v27, %v524_v62  ;;  %1167 = vmatpush.msra.mxu2 %v764_v50  ;;  %v732_v27 = vld [vmem:[%s3660_s3 + $0x1b8] sm:$0xff]  ;;  %v640_v58 = vsel %vm628_vm2, %v1986_v2, %v1957_v14  ;;  %v1962_v62 = vunpack.i.h.bf16 %v2826_v34  ;;  %v636_v14 = vsel %vm628_vm2, %v1971_v15, %v1987_v8 }
  0xae   : > { %1142 = vmatpush.msra.mxu1 %v736_v52  ;;  %1188 = vmatpush.msra.mxu3 %v800_v53  ;;  %v730_v53 = vld [vmem:[%s3660_s3 + $0x1a8] sm:$0xff]  ;;  %v728_v2 = vld [vmem:[%s3660_s3 + $0x198] sm:$0xff] }
  0xaf   : > { %v2889_v13 = vmax.f32 %v541_v4, %v655_v1  ;;  %1120 = vmatpush.msra.mxu0 %v702_v6  ;;  %1168 = vmatpush.msra.mxu2 %v762_v17  ;;  %v696_v17 = vld [vmem:[%s3660_s3 + $0x98] sm:$0xff] }
  0xb0   : > { %1189 = vmatpush.msra.mxu3 %v798_v3  ;;  %v2897_v33 = vpop.permute.xlu1 %1979  ;;  %1143 = vmatpush.msra.mxu1 %v734_v5  ;;  %v758_v3 = vld [vmem:[%s3660_s3 + $0x288] sm:$0xff]  ;;  %v792_v4 = vld [vmem:[%s3660_s3 + $0x398] sm:$0xff] }
  0xb1   : > { %v2910_v28 = vpop.permute.xlu0 %1974  ;;  %v1982_v50 = vunpack.i.h.bf16 %v2897_v33  ;;  %v1981_v52 = vunpack.i.l.bf16 %v2897_v33  ;;  %998 = vmatmul.f32.gmra.mxu2 %v2889_v13  ;;  %1121 = vmatpush.msra.mxu0 %v700_v9 }
  0xb2   : > { %v1977_v1 = vunpack.i.h.bf16 %v2910_v28  ;;  %v1976_v6 = vunpack.i.l.bf16 %v2910_v28  ;;  %1144 = vmatpush.msra.mxu1 %v732_v27  ;;  %1190 = vmatpush.msra.mxu3 %v796_v29 }
  0xb3   : > { %1122 = vmatpush.msra.mxu0 %v698_v21  ;;  %1169 = vmatpush.msra.mxu2 %v760_v24  ;;  %v593_v5 = vsel %vm579_vm1, %v1967_v37, %v1981_v52  ;;  %v591_v15 = vsel %vm579_vm1, %v1981_v52, %v1947_v25  ;;  %v587_v9 = vsel %vm579_vm1, %v1966_v35, %v1982_v50  ;;  %v694_v21 = vld [vmem:[%s3660_s3 + $0x88] sm:$0xff]  ;;  %v756_v35 = vld [vmem:[%s3660_s3 + $0x278] sm:$0xff]  ;;  %v2001_v24 = vunpack.i.l.bf16 %v2876_v32 }
  0xb4   : > { %1145 = vmatpush.msra.mxu1 %v730_v53  ;;  %1191 = vmatpush.msra.mxu3 %v794_v55  ;;  %v528_v27 = vsel %vm514_vm0, %v1962_v62, %v1976_v6  ;;  %v653_v29 = vmax.f32 %v593_v5, %v642_v36  ;;  %v526_v25 = vsel %vm514_vm0, %v1976_v6, %v1937_v39  ;;  %v790_v36 = vld [vmem:[%s3660_s3 + $0x388] sm:$0xff] }
  0xb5   : > { %1123 = vmatpush.msra.mxu0 %v696_v17  ;;  %1170 = vmatpush.msra.mxu2 %v758_v3  ;;  %v539_v52 = vmax.f32 %v2254_v43, %v528_v27  ;;  %v540_v39 = vmax.f32 %v2273_v56, %v526_v25  ;;  %v654_v53 = vmax.f32 %v591_v15, %v640_v58  ;;  %v726_v55 = vld [vmem:[%s3660_s3 + $0x188] sm:$0xff]  ;;  %v2002_v3 = vunpack.i.h.bf16 %v2876_v32  ;;  %v2990_v43 = vpop.permute.xlu2 %2014  ;;  %v788_v25 = vld [vmem:[%s3660_s3 + $0x378] sm:$0xff] }
  0xb6   : > { %1146 = vmatpush.msra.mxu1 %v728_v2  ;;  %1192 = vmatpush.msra.mxu3 %v792_v4  ;;  %v522_v6 = vsel %vm514_vm0, %v1961_v45, %v1977_v1  ;;  %v656_v17 = vmax.f32 %v587_v9, %v636_v14  ;;  %v692_v2 = vld [vmem:[%s3660_s3 + $0x78] sm:$0xff]  ;;  %v754_v4 = vld [vmem:[%s3660_s3 + $0x268] sm:$0xff] }
  0xb7   : > { %v2992_v56 = vmax.f32 %v539_v52, %v653_v29  ;;  %v2994_v58 = vmax.f32 %v540_v39, %v654_v53  ;;  %v542_v5 = vmax.f32 %v2256_v44, %v522_v6  ;;  %1124 = vmatpush.msra.mxu0 %v694_v21  ;;  %v724_v45 = vld [vmem:[%s3660_s3 + $0x178] sm:$0xff]  ;;  %1171 = vmatpush.msra.mxu2 %v756_v35  ;;  %v690_v21 = vld [vmem:[%s3660_s3 + $0x68] sm:$0xff] }
  0xb8   : > { %1193 = vmatpush.msra.mxu3 %v790_v36  ;;  %v3003_v14 = vpop.permute.xlu1 %1994  ;;  %1147 = vmatpush.msra.mxu1 %v726_v55  ;;  %v629_v44 = vsel %vm628_vm2, %v2001_v24, %v2002_v3  ;;  %v722_v52 = vld [vmem:[%s3660_s3 + $0x168] sm:$0xff]  ;;  %v752_v39 = vld [vmem:[%s3660_s3 + $0x258] sm:$0xff]  ;;  %v643_v53 = vsel %vm628_vm2, %v2002_v3, %v1951_v51 }
  0xb9   : > { %v3012_v15 = vpop.permute.xlu0 %1989  ;;  %v1997_v9 = vunpack.i.h.bf16 %v3003_v14  ;;  %v1996_v27 = vunpack.i.l.bf16 %v3003_v14  ;;  %952 = vmatmul.f32.gmra.mxu0 %v2992_v56  ;;  %975 = vmatmul.f32.gmra.mxu1 %v2994_v58  ;;  %v3018_v29 = vmax.f32 %v542_v5, %v656_v17  ;;  %v786_v17 = vld [vmem:[%s3660_s3 + $0x368] sm:$0xff]  ;;  %v720_v51 = vld [vmem:[%s3660_s3 + $0x158] sm:$0xff] }
  0xba   : > { %v1992_v35 = vunpack.i.h.bf16 %v3012_v15  ;;  %v1991_v36 = vunpack.i.l.bf16 %v3012_v15  ;;  %1125 = vmatpush.msra.mxu0 %v692_v2  ;;  %1148 = vmatpush.msra.mxu1 %v724_v45  ;;  %v750_v3 = vld [vmem:[%s3660_s3 + $0x248] sm:$0xff] }
  0xbb   : > { %v594_v55 = vsel %vm579_vm1, %v1997_v9, %v1941_v40  ;;  %v580_v6 = vsel %vm579_vm1, %v1996_v27, %v1997_v9  ;;  %1021 = vmatmul.f32.gmra.mxu3 %v3018_v29  ;;  %1172 = vmatpush.msra.mxu2 %v754_v4  ;;  %v686_v14 = vld [vmem:[%s3660_s3 + $0x48] sm:$0xff]  ;;  %v684_v9 = vld [vmem:[%s3660_s3 + $0x38] sm:$0xff] }
  0xbc   : > { %v515_v59 = vsel %vm514_vm0, %v1991_v36, %v1992_v35  ;;  %v529_v40 = vsel %vm514_vm0, %v1992_v35, %v1931_v31  ;;  %1194 = vmatpush.msra.mxu3 %v788_v25  ;;  %1126 = vmatpush.msra.mxu0 %v690_v21  ;;  %v651_v5 = vmax.f32 %v580_v6, %v629_v44  ;;  %v718_v4 = vld [vmem:[%s3660_s3 + $0x148] sm:$0xff]  ;;  %v2016_v44 = vunpack.i.l.bf16 %v2990_v43  ;;  %v716_v21 = vld [vmem:[%s3660_s3 + $0x138] sm:$0xff] }
  0xbd   : > { %1149 = vmatpush.msra.mxu1 %v722_v52  ;;  %1173 = vmatpush.msra.mxu2 %v752_v39  ;;  %v537_v2 = vmax.f32 %v2337_v22, %v515_v59  ;;  %v538_v31 = vmax.f32 %v2339_v23, %v529_v40  ;;  %v652_v45 = vmax.f32 %v594_v55, %v643_v53  ;;  %v782_v22 = vld [vmem:[%s3660_s3 + $0x348] sm:$0xff]  ;;  %v3090_v35 = vpop.permute.xlu2 %2029  ;;  %v748_v53 = vld [vmem:[%s3660_s3 + $0x238] sm:$0xff] }
  0xbe   : > { %1195 = vmatpush.msra.mxu3 %v786_v17  ;;  %1127 = vmatpush.msra.mxu0 %v688_v46  ;;  %v780_v55 = vld [vmem:[%s3660_s3 + $0x338] sm:$0xff]  ;;  %v631_v6 = vsel %vm628_vm2, %v2016_v44, %v2001_v24  ;;  %v682_v46 = vld [vmem:[%s3660_s3 + $0x28] sm:$0xff]  ;;  %v633_v32 = vsel %vm628_vm2, %v1956_v41, %v2016_v44  ;;  %v2032_v41 = vunpack.i.h.bf16 %v3090_v35 }
  0xbf   : > { %1150 = vmatpush.msra.mxu1 %v720_v51  ;;  %1174 = vmatpush.msra.mxu2 %v750_v3  ;;  %v3078_v23 = vmax.f32 %v537_v2, %v651_v5  ;;  %v3080_v15 = vmax.f32 %v538_v31, %v652_v45  ;;  %v714_v59 = vld [vmem:[%s3660_s3 + $0x128] sm:$0xff]  ;;  %v712_v3 = vld [vmem:[%s3660_s3 + $0x118] sm:$0xff] }
  0xc0   : > { %1196 = vmatpush.msra.mxu3 %v784_v16  ;;  %v3085_v25 = vpop.permute.xlu1 %2009  ;;  %1128 = vmatpush.msra.mxu0 %v686_v14  ;;  %v746_v51 = vld [vmem:[%s3660_s3 + $0x228] sm:$0xff]  ;;  %v2017_v16 = vunpack.i.h.bf16 %v2990_v43 }
  0xc1   : > { %v3092_v52 = vpop.permute.xlu0 %2004  ;;  %v2011_v39 = vunpack.i.l.bf16 %v3085_v25  ;;  %1087 = vmatmul.f32.vlgmr.msrb.gmra.mxu2 %v3078_v23  ;;  %1151 = vmatpush.msra.mxu1 %v718_v4  ;;  %v742_v43 = vld [vmem:[%s3660_s3 + $0x208] sm:$0xff] }
  0xc2   : > { %v2006_v17 = vunpack.i.l.bf16 %v3092_v52  ;;  %1197 = vmatpush.msra.mxu3 %v782_v22  ;;  %1129 = vmatpush.msra.mxu0 %v684_v9  ;;  %v774_v45 = vld [vmem:[%s3660_s3 + $0x308] sm:$0xff]  ;;  %v634_v9 = vsel %vm628_vm2, %v1987_v8, %v2032_v41  ;;  %v632_v8 = vsel %vm628_vm2, %v2032_v41, %v2017_v16 }
  0xc3   : > { %v582_v24 = vsel %vm579_vm1, %v2011_v39, %v1996_v27  ;;  %v584_v40 = vsel %vm579_vm1, %v1946_v54, %v2011_v39  ;;  %1110 = vmatmul.f32.vlgmr.msrb.gmra.mxu3 %v3080_v15  ;;  %1152 = vmatpush.msra.mxu1 %v716_v21  ;;  %v680_v54 = vld [vmem:[%s3660_s3 + $0x18] sm:$0xff]  ;;  %v678_v44 = vld [vmem:[%s3660_s3 + $0x8] sm:$0xff]  ;;  %v2012_v21 = vunpack.i.h.bf16 %v3085_v25  ;;  %v2007_v25 = vunpack.i.h.bf16 %v3092_v52 }
  0xc4   : > { %v517_v27 = vsel %vm514_vm0, %v2006_v17, %v1991_v36  ;;  %v519_v47 = vsel %vm514_vm0, %v1936_v38, %v2006_v17  ;;  %1175 = vmatpush.msra.mxu2 %v748_v53  ;;  %1198 = vmatpush.msra.mxu3 %v780_v55  ;;  %v649_v5 = vmax.f32 %v584_v40, %v633_v32  ;;  %v776_v38 = vld [vmem:[%s3660_s3 + $0x318] sm:$0xff]  ;;  %v710_v22 = vld [vmem:[%s3660_s3 + $0x108] sm:$0xff] }
  0xc5   : > { %1130 = vmatpush.msra.mxu0 %v682_v46  ;;  %1153 = vmatpush.msra.mxu1 %v714_v59  ;;  %v535_v36 = vmax.f32 %v2220_v26, %v519_v47  ;;  %v536_v2 = vmax.f32 %v2381_v48, %v517_v27  ;;  %v650_v31 = vmax.f32 %v582_v24, %v631_v6  ;;  %v2031_v26 = vunpack.i.l.bf16 %v3090_v35  ;;  %v836_v55 = vld [vmem:[%s3660_s3 + $0x4f8] sm:$0xff]  ;;  %v834_v52 = vld [vmem:[%s3660_s3 + $0x4e8] sm:$0xff] }
  0xc6   : > { %1176 = vmatpush.msra.mxu2 %v746_v51  ;;  %1199 = vmatpush.msra.mxu3 %v778_v7  ;;  %v900_v46 = vld [vmem:[%s3660_s3 + $0x6f8] sm:$0xff]  ;;  %v866_v24 = vld [vmem:[%s3660_s3 + $0x5e8] sm:$0xff] }
  0xc7   : > { %1131 = vmatpush.msra.mxu0 %v680_v54  ;;  %1154 = vmatpush.msra.mxu1 %v712_v3  ;;  %v3158_v14 = vmax.f32 %v535_v36, %v649_v5  ;;  %v3160_v4 = vmax.f32 %v536_v2, %v650_v31  ;;  %v932_v59 = vld [vmem:[%s3660_s3 + $0x7f8] sm:$0xff]  ;;  %v630_v32 = vsel %vm628_vm2, %v2017_v16, %v2031_v26  ;;  %v898_v41 = vld [vmem:[%s3660_s3 + $0x6e8] sm:$0xff] }
  0xc8   : > { %1177 = vmatpush.msra.mxu2 %v744_v30  ;;  %1200 = vmatpush.msra.mxu3 %v776_v38  ;;  %v3163_v48 = vpop.permute.xlu1 %2024  ;;  %v930_v27 = vld [vmem:[%s3660_s3 + $0x7e8] sm:$0xff]  ;;  %v832_v54 = vld [vmem:[%s3660_s3 + $0x4d8] sm:$0xff]  ;;  %v644_v34 = vsel %vm628_vm2, %v2031_v26, %v1972_v60 }
  0xc9   : > { %v2020_v35 = vpop.permute.xlu0 %2019  ;;  %v2027_v39 = vunpack.i.h.bf16 %v3163_v48  ;;  %v2026_v53 = vunpack.i.l.bf16 %v3163_v48  ;;  %1041 = vmatmul.f32.vlgmr.msrb.gmra.mxu0 %v3158_v14  ;;  %1064 = vmatmul.f32.vlgmr.msrb.gmra.mxu1 %v3160_v4  ;;  %v864_v3 = vld [vmem:[%s3660_s3 + $0x5d8] sm:$0xff]  ;;  %v862_v2 = vld [vmem:[%s3660_s3 + $0x5c8] sm:$0xff] }
  0xca   : > { %v2022_v6 = vunpack.i.h.bf16 %v2020_v35  ;;  %v2021_v17 = vunpack.i.l.bf16 %v2020_v35  ;;  %1178 = vmatpush.msra.mxu2 %v742_v43  ;;  %1201 = vmatpush.msra.mxu3 %v774_v45  ;;  %v928_v30 = vld [vmem:[%s3660_s3 + $0x7d8] sm:$0xff]  ;;  %v926_v45 = vld [vmem:[%s3660_s3 + $0x7c8] sm:$0xff] }
  0xcb   : > { %1132 = vmatpush.msra.mxu0 %v678_v44  ;;  %1155 = vmatpush.msra.mxu1 %v710_v22  ;;  %v585_v40 = vsel %vm579_vm1, %v1982_v50, %v2027_v39  ;;  %v583_v51 = vsel %vm579_vm1, %v2027_v39, %v2012_v21  ;;  %v581_v7 = vsel %vm579_vm1, %v2012_v21, %v2026_v53  ;;  %v826_v22 = vld [vmem:[%s3660_s3 + $0x4a8] sm:$0xff]  ;;  %v824_v39 = vld [vmem:[%s3660_s3 + $0x498] sm:$0xff] }
  0xcc   : > { %v520_v33 = vsel %vm514_vm0, %v1977_v1, %v2022_v6  ;;  %v657_v50 = vmax.f32 %v585_v40, %v634_v9  ;;  %v518_v47 = vsel %vm514_vm0, %v2022_v6, %v2007_v25  ;;  %1255 = vmatpush.msrb.mxu2 %v900_v46  ;;  %1278 = vmatpush.msrb.mxu3 %v932_v59  ;;  %v896_v1 = vld [vmem:[%s3660_s3 + $0x6d8] sm:$0xff]  ;;  %v858_v9 = vld [vmem:[%s3660_s3 + $0x5a8] sm:$0xff] }
  0xcd   : > { %1209 = vmatpush.msrb.mxu0 %v836_v55  ;;  %1232 = vmatpush.msrb.mxu1 %v868_v61  ;;  %v543_v5 = vmax.f32 %v2275_v57, %v520_v33  ;;  %v544_v28 = vmax.f32 %v2406_v63, %v518_v47  ;;  %v658_v16 = vmax.f32 %v583_v51, %v632_v8  ;;  %v830_v63 = vld [vmem:[%s3660_s3 + $0x4c8] sm:$0xff]  ;;  %v888_v55 = vld [vmem:[%s3660_s3 + $0x698] sm:$0xff] }
  0xce   : > { %v516_v38 = vsel %vm514_vm0, %v2007_v25, %v2021_v17  ;;  %v659_v36 = vmax.f32 %v581_v7, %v630_v32  ;;  %v530_v57 = vsel %vm514_vm0, %v2021_v17, %v1962_v62  ;;  %1256 = vmatpush.msrb.mxu2 %v898_v41  ;;  %1279 = vmatpush.msrb.mxu3 %v930_v27  ;;  %v894_v62 = vld [vmem:[%s3660_s3 + $0x6c8] sm:$0xff]  ;;  %v920_v61 = vld [vmem:[%s3660_s3 + $0x798] sm:$0xff] }
  0xcf   : > { %1210 = vmatpush.msrb.mxu0 %v834_v52  ;;  %1233 = vmatpush.msrb.mxu1 %v866_v24  ;;  %v3249_v31 = vmax.f32 %v543_v5, %v657_v50  ;;  %v545_v43 = vmax.f32 %v2383_v49, %v516_v38  ;;  %v3262_v48 = vmax.f32 %v544_v28, %v658_v16  ;;  %v890_v21 = vld [vmem:[%s3660_s3 + $0x6a8] sm:$0xff]  ;;  %v820_v46 = vld [vmem:[%s3660_s3 + $0x478] sm:$0xff] }
  0xd0   : > { %v546_v44 = vmax.f32 %v2408_v0, %v530_v57  ;;  %v595_v49 = vsel %vm579_vm1, %v2026_v53, %v1967_v37  ;;  %1257 = vmatpush.msrb.mxu2 %v896_v1  ;;  %1280 = vmatpush.msrb.mxu3 %v928_v30  ;;  %v828_v0 = vld [vmem:[%s3660_s3 + $0x4b8] sm:$0xff]  ;;  %v922_v35 = vld [vmem:[%s3660_s3 + $0x7a8] sm:$0xff] }
  0xd1   : > { %1211 = vmatpush.msrb.mxu0 %v832_v54  ;;  %1234 = vmatpush.msrb.mxu1 %v864_v3  ;;  %v3269_v18 = vmax.f32 %v545_v43, %v659_v36  ;;  %v660_v60 = vmax.f32 %v595_v49, %v644_v34  ;;  %v924_v37 = vld [vmem:[%s3660_s3 + $0x7b8] sm:$0xff]  ;;  %v822_v8 = vld [vmem:[%s3660_s3 + $0x488] sm:$0xff] }
  0xd2   : > { %1258 = vmatpush.msrb.mxu2 %v894_v62  ;;  %1281 = vmatpush.msrb.mxu3 %v926_v45  ;;  %v856_v53 = vld [vmem:[%s3660_s3 + $0x598] sm:$0xff]  ;;  %v854_v25 = vld [vmem:[%s3660_s3 + $0x588] sm:$0xff] }
  0xd3   : > { %1212 = vmatpush.msrb.mxu0 %v830_v63  ;;  %1235 = vmatpush.msrb.mxu1 %v862_v2  ;;  %v3271_v26 = vmax.f32 %v546_v44, %v660_v60  ;;  %v886_v6 = vld [vmem:[%s3660_s3 + $0x688] sm:$0xff]  ;;  %v852_v59 = vld [vmem:[%s3660_s3 + $0x578] sm:$0xff] }
  0xd4   : > { %1044 = vmatmul.f32.gmra.mxu0 %v3249_v31  ;;  %1067 = vmatmul.f32.gmra.mxu1 %v3262_v48  ;;  %v918_v17 = vld [vmem:[%s3660_s3 + $0x788] sm:$0xff]  ;;  %v884_v32 = vld [vmem:[%s3660_s3 + $0x678] sm:$0xff] }
  0xd5   : > { %1090 = vmatmul.f32.gmra.mxu2 %v3269_v18  ;;  %1113 = vmatmul.f32.gmra.mxu3 %v3271_v26  ;;  %v916_v52 = vld [vmem:[%s3660_s3 + $0x778] sm:$0xff]  ;;  %v818_v24 = vld [vmem:[%s3660_s3 + $0x468] sm:$0xff] }
  0xd6   : > { %1213 = vmatpush.msrb.mxu0 %v828_v0  ;;  %1236 = vmatpush.msrb.mxu1 %v860_v11  ;;  %v848_v40 = vld [vmem:[%s3660_s3 + $0x558] sm:$0xff]  ;;  %v814_v41 = vld [vmem:[%s3660_s3 + $0x448] sm:$0xff] }
  0xd7   : > { %1259 = vmatpush.msrb.mxu2 %v892_v20  ;;  %1282 = vmatpush.msrb.mxu3 %v924_v37  ;;  %v880_v51 = vld [vmem:[%s3660_s3 + $0x658] sm:$0xff]  ;;  %v846_v27 = vld [vmem:[%s3660_s3 + $0x548] sm:$0xff] }
  0xd8   : > { %1214 = vmatpush.msrb.mxu0 %v826_v22  ;;  %1237 = vmatpush.msrb.mxu1 %v858_v9  ;;  %v912_v7 = vld [vmem:[%s3660_s3 + $0x758] sm:$0xff]  ;;  %v878_v33 = vld [vmem:[%s3660_s3 + $0x648] sm:$0xff] }
  0xd9   : > { %1260 = vmatpush.msrb.mxu2 %v890_v21  ;;  %1283 = vmatpush.msrb.mxu3 %v922_v35  ;;  %v910_v50 = vld [vmem:[%s3660_s3 + $0x748] sm:$0xff]  ;;  %v812_v47 = vld [vmem:[%s3660_s3 + $0x438] sm:$0xff] }
  0xda   : > { %1215 = vmatpush.msrb.mxu0 %v824_v39  ;;  %1238 = vmatpush.msrb.mxu1 %v856_v53  ;;  %v844_v54 = vld [vmem:[%s3660_s3 + $0x538] sm:$0xff]  ;;  %v810_v28 = vld [vmem:[%s3660_s3 + $0x428] sm:$0xff] }
  0xdb   : > { %1261 = vmatpush.msrb.mxu2 %v888_v55  ;;  %1284 = vmatpush.msrb.mxu3 %v920_v61  ;;  %v876_v3 = vld [vmem:[%s3660_s3 + $0x638] sm:$0xff]  ;;  %v806_v38 = vld [vmem:[%s3660_s3 + $0x408] sm:$0xff] }
  0xdc   : > { %1216 = vmatpush.msrb.mxu0 %v822_v8  ;;  %1239 = vmatpush.msrb.mxu1 %v854_v25  ;;  %v908_v5 = vld [vmem:[%s3660_s3 + $0x738] sm:$0xff]  ;;  %v838_v36 = vld [vmem:[%s3660_s3 + $0x508] sm:$0xff] }
  0xdd   : > { %1262 = vmatpush.msrb.mxu2 %v886_v6  ;;  %1285 = vmatpush.msrb.mxu3 %v918_v17  ;;  %v840_v16 = vld [vmem:[%s3660_s3 + $0x518] sm:$0xff]  ;;  %v870_v57 = vld [vmem:[%s3660_s3 + $0x608] sm:$0xff] }
  0xde   : > { %1133 = vmatmul.f32.vlgmr.msra.gmra.mxu0 %v2798_v10  ;;  %1156 = vmatmul.f32.vlgmr.msra.gmra.mxu1 %v2800_v12  ;;  %v850_v10 = vld [vmem:[%s3660_s3 + $0x568] sm:$0xff]  ;;  %v872_v1 = vld [vmem:[%s3660_s3 + $0x618] sm:$0xff] }
  0xdf   : > { %1179 = vmatmul.f32.vlgmr.msra.gmra.mxu2 %v2744_v42  ;;  %1202 = vmatmul.f32.vlgmr.msra.gmra.mxu3 %v2807_v19  ;;  %v882_v12 = vld [vmem:[%s3660_s3 + $0x668] sm:$0xff]  ;;  %v816_v19 = vld [vmem:[%s3660_s3 + $0x458] sm:$0xff] }
  0xe0   : > { %1217 = vmatpush.msrb.mxu0 %v820_v46  ;;  %1240 = vmatpush.msrb.mxu1 %v852_v59  ;;  %v914_v42 = vld [vmem:[%s3660_s3 + $0x768] sm:$0xff]  ;;  %v904_v30 = vld [vmem:[%s3660_s3 + $0x718] sm:$0xff]  ;;  %v1301_v46 = vld [vmem:[%s3659_s2] sm:$0xff] }
  0xe1   : > { %1263 = vmatpush.msrb.mxu2 %v884_v32  ;;  %1286 = vmatpush.msrb.mxu3 %v916_v52  ;;  %v902_v63 = vld [vmem:[%s3660_s3 + $0x708] sm:$0xff] }
  0xe2   : > { %1218 = vmatpush.msrb.mxu0 %v818_v24  ;;  %1241 = vmatpush.msrb.mxu1 %v850_v10  ;;  %v1302_v24 = vld [vmem:[%s3659_s2 + $0x8] sm:$0xff] }
  0xe3   : > { %1264 = vmatpush.msrb.mxu2 %v882_v12  ;;  %1287 = vmatpush.msrb.mxu3 %v914_v42 }
  0xe4   : > { %1219 = vmatpush.msrb.mxu0 %v816_v19  ;;  %1242 = vmatpush.msrb.mxu1 %v848_v40  ;;  %v3448_v19 = vld [vmem:[%s3659_s2 + $0x10] sm:$0xff] }
  0xe5   : > { %1265 = vmatpush.msrb.mxu2 %v880_v51  ;;  %1288 = vmatpush.msrb.mxu3 %v912_v7 }
  0xe6   : > { %1220 = vmatpush.msrb.mxu0 %v814_v41  ;;  %1243 = vmatpush.msrb.mxu1 %v846_v27 }
  0xe7   : > { %1266 = vmatpush.msrb.mxu2 %v878_v33  ;;  %1289 = vmatpush.msrb.mxu3 %v910_v50 }
  0xe8   : > { %1136 = vmatmul.f32.gmra.mxu0 %v2992_v56  ;;  %1159 = vmatmul.f32.gmra.mxu1 %v2994_v58  ;;  %v842_v56 = vld [vmem:[%s3660_s3 + $0x528] sm:$0xff] }
  0xe9   : > { %1182 = vmatmul.f32.gmra.mxu2 %v2889_v13  ;;  %1205 = vmatmul.f32.gmra.mxu3 %v3018_v29  ;;  %v874_v58 = vld [vmem:[%s3660_s3 + $0x628] sm:$0xff]  ;;  %v808_v29 = vld [vmem:[%s3660_s3 + $0x418] sm:$0xff] }
  0xea   : > { %1221 = vmatpush.msrb.mxu0 %v812_v47  ;;  %1244 = vmatpush.msrb.mxu1 %v844_v54  ;;  %v906_v13 = vld [vmem:[%s3660_s3 + $0x728] sm:$0xff]  ;;  %v3455_v54 = vld [vmem:[%s3659_s2 + $0x18] sm:$0xff] }
  0xeb   : > { %1267 = vmatpush.msrb.mxu2 %v876_v3  ;;  %1290 = vmatpush.msrb.mxu3 %v908_v5 }
  0xec   : > { %1222 = vmatpush.msrb.mxu0 %v810_v28  ;;  %1245 = vmatpush.msrb.mxu1 %v842_v56 }
  0xed   : > { %1268 = vmatpush.msrb.mxu2 %v874_v58  ;;  %1291 = vmatpush.msrb.mxu3 %v906_v13 }
  0xee   : > { %1223 = vmatpush.msrb.mxu0 %v808_v29  ;;  %1246 = vmatpush.msrb.mxu1 %v840_v16 }
  0xef   : > { %1269 = vmatpush.msrb.mxu2 %v872_v1  ;;  %1292 = vmatpush.msrb.mxu3 %v904_v30 }
  0xf0   : > { %1224 = vmatpush.msrb.mxu0 %v806_v38  ;;  %1247 = vmatpush.msrb.mxu1 %v838_v36  ;;  %v2084_v36 = vmov 1.0  }
  0xf1   : > { %1270 = vmatpush.msrb.mxu2 %v870_v57  ;;  %1293 = vmatpush.msrb.mxu3 %v902_v63 }
  0xf2   : > { %1225 = vmatmul.f32.vlgmr.msrb.gmra.mxu0 %v3158_v14  ;;  %1248 = vmatmul.f32.vlgmr.msrb.gmra.mxu1 %v3160_v4 }
  0xf3   : > { %1271 = vmatmul.f32.vlgmr.msrb.gmra.mxu2 %v3078_v23  ;;  %1294 = vmatmul.f32.vlgmr.msrb.gmra.mxu3 %v3080_v15 }
  0xf4   : > { %1384 = vmatpush.msra.mxu2 %v2084_v36  ;;  %1413 = vmatpush.msra.mxu3 %v2084_v36 }
  0xf6   : > { %1385 = vmatpush.msra.mxu2 %v2084_v36  ;;  %1414 = vmatpush.msra.mxu3 %v2084_v36 }
  0xf8   : > { %1386 = vmatpush.msra.mxu2 %v2084_v36  ;;  %1415 = vmatpush.msra.mxu3 %v2084_v36 }
  0xfa   : > { %1228 = vmatmul.f32.gmra.mxu0 %v3249_v31  ;;  %1251 = vmatmul.f32.gmra.mxu1 %v3262_v48 }
  0xfb   : > { %1274 = vmatmul.f32.gmra.mxu2 %v3269_v18  ;;  %1297 = vmatmul.f32.gmra.mxu3 %v3271_v26 }
  0xfc   : > { %1387 = vmatpush.msra.mxu2 %v2084_v36  ;;  %1416 = vmatpush.msra.mxu3 %v2084_v36 }
  0xfe   : > { %1388 = vmatpush.msra.mxu2 %v2084_v36  ;;  %1417 = vmatpush.msra.mxu3 %v2084_v36 }
 0x100   : > { %1389 = vmatpush.msra.mxu2 %v2084_v36  ;;  %1418 = vmatpush.msra.mxu3 %v2084_v36 }
 0x102   : > { %1390 = vmatpush.msra.mxu2 %v2084_v36  ;;  %1419 = vmatpush.msra.mxu3 %v2084_v36 }
 0x104   : > { %1391 = vmatpush.msra.mxu2 %v2084_v36  ;;  %1420 = vmatpush.msra.mxu3 %v2084_v36 }
 0x106   : > { %1392 = vmatpush.msra.mxu2 %v2084_v36  ;;  %1421 = vmatpush.msra.mxu3 %v2084_v36 }
 0x108   : > { %1393 = vmatpush.msra.mxu2 %v2084_v36  ;;  %1422 = vmatpush.msra.mxu3 %v2084_v36 }
 0x10a   : > { %1394 = vmatpush.msra.mxu2 %v2084_v36  ;;  %1423 = vmatpush.msra.mxu3 %v2084_v36 }
 0x10c   : > { %1395 = vmatpush.msra.mxu2 %v2084_v36  ;;  %1424 = vmatpush.msra.mxu3 %v2084_v36 }
 0x10e   : > { %1396 = vmatpush.msra.mxu2 %v2084_v36  ;;  %1425 = vmatpush.msra.mxu3 %v2084_v36 }
 0x110   : > { %1397 = vmatpush.msra.mxu2 %v2084_v36  ;;  %1426 = vmatpush.msra.mxu3 %v2084_v36 }
 0x112   : > { %1398 = vmatpush.msra.mxu2 %v2084_v36  ;;  %1427 = vmatpush.msra.mxu3 %v2084_v36 }
 0x114   : > { %1399 = vmatpush.msra.mxu2 %v2084_v36  ;;  %1428 = vmatpush.msra.mxu3 %v2084_v36 }
 0x116   : > { %1836 = vmatpush.msrb.mxu2 %v2084_v36  ;;  %1852 = vmatpush.msrb.mxu3 %v2084_v36 }
 0x118   : > { %1837 = vmatpush.msrb.mxu2 %v2084_v36  ;;  %1853 = vmatpush.msrb.mxu3 %v2084_v36 }
 0x11a   : > { %1838 = vmatpush.msrb.mxu2 %v2084_v36  ;;  %1854 = vmatpush.msrb.mxu3 %v2084_v36 }
 0x11c   : > { %1839 = vmatpush.msrb.mxu2 %v2084_v36  ;;  %1855 = vmatpush.msrb.mxu3 %v2084_v36 }
 0x11e   : > { %1840 = vmatpush.msrb.mxu2 %v2084_v36  ;;  %1856 = vmatpush.msrb.mxu3 %v2084_v36 }
 0x120   : > { %1841 = vmatpush.msrb.mxu2 %v2084_v36  ;;  %1857 = vmatpush.msrb.mxu3 %v2084_v36 }
 0x122   : > { %1842 = vmatpush.msrb.mxu2 %v2084_v36  ;;  %1858 = vmatpush.msrb.mxu3 %v2084_v36 }
 0x124   : > { %v996_v45 = vpop.f32.mrf.mxu2  ;;  %1843 = vmatpush.msrb.mxu2 %v2084_v36  ;;  %1859 = vmatpush.msrb.mxu3 %v2084_v36 }
 0x125   : > { %v950_v2 = vpop.f32.mrf.mxu0  ;;  %v973_v43 = vpop.f32.mrf.mxu1 }
 0x126   : > { %v974_v23 = vadd.f32 %v973_v43, %v950_v2  ;;  %1844 = vmatpush.msrb.mxu2 %v2084_v36  ;;  %1860 = vmatpush.msrb.mxu3 %v2084_v36 }
 0x128   : > { %v997_v0 = vadd.f32 %v996_v45, %v974_v23  ;;  %1845 = vmatpush.msrb.mxu2 %v2084_v36  ;;  %1861 = vmatpush.msrb.mxu3 %v2084_v36 }
 0x12a   : > { %1846 = vmatpush.msrb.mxu2 %v2084_v36  ;;  %1862 = vmatpush.msrb.mxu3 %v2084_v36 }
 0x12c   : > { %v1019_v34 = vpop.f32.mrf.mxu3  ;;  %1847 = vmatpush.msrb.mxu2 %v2084_v36  ;;  %1863 = vmatpush.msrb.mxu3 %v2084_v36 }
 0x12d   : > { %v1020_v31 = vadd.f32 %v1019_v34, %v997_v0 }
 0x12e   : > { %1848 = vmatpush.msrb.mxu2 %v2084_v36  ;;  %1864 = vmatpush.msrb.mxu3 %v2084_v36 }
 0x130   : > { %1849 = vmatpush.msrb.mxu2 %v2084_v36  ;;  %1865 = vmatpush.msrb.mxu3 %v2084_v36 }
 0x132   : > { %1850 = vmatpush.msrb.mxu2 %v2084_v36  ;;  %1866 = vmatpush.msrb.mxu3 %v2084_v36 }
 0x134   : > { %v999_v49 = vpop.f32.mrf.mxu2  ;;  %1851 = vmatpush.msrb.mxu2 %v2084_v36  ;;  %1867 = vmatpush.msrb.mxu3 %v2084_v36 }
 0x136   : > { %v953_v62 = vpop.f32.mrf.mxu0  ;;  %v976_v14 = vpop.f32.mrf.mxu1 }
 0x137   : > { %v977_v15 = vadd.f32 %v976_v14, %v953_v62 }
 0x139   : > { %v1000_v11 = vadd.f32 %v999_v49, %v977_v15 }
 0x13e   : > { %v1022_v44 = vpop.f32.mrf.mxu3 }
 0x13f   : > { %v1023_v18 = vadd.f32 %v1022_v44, %v1000_v11 }
 0x144   : > { %v1088_v48 = vpop.f32.mrf.mxu2 }
 0x146   : > { %v1042_v4 = vpop.f32.mrf.mxu0  ;;  %v1065_v60 = vpop.f32.mrf.mxu1 }
 0x147   : > { %v1111_v20 = vpop.f32.mrf.mxu3  ;;  %v1043_v37 = vadd.f32 %v1042_v4, %v1020_v31 }
 0x149   : > { %v1066_v21 = vadd.f32 %v1065_v60, %v1043_v37 }
 0x14b   : > { %v1089_v55 = vadd.f32 %v1088_v48, %v1066_v21 }
 0x14d   : > { %v1112_v6 = vadd.f32 %v1111_v20, %v1089_v55 }
 0x151   : > { %v1045_v26 = vpop.f32.mrf.mxu0  ;;  %v1068_v9 = vpop.f32.mrf.mxu1 }
 0x152   : > { %v1046_v22 = vadd.f32 %v1045_v26, %v1023_v18 }
 0x154   : > { %v1069_v35 = vadd.f32 %v1068_v9, %v1046_v22 }
 0x158   : > { %v1091_v39 = vpop.f32.mrf.mxu2  ;;  %v1114_v53 = vpop.f32.mrf.mxu3 }
 0x159   : > { %v1092_v61 = vadd.f32 %v1091_v39, %v1069_v35 }
 0x15b   : > { %v1115_v8 = vadd.f32 %v1114_v53, %v1092_v61  ;;  %v1134_v25 = vpop.f32.mrf.mxu0  ;;  %v1157_v17 = vpop.f32.mrf.mxu1 }
 0x15c   : > { %v1158_v51 = vadd.f32 %v1157_v17, %v1134_v25 }
 0x15d   : > { %1332 = vmatpush.msra.mxu0 %v1115_v8 }
 0x15f   : > { %1333 = vmatpush.msra.mxu0 %v1112_v6 }
 0x160   : > { %1819 = vmatmul.msk.f32.vlgmr.msra.gmra.mxu0 %vm1305_vm3, %v1301_v46 }
 0x161   : > { %1450 = vmatpush.msrb.mxu0 %v2084_v36 }
 0x162   : > { %v1180_v59 = vpop.f32.mrf.mxu2  ;;  %v1203_v32 = vpop.f32.mrf.mxu3 }
 0x163   : > { %v1181_v27 = vadd.f32 %v1180_v59, %v1158_v51  ;;  %1451 = vmatpush.msrb.mxu0 %v2084_v36 }
 0x165   : > { %v1137_v52 = vpop.f32.mrf.mxu0  ;;  %v1160_v10 = vpop.f32.mrf.mxu1  ;;  %v1204_v3 = vadd.f32 %v1203_v32, %v1181_v27  ;;  %1452 = vmatpush.msrb.mxu0 %v2084_v36 }
 0x166   : > { %v1161_v7 = vadd.f32 %v1160_v10, %v1137_v52 }
 0x167   : > { %1453 = vmatpush.msrb.mxu0 %v2084_v36 }
 0x168   : > { %1820 = vmatmul.msk.f32.gmra.mxu0 %vm1305_vm3, %v1302_v24 }
 0x169   : > { %1454 = vmatpush.msrb.mxu0 %v2084_v36 }
 0x16b   : > { %1455 = vmatpush.msrb.mxu0 %v2084_v36 }
 0x16c   : > { %v1183_v12 = vpop.f32.mrf.mxu2  ;;  %v1206_v42 = vpop.f32.mrf.mxu3 }
 0x16d   : > { %v1184_v33 = vadd.f32 %v1183_v12, %v1161_v7  ;;  %1456 = vmatpush.msrb.mxu0 %v2084_v36 }
 0x16f   : > { %v1226_v40 = vpop.f32.mrf.mxu0  ;;  %v1249_v41 = vpop.f32.mrf.mxu1  ;;  %v1207_v5 = vadd.f32 %v1206_v42, %v1184_v33  ;;  %1457 = vmatpush.msrb.mxu0 %v2084_v36 }
 0x170   : > { %1821 = vmatmul.msk.f32.gmra.mxu0 %vm1305_vm3, %v3448_v19  ;;  %v1227_v56 = vadd.f32 %v1226_v40, %v1204_v3 }
 0x171   : > { %1458 = vmatpush.msrb.mxu0 %v2084_v36 }
 0x172   : > { %v1250_v29 = vadd.f32 %v1249_v41, %v1227_v56 }
 0x173   : > { %1459 = vmatpush.msrb.mxu0 %v2084_v36 }
 0x175   : > { %1460 = vmatpush.msrb.mxu0 %v2084_v36 }
 0x176   : > { %v1272_v50 = vpop.f32.mrf.mxu2  ;;  %v1295_v47 = vpop.f32.mrf.mxu3 }
 0x177   : > { %v1229_v28 = vpop.f32.mrf.mxu0  ;;  %v1252_v13 = vpop.f32.mrf.mxu1  ;;  %v1273_v30 = vadd.f32 %v1272_v50, %v1250_v29  ;;  %1461 = vmatpush.msrb.mxu0 %v2084_v36 }
 0x178   : > { %1822 = vmatmul.msk.f32.gmra.mxu0 %vm1305_vm3, %v3455_v54  ;;  %v1230_v58 = vadd.f32 %v1229_v28, %v1207_v5 }
 0x179   : > { %v1296_v2 = vadd.f32 %v1295_v47, %v1273_v30  ;;  %1462 = vmatpush.msrb.mxu0 %v2084_v36 }
 0x17a   : > { %v1253_v16 = vadd.f32 %v1252_v13, %v1230_v58 }
 0x17b   : > { %1463 = vmatpush.msrb.mxu0 %v2084_v36 }
 0x17d   : > { %1464 = vmatpush.msrb.mxu0 %v2084_v36 }
 0x17e   : > { %v1275_v1 = vpop.f32.mrf.mxu2  ;;  %v1298_v57 = vpop.f32.mrf.mxu3 }
 0x17f   : > { %v1276_v38 = vadd.f32 %v1275_v1, %v1253_v16  ;;  %1465 = vmatpush.msrb.mxu0 %v2084_v36 }
 0x181   : > { %v1299_v63 = vadd.f32 %v1298_v57, %v1276_v38 }
 0x183   : > { %1361 = vmatpush.msra.mxu1 %v1299_v63 }
 0x185   : > { %1362 = vmatpush.msra.mxu1 %v1296_v2 }
 0x186   : > { %1823 = vmatmul.msk.f32.vlgmr.msra.gmra.mxu1 %vm1305_vm3, %v1301_v46 }
 0x187   : > { %1479 = vmatpush.msrb.mxu1 %v2084_v36 }
 0x189   : > { %1480 = vmatpush.msrb.mxu1 %v2084_v36 }
 0x18b   : > { %1481 = vmatpush.msrb.mxu1 %v2084_v36 }
 0x18d   : > { %1482 = vmatpush.msrb.mxu1 %v2084_v36 }
 0x18e   : > { %1824 = vmatmul.msk.f32.gmra.mxu1 %vm1305_vm3, %v1302_v24 }
 0x18f   : > { %1483 = vmatpush.msrb.mxu1 %v2084_v36 }
 0x191   : > { %1484 = vmatpush.msrb.mxu1 %v2084_v36 }
 0x193   : > { %1485 = vmatpush.msrb.mxu1 %v2084_v36 }
 0x195   : > { %1486 = vmatpush.msrb.mxu1 %v2084_v36 }
 0x196   : > { %1825 = vmatmul.msk.f32.gmra.mxu1 %vm1305_vm3, %v3448_v19 }
 0x197   : > { %1487 = vmatpush.msrb.mxu1 %v2084_v36 }
 0x199   : > { %1488 = vmatpush.msrb.mxu1 %v2084_v36 }
 0x19b   : > { %1489 = vmatpush.msrb.mxu1 %v2084_v36 }
 0x19d   : > { %1490 = vmatpush.msrb.mxu1 %v2084_v36 }
 0x19e   : > { %1826 = vmatmul.msk.f32.gmra.mxu1 %vm1305_vm3, %v3455_v54 }
 0x19f   : > { %1491 = vmatpush.msrb.mxu1 %v2084_v36 }
 0x1a1   : > { %1492 = vmatpush.msrb.mxu1 %v2084_v36 }
 0x1a3   : > { %1493 = vmatpush.msrb.mxu1 %v2084_v36 }
 0x1a5   : > { %1494 = vmatpush.msrb.mxu1 %v2084_v36 }
 0x1dd   : > { %v1335_v43 = vpop.f32.mrf.mxu0 }
 0x1de   : > { %v1442_v34 = vmul.f32 %v1335_v43, %v1335_v43  ;;  %1400 = vmatmul.f32.vlgmr.msra.gmra.mxu2 %v1335_v43 }
 0x1e0   : > { %1466 = vmatmul.f32.vlgmr.msrb.gmra.mxu0 %v1442_v34 }
 0x1e5   : > { %v1338_v62 = vpop.f32.mrf.mxu0 }
 0x1e6   : > { %1403 = vmatmul.f32.gmra.mxu2 %v1338_v62  ;;  %v1444_v45 = vmul.f32 %v1338_v62, %v1338_v62 }
 0x1e8   : > { %1469 = vmatmul.f32.gmra.mxu0 %v1444_v45 }
 0x1ed   : > { %v1341_v14 = vpop.f32.mrf.mxu0 }
 0x1ee   : > { %1406 = vmatmul.f32.gmra.mxu2 %v1341_v14  ;;  %v1446_v44 = vmul.f32 %v1341_v14, %v1341_v14 }
 0x1f0   : > { %1472 = vmatmul.f32.gmra.mxu0 %v1446_v44 }
 0x1f5   : > { %v1344_v4 = vpop.f32.mrf.mxu0 }
 0x1f6   : > { %1409 = vmatmul.f32.gmra.mxu2 %v1344_v4  ;;  %v1448_v49 = vmul.f32 %v1344_v4, %v1344_v4 }
 0x1fe   : > { %1475 = vmatmul.f32.vlgmr.msrb.gmra.mxu2 %v1448_v49 }
 0x203   : > { %v1364_v23 = vpop.f32.mrf.mxu1 }
 0x204   : > { %v1376_v60 = vpack.c.bf16 %v1364_v23, %v1335_v43  ;;  %v1443_v15 = vmul.f32 %v1364_v23, %v1364_v23  ;;  %1429 = vmatmul.f32.vlgmr.msra.gmra.mxu3 %v1364_v23 }
 0x206   : > { %1380 = vst [vmem:[%s381_s22] sm:$0xff] %v1376_v60  ;;  %1495 = vmatmul.f32.vlgmr.msrb.gmra.mxu1 %v1443_v15 }
 0x20b   : > { %v1367_v0 = vpop.f32.mrf.mxu1 }
 0x20c   : > { %v1377_v31 = vpack.c.bf16 %v1367_v0, %v1338_v62  ;;  %1432 = vmatmul.f32.gmra.mxu3 %v1367_v0  ;;  %v1445_v11 = vmul.f32 %v1367_v0, %v1367_v0 }
 0x20e   : > { %1381 = vst [vmem:[%s381_s22 + $0x8] sm:$0xff] %v1377_v31  ;;  %1498 = vmatmul.f32.gmra.mxu1 %v1445_v11 }
 0x213   : > { %v1370_v48 = vpop.f32.mrf.mxu1 }
 0x214   : > { %v1378_v20 = vpack.c.bf16 %v1370_v48, %v1341_v14  ;;  %1435 = vmatmul.f32.gmra.mxu3 %v1370_v48  ;;  %v1447_v18 = vmul.f32 %v1370_v48, %v1370_v48 }
 0x216   : > { %1382 = vst [vmem:[%s381_s22 + $0x10] sm:$0xff] %v1378_v20  ;;  %1501 = vmatmul.f32.gmra.mxu1 %v1447_v18 }
 0x21b   : > { %v1373_v37 = vpop.f32.mrf.mxu1 }
 0x21c   : > { %v1379_v26 = vpack.c.bf16 %v1373_v37, %v1344_v4  ;;  %1438 = vmatmul.f32.gmra.mxu3 %v1373_v37  ;;  %v1449_v22 = vmul.f32 %v1373_v37, %v1373_v37 }
 0x21e   : > { %1383 = vst [vmem:[%s381_s22 + $0x18] sm:$0xff] %v1379_v26 }
 0x224   : > { %1504 = vmatmul.f32.vlgmr.msrb.gmra.mxu3 %v1449_v22 }
 0x25d   : > { %v1467_v9 = vpop.f32.mrf.mxu0 }
 0x261   : > { %v1401_v21 = vpop.f32.mrf.mxu2 }
 0x265   : > { %v1470_v55 = vpop.f32.mrf.mxu0 }
 0x269   : > { %v1404_v8 = vpop.f32.mrf.mxu2 }
 0x26d   : > { %v1473_v59 = vpop.f32.mrf.mxu0 }
 0x271   : > { %v1407_v32 = vpop.f32.mrf.mxu2 }
 0x279   : > { %v1410_v42 = vpop.f32.mrf.mxu2 }
 0x281   : > { %v1476_v51 = vpop.f32.mrf.mxu2 }
 0x283   : > { %v1496_v35 = vpop.f32.mrf.mxu1 }
 0x284   : > { %v1497_v39 = vadd.f32 %v1496_v35, %v1467_v9 }
 0x287   : > { %v1430_v53 = vpop.f32.mrf.mxu3 }
 0x288   : > { %v1431_v61 = vadd.f32 %v1430_v53, %v1401_v21 }
 0x28b   : > { %v1499_v25 = vpop.f32.mrf.mxu1 }
 0x28c   : > { %v1500_v6 = vadd.f32 %v1499_v25, %v1470_v55 }
 0x28f   : > { %v1433_v17 = vpop.f32.mrf.mxu3 }
 0x290   : > { %v1434_v46 = vadd.f32 %v1433_v17, %v1404_v8 }
 0x293   : > { %v1502_v52 = vpop.f32.mrf.mxu1 }
 0x294   : > { %v1503_v24 = vadd.f32 %v1502_v52, %v1473_v59 }
 0x297   : > { %v1436_v10 = vpop.f32.mrf.mxu3 }
 0x298   : > { %v1437_v12 = vadd.f32 %v1436_v10, %v1407_v32 }
 0x29f   : > { %v1439_v19 = vpop.f32.mrf.mxu3 }
 0x2a0   : > { %v1440_v40 = vadd.f32 %v1439_v19, %v1410_v42 }
 0x2a4   : > { %1511 = sbr.rel (%p1827_p10) target bundleno = 690 (0x2b2), region = 48 }
 0x2a7   : > { %v1505_v7 = vpop.f32.mrf.mxu3 }
 0x2a8   : > { %v1506_v41 = vadd.f32 %v1505_v7, %v1476_v51 }
 0x2a9   : > { %vm1512_vm4 = vcmask 7168   ;;  %v2085_v27 = vmov 0.0  }
 0x2aa   : > { %1513 = vst.msk [vmem:[#allocation2] sm:$0xff] %vm1512_vm4, %v2085_v27 }
 0x2ab   : > { %1514 = vst.msk [vmem:[#allocation2 + $0x8] sm:$0xff] %vm1512_vm4, %v2085_v27 }
 0x2ac   : > { %1515 = vst.msk [vmem:[#allocation2 + $0x10] sm:$0xff] %vm1512_vm4, %v2085_v27 }
 0x2ad   : > { %1516 = vst.msk [vmem:[#allocation2 + $0x18] sm:$0xff] %vm1512_vm4, %v2085_v27 }
 0x2ae   : > { %1517 = vst.msk [vmem:[#allocation3] sm:$0xff] %vm1512_vm4, %v2085_v27 }
 0x2af   : > { %1518 = vst.msk [vmem:[#allocation3 + $0x8] sm:$0xff] %vm1512_vm4, %v2085_v27 }
 0x2b0   : > { %1519 = vst.msk [vmem:[#allocation3 + $0x10] sm:$0xff] %vm1512_vm4, %v2085_v27 }
 0x2b1   : > { %1520 = vst.msk [vmem:[#allocation3 + $0x18] sm:$0xff] %vm1512_vm4, %v2085_v27 }
 0x2b2 PF: > { %v1521_v33 = vld [vmem:[#allocation2] sm:$0xff]  ;;  %vm1529_vm5 = vcmask 7168   ;;  %v1522_v50 = vld [vmem:[#allocation2 + $0x8] sm:$0xff]  ;;  %p1828_p11 = scmp.ne.s32.totalorder %s2063_s27, 1 }
 0x2b3   : > { %v1523_v47 = vld [vmem:[#allocation2 + $0x10] sm:$0xff]  ;;  %v1525_v54 = vadd.f32 %v1521_v33, %v1431_v61  ;;  %v1526_v3 = vadd.f32 %v1522_v50, %v1434_v46 }
 0x2b4   : > { %v1527_v5 = vadd.f32 %v1523_v47, %v1437_v12  ;;  %v1524_v28 = vld [vmem:[#allocation2 + $0x18] sm:$0xff] }
 0x2b5   : > { %v1534_v56 = vld [vmem:[#allocation3] sm:$0xff]  ;;  %v1528_v13 = vadd.f32 %v1524_v28, %v1440_v40  ;;  %1530 = vst.msk [vmem:[#allocation2] sm:$0xff] %vm1529_vm5, %v1525_v54 }
 0x2b6   : > { %v1535_v58 = vld [vmem:[#allocation3 + $0x8] sm:$0xff]  ;;  %v1538_v16 = vadd.f32 %v1534_v56, %v1497_v39  ;;  %1531 = vst.msk [vmem:[#allocation2 + $0x8] sm:$0xff] %vm1529_vm5, %v1526_v3 }
 0x2b7   : > { %v1536_v29 = vld [vmem:[#allocation3 + $0x10] sm:$0xff]  ;;  %v1539_v30 = vadd.f32 %v1535_v58, %v1500_v6  ;;  %1532 = vst.msk [vmem:[#allocation2 + $0x10] sm:$0xff] %vm1529_vm5, %v1527_v5 }
 0x2b8   : > { %v1537_v1 = vld [vmem:[#allocation3 + $0x18] sm:$0xff]  ;;  %v1540_v38 = vadd.f32 %v1536_v29, %v1503_v24  ;;  %1533 = vst.msk [vmem:[#allocation2 + $0x18] sm:$0xff] %vm1529_vm5, %v1528_v13  ;;  %1549 = sbr.rel (%p1828_p11) target bundleno = 741 (0x2e5), region = 52 }
 0x2b9   : > { %v1541_v36 = vadd.f32 %v1537_v1, %v1506_v41  ;;  %1542 = vst.msk [vmem:[#allocation3] sm:$0xff] %vm1529_vm5, %v1538_v16 }
 0x2ba   : > { %1543 = vst.msk [vmem:[#allocation3 + $0x8] sm:$0xff] %vm1529_vm5, %v1539_v30 }
 0x2bb   : > { %1544 = vst.msk [vmem:[#allocation3 + $0x10] sm:$0xff] %vm1529_vm5, %v1540_v38 }
 0x2bc   : > { %1545 = vst.msk [vmem:[#allocation3 + $0x18] sm:$0xff] %vm1529_vm5, %v1541_v36 }
 0x2bd   : > { %v1550_v57 = vld [vmem:[#allocation2] sm:$0xff]  ;;  %v1551_v34 = vld [vmem:[#allocation2 + $0x8] sm:$0xff]  ;;  %v1624_v16 = vld [vmem:[%s3661_s4 + $0x10] sm:$0xff] }
 0x2be   : > { %v3576_v2 = vmul.f32 0.001953125, %v1550_v57  ;;  %v3578_v45 = vmul.f32 0.001953125, %v1551_v34  ;;  %v1552_v44 = vld [vmem:[#allocation2 + $0x10] sm:$0xff]  ;;  %v1622_v3 = vld [vmem:[%s3661_s4] sm:$0xff]  ;;  %v1623_v56 = vld [vmem:[%s3661_s4 + $0x8] sm:$0xff] }
 0x2bf   : > { %v3582_v23 = vmul.f32 0.001953125, %v1552_v44  ;;  %v1553_v15 = vld [vmem:[#allocation2 + $0x18] sm:$0xff]  ;;  %v1635_v44 = vld [vmem:[%s3662_s5 + $0x8] sm:$0xff] }
 0x2c0   : > { %v1558_v63 = vld [vmem:[#allocation3] sm:$0xff]  ;;  %v1566_v49 = vmul.f32 %v3576_v2, %v3576_v2  ;;  %v1567_v31 = vmul.f32 %v3578_v45, %v3578_v45  ;;  %v3586_v11 = vmul.f32 0.001953125, %v1553_v15  ;;  %v1625_v36 = vld [vmem:[%s3661_s4 + $0x18] sm:$0xff] }
 0x2c1   : > { %v1562_v43 = vmul.f32 0.001953125, %v1558_v63  ;;  %v1559_v62 = vld [vmem:[#allocation3 + $0x8] sm:$0xff]  ;;  %v1568_v18 = vmul.f32 %v3582_v23, %v3582_v23 }
 0x2c2   : > { %v1563_v14 = vmul.f32 0.001953125, %v1559_v62  ;;  %v1560_v4 = vld [vmem:[#allocation3 + $0x10] sm:$0xff]  ;;  %v1569_v26 = vmul.f32 %v3586_v11, %v3586_v11 }
 0x2c3   : > { %v1564_v60 = vmul.f32 0.001953125, %v1560_v4  ;;  %v1561_v0 = vld [vmem:[#allocation3 + $0x18] sm:$0xff]  ;;  %v1570_v20 = vsub.f32 %v1562_v43, %v1566_v49  ;;  %v1634_v43 = vld [vmem:[%s3662_s5] sm:$0xff] }
 0x2c4   : > { %v1565_v48 = vmul.f32 0.001953125, %v1561_v0  ;;  %v1571_v37 = vsub.f32 %v1563_v14, %v1567_v31  ;;  %v1637_v0 = vld [vmem:[%s3662_s5 + $0x18] sm:$0xff] }
 0x2c5   : > { %v1574_v22 = vmax.f32 %v1570_v20, 0.0  ;;  %v1572_v9 = vsub.f32 %v1564_v60, %v1568_v18  ;;  %v1636_v60 = vld [vmem:[%s3662_s5 + $0x10] sm:$0xff] }
 0x2c6   : > { %v1575_v21 = vmax.f32 %v1571_v37, 0.0  ;;  %v1573_v35 = vsub.f32 %v1565_v48, %v1569_v26 }
 0x2c7   : > { %v1578_v39 = vadd.f32 1e-05, %v1574_v22  ;;  %v1576_v53 = vmax.f32 %v1572_v9, 0.0 }
 0x2c8   : > { %v1579_v55 = vadd.f32 1e-05, %v1575_v21  ;;  %v1577_v61 = vmax.f32 %v1573_v35, 0.0 }
 0x2c9   : > { %2033 = vrsqrt.f32 %v1578_v39  ;;  %v1580_v8 = vadd.f32 1e-05, %v1576_v53  ;;  %vm1588_vm6 = vweird.f32 %v1578_v39 }
 0x2ca   : > { %2035 = vrsqrt.f32 %v1579_v55  ;;  %v1581_v25 = vadd.f32 1e-05, %v1577_v61  ;;  %vm1598_vm8 = vweird.f32 %v1579_v55 }
 0x2cb   : > { %2037 = vrsqrt.f32 %v1580_v8  ;;  %vm1608_vm10 = vweird.f32 %v1580_v8 }
 0x2cc   : > { %2039 = vrsqrt.f32 %v1581_v25  ;;  %vm1618_vm13 = vweird.f32 %v1581_v25 }
 0x2cf   : > { %v2034_v6 = vpop.eup %2033 }
 0x2d0   : > { %v2036_v17 = vpop.eup %2035  ;;  %v1583_v46 = vmul.f32 %v2034_v6, %v1578_v39  ;;  %vm1589_vm7 = vweird.f32 %v2034_v6 }
 0x2d1   : > { %v2038_v59 = vpop.eup %2037  ;;  %v1593_v32 = vmul.f32 %v2036_v17, %v1579_v55  ;;  %vm1599_vm9 = vweird.f32 %v2036_v17  ;;  %vm3592_vm12 = vmor %vm1588_vm6, %vm1589_vm7 }
 0x2d2   : > { %v2040_v52 = vpop.eup %2039  ;;  %v1584_v24 = vmul.f32 %v2034_v6, %v1583_v46  ;;  %v1603_v10 = vmul.f32 %v2038_v59, %v1580_v8  ;;  %vm1609_vm11 = vweird.f32 %v2038_v59  ;;  %vm1600_vm15 = vmor %vm1598_vm8, %vm1599_vm9 }
 0x2d3   : > { %v1594_v12 = vmul.f32 %v2036_v17, %v1593_v32  ;;  %v1613_v42 = vmul.f32 %v2040_v52, %v1581_v25  ;;  %vm1619_vm14 = vweird.f32 %v2040_v52  ;;  %vm1610_vm0 = vmor %vm1608_vm10, %vm1609_vm11 }
 0x2d4   : > { %v1585_v19 = vmul.f32 0.5, %v1584_v24  ;;  %v1604_v40 = vmul.f32 %v2038_v59, %v1603_v10  ;;  %vm1620_vm1 = vmor %vm1618_vm13, %vm1619_vm14 }
 0x2d5   : > { %v1595_v51 = vmul.f32 0.5, %v1594_v12  ;;  %v1614_v7 = vmul.f32 %v2040_v52, %v1613_v42 }
 0x2d6   : > { %v1586_v41 = vsub.f32 1.5, %v1585_v19  ;;  %v1605_v27 = vmul.f32 0.5, %v1604_v40 }
 0x2d7   : > { %v1596_v50 = vsub.f32 1.5, %v1595_v51  ;;  %v1615_v47 = vmul.f32 0.5, %v1614_v7 }
 0x2d8   : > { %v1587_v54 = vmul.f32 %v2034_v6, %v1586_v41  ;;  %v1606_v5 = vsub.f32 1.5, %v1605_v27 }
 0x2d9   : > { %v1597_v28 = vmul.f32 %v2036_v17, %v1596_v50  ;;  %v1616_v58 = vsub.f32 1.5, %v1615_v47 }
 0x2da   : > { %v1591_v13 = vsel %vm3592_vm12, %v2034_v6, %v1587_v54  ;;  %v1607_v29 = vmul.f32 %v2038_v59, %v1606_v5 }
 0x2db   : > { %v1626_v1 = vmul.f32 %v1622_v3, %v1591_v13  ;;  %v1601_v30 = vsel %vm1600_vm15, %v2036_v17, %v1597_v28  ;;  %v1617_v38 = vmul.f32 %v2040_v52, %v1616_v58 }
 0x2dc   : > { %v1627_v57 = vmul.f32 %v1623_v56, %v1601_v30  ;;  %v1611_v63 = vsel %vm1610_vm0, %v2038_v59, %v1607_v29 }
 0x2dd   : > { %1630 = vst.msk [vmem:[%s2196_s15] sm:$0xff] %vm1529_vm5, %v1626_v1  ;;  %v1628_v34 = vmul.f32 %v1624_v16, %v1611_v63  ;;  %v1621_v62 = vsel %vm1620_vm1, %v2040_v52, %v1617_v38  ;;  %v1638_v14 = vmul.f32 %v1626_v1, %v3576_v2 }
 0x2de   : > { %1631 = vst.msk [vmem:[%s2196_s15 + $0x8] sm:$0xff] %vm1529_vm5, %v1627_v57  ;;  %v1629_v4 = vmul.f32 %v1625_v36, %v1621_v62  ;;  %v1639_v49 = vmul.f32 %v1627_v57, %v3578_v45 }
 0x2df   : > { %1632 = vst.msk [vmem:[%s2196_s15 + $0x10] sm:$0xff] %vm1529_vm5, %v1628_v34  ;;  %v1642_v15 = vsub.f32 %v1634_v43, %v1638_v14  ;;  %v1640_v2 = vmul.f32 %v1628_v34, %v3582_v23 }
 0x2e0   : > { %1633 = vst.msk [vmem:[%s2196_s15 + $0x18] sm:$0xff] %vm1529_vm5, %v1629_v4  ;;  %v1643_v31 = vsub.f32 %v1635_v44, %v1639_v49  ;;  %v1641_v48 = vmul.f32 %v1629_v4, %v3586_v11 }
 0x2e1   : > { %1646 = vst.msk [vmem:[%s2208_s18] sm:$0xff] %vm1529_vm5, %v1642_v15  ;;  %v1644_v45 = vsub.f32 %v1636_v60, %v1640_v2 }
 0x2e2   : > { %1647 = vst.msk [vmem:[%s2208_s18 + $0x8] sm:$0xff] %vm1529_vm5, %v1643_v31  ;;  %v1645_v20 = vsub.f32 %v1637_v0, %v1641_v48 }
 0x2e3   : > { %1648 = vst.msk [vmem:[%s2208_s18 + $0x10] sm:$0xff] %vm1529_vm5, %v1644_v45 }
 0x2e4   : > { %1649 = vst.msk [vmem:[%s2208_s18 + $0x18] sm:$0xff] %vm1529_vm5, %v1645_v20 }
 0x2e5 PF: > { %s19_s9 = sadd.s32 1, %s2079_s9   ;;  %s3674_s27 = smov %s2071_s29 }
 0x2e6   : > { %p16_p12 = scmp.ge.s32.totalorder %s19_s9, 6   ;;  %s3675_s28 = smov %s2075_s30 }
 0x2e7   : > { %s3676_s29 = smov %s3679_s10  ;;  %s3677_s30 = smov %s3683_s11 }
 0x2e8   :  { %18 = sbr.rel (!%p16_p12) target bundleno = 3 (0x3), region = 109 }

</bundles_post_ra>
